<compile_context>
chip_gen: v7x
topology: tpu7x:2x2x1
jax: 0.10.0
libtpu: 0.0.40
codegen_flags: <defaults>
</compile_context>

<pallas_src>
import functools

import jax
import jax.numpy as jnp
from jax import lax
from jax.experimental import pallas as pl
from jax.experimental.pallas import tpu as pltpu

_LANE = 128
_SUB = 8
_VMEM_TILE_BUDGET = 2 << 20   # f32 result tile + bf16 im2col scratch budget (bytes)


def _round_up(v, m):
    return (v + m - 1) // m * m


def _cdiv(a, b):
    return -(-a // b)


def _const_spec(shape, index_map):
    """BlockSpec for a grid-invariant input: single pipeline buffer when supported."""
    if hasattr(pl, "Buffered"):
        try:
            return pl.BlockSpec(shape, index_map, pipeline_mode=pl.Buffered(1))
        except TypeError:
            pass
    return pl.BlockSpec(shape, index_map)


# ----------------------------- Pallas kernel -----------------------------

def _make_stage_kernel(stride, plane_h, th, w_out, cin_p, cout_p, dual,
                       has_identity, id_off, mask_hw):
    """One fused 3x3-conv stage.

    Ref layout (batch dim squeezed by the BlockSpecs):
      plane_ref : (stride*stride*plane_h, ws, cin_p) bf16, resident per image.
                  plane p occupies rows [p*plane_h, (p+1)*plane_h).
      w_ref     : (n_branch, 9*cin_p, cout_p) bf16 (un-scaled conv weights)
      aff_ref   : (4 or 6, cout_p) f32, rows = [s0, b0, s1, b1, (s_ds, b_ds)]
      id_ref    : (hid, wid, cout_p) bf16, resident per image (stage 2 only)
      out refs  : (th, w_out, cout_p), 1 or 2 outputs
      col_ref   : scratch (th*w_out, 9*cin_p) bf16  (in-VMEM im2col)

      main branch: relu(relu(conv*s0 + b0)*s1 + b1 [+ identity])
      ds branch  : relu(conv_ds*s_ds + b_ds)
      mask_hw    : (Ho, Wo) -> outputs live in a zero-halo frame; positions
                   outside [1, Ho] x [1, Wo] are forced to zero.
    """
    def kernel(*refs):
        plane_ref, w_ref, aff_ref = refs[0], refs[1], refs[2]
        idx = 3
        id_ref = None
        if has_identity:
            id_ref = refs[idx]
            idx += 1
        o_ref = refs[idx]
        o2_ref = refs[idx + 1] if dual else None
        col_ref = refs[-1]

        r0 = pl.program_id(1) * th

        # ---- in-VMEM im2col: 9 unit-stride tap slices -> (th*w_out, 9*cin_p) ----
        for ky in range(3):
            for kx in range(3):
                p_idx = (ky % stride) * stride + (kx % stride)
                tap = plane_ref[
                    pl.ds(p_idx * plane_h + r0 + ky // stride, th),
                    pl.ds(kx // stride, w_out), :]
                t_idx = ky * 3 + kx
                col_ref[:, t_idx * cin_p:(t_idx + 1) * cin_p] = (
                    tap.reshape(th * w_out, cin_p))
        col = col_ref[...]

        valid = None
        if mask_hw is not None:
            hv, wv = mask_hw
            rows = lax.broadcasted_iota(jnp.int32, (th, w_out, cout_p), 0) + r0
            cols = lax.broadcasted_iota(jnp.int32, (th, w_out, cout_p), 1)
            valid = (rows >= 1) & (rows <= hv) & (cols >= 1) & (cols <= wv)

        # ---- main branch: one deep-K MXU matmul + f32 epilogue ----
        acc = jnp.dot(col, w_ref[0], preferred_element_type=jnp.float32)
        t = jnp.maximum(acc * aff_ref[0:1, :] + aff_ref[1:2, :], 0.0)
        t = t * aff_ref[2:3, :] + aff_ref[3:4, :]
        if has_identity:
            idt = id_ref[pl.ds(id_off[0] + r0, th), pl.ds(id_off[1], w_out), :]
            t = t + idt.reshape(th * w_out, cout_p).astype(jnp.float32)
        t = jnp.maximum(t, 0.0).reshape(th, w_out, cout_p)
        if valid is not None:
            t = jnp.where(valid, t, 0.0)
        o_ref[...] = t.astype(o_ref.dtype)

        # ---- fused strided down-sample branch (shares the im2col scratch) ----
        if dual:
            acc2 = jnp.dot(col, w_ref[1], preferred_element_type=jnp.float32)
            u = jnp.maximum(acc2 * aff_ref[4:5, :] + aff_ref[5:6, :], 0.0)
            u = u.reshape(th, w_out, cout_p)
            if valid is not None:
                u = jnp.where(valid, u, 0.0)
            o2_ref[...] = u.astype(o2_ref.dtype)

    return kernel


def _conv_stage(planes, w, aff, identity, *, stride, th, n_tiles, w_out,
                dual, mask_hw, id_off, out_dtype):
    """One fused conv stage as a pallas_call over grid (N, row_tiles)."""
    n, plane_rows, ws, cin_p = planes.shape
    nb, kdim, cout_p = w.shape
    assert kdim == 9 * cin_p
    plane_h = plane_rows // (stride * stride)
    out_rows = n_tiles * th
    has_id = identity is not None

    kernel = _make_stage_kernel(stride, plane_h, th, w_out, cin_p, cout_p,
                                dual, has_id, id_off, mask_hw)

    out_block = pl.BlockSpec((None, th, w_out, cout_p), lambda i, j: (i, j, 0, 0))
    in_specs = [
        # stacked stride-parity planes: resident per image, reused across row tiles
        pl.BlockSpec((None, plane_rows, ws, cin_p), lambda i, j: (i, 0, 0, 0)),
        # grid-invariant weights / per-channel affines: single pipeline buffer
        _const_spec((nb, kdim, cout_p), lambda i, j: (0, 0, 0)),
        _const_spec(aff.shape, lambda i, j: (0, 0)),
    ]
    args = [planes, w, aff]
    if has_id:
        hid, wid, cid = identity.shape[1], identity.shape[2], identity.shape[3]
        in_specs.append(pl.BlockSpec((None, hid, wid, cid),
                                     lambda i, j: (i, 0, 0, 0)))
        args.append(identity)

    one_out = jax.ShapeDtypeStruct((n, out_rows, w_out, cout_p), out_dtype)
    if dual:
        out_shape = (one_out, one_out)
        out_specs = (out_block, out_block)
    else:
        out_shape = one_out
        out_specs = out_block

    flops = 2 * n * out_rows * w_out * kdim * nb * cout_p
    bytes_accessed = int(
        planes.size * 2 + w.size * 2 + aff.size * 4
        + (identity.size * 2 if has_id else 0)
        + (2 if dual else 1) * n * out_rows * w_out * cout_p
        * jnp.dtype(out_dtype).itemsize)

    return pl.pallas_call(
        kernel,
        out_shape=out_shape,
        grid_spec=pltpu.PrefetchScalarGridSpec(
            num_scalar_prefetch=0,
            grid=(n, n_tiles),
            in_specs=in_specs,
            out_specs=out_specs,
            scratch_shapes=[pltpu.VMEM((th * w_out, kdim), jnp.bfloat16)],
        ),
        compiler_params=pltpu.CompilerParams(
            dimension_semantics=("parallel", "parallel"),
            vmem_limit_bytes=64 * 1024 * 1024),
        cost_estimate=pl.CostEstimate(flops=flops, transcendentals=0,
                                      bytes_accessed=bytes_accessed),
    )(*args)


# ----------------------------- Module forward -----------------------------

@functools.partial(jax.jit, static_argnames=("stride", "row_tile"))
def resnet_reduction_block_forward(x_nchw, p, stride=2, row_tile=None):
    """Pallas forward of ResNetReductionBlock (inference-mode folded BN)."""
    s = int(stride)
    N, Cin, H, W = x_nchw.shape
    Cout = p["w1"].shape[-1]
    cin_p = _round_up(Cin, _LANE)
    cout_p = _round_up(Cout, _LANE)
    if s == 1 and Cin != Cout:
        raise ValueError("stride == 1 requires inplanes == planes (identity skip)")

    Ho = (H - 1) // s + 1          # 3x3 conv, padding=1
    Wo = (W - 1) // s + 1
    wo_pad = _round_up(Wo, _SUB)            # stage-2 output width (sublane aligned)
    wp2 = _round_up(wo_pad + 2, _SUB)       # stage-1 (halo-layout) output width

    # Row tiling: bound the f32 result tile + bf16 im2col scratch; keep >= 2 row
    # tiles at batch 1 so both v7x TensorCores have work; balance tile sizes.
    if row_tile is not None:
        th_max = int(row_tile)
    else:
        per_row = wp2 * (4 * cout_p + 2 * 9 * max(cin_p, cout_p))
        th_max = max(1, _VMEM_TILE_BUDGET // per_row)
    n2 = _cdiv(Ho, max(1, min(th_max, Ho)))
    if N == 1 and Ho >= 2:
        n2 = max(n2, 2)
    th = _cdiv(Ho, n2)
    ho_pad = n2 * th                        # stage-2 output rows (>= Ho)
    n1 = _cdiv(ho_pad + 2, th)
    hp2 = n1 * th                           # stage-1 (halo-layout) output rows

    # ---- stage-1 input: one fused cast+pad+transpose NCHW -> stacked stride-
    #      parity planes; plane (a,b) row i, col j = x[s*i + a - 1 - s, s*j + b - 1 - s]
    hs1, ws1 = hp2 + 2, wp2 + 2
    Hp, Wp = s * hs1, s * ws1
    xb = x_nchw.astype(jnp.bfloat16)        # cast before transpose: half the traffic
    xpad = jnp.pad(xb, ((0, 0), (0, cin_p - Cin),
                        (1 + s, Hp - (1 + s) - H), (1 + s, Wp - (1 + s) - W)))
    planes = (xpad.reshape(N, cin_p, hs1, s, ws1, s)
              .transpose(0, 3, 5, 2, 4, 1)          # (N, a, b, i, j, c)
              .reshape(N, s * s * hs1, ws1, cin_p))

    def prep_w(w, ci_p):
        w = jnp.pad(w, ((0, 0), (0, 0),
                        (0, ci_p - w.shape[2]), (0, cout_p - w.shape[3])))
        return w.reshape(9 * ci_p, cout_p).astype(jnp.bfloat16)

    def pad_c(v):
        return jnp.pad(v, (0, cout_p - v.shape[0]))

    # ---- stage 1: conv1 (+ fused strided down-sample), written directly in the
    #      zero-halo layout stage 2 consumes (no inter-stage pad pass) ----
    if s > 1:
        w_s1 = jnp.stack([prep_w(p["w1"], cin_p), prep_w(p["w_ds"], cin_p)])
        aff1 = jnp.stack([pad_c(p["s_c1"]), pad_c(p["b_c1"]),
                          pad_c(p["s_bn1"]), pad_c(p["b_bn1"]),
                          pad_c(p["s_ds"]), pad_c(p["b_ds"])]).astype(jnp.float32)
        plane2, identity = _conv_stage(
            planes, w_s1, aff1, None, stride=s, th=th, n_tiles=n1, w_out=wp2,
            dual=True, mask_hw=(Ho, Wo), id_off=None, out_dtype=jnp.bfloat16)
        id_off = (1, 1)
    else:
        w_s1 = prep_w(p["w1"], cin_p)[None]
        aff1 = jnp.stack([pad_c(p["s_c1"]), pad_c(p["b_c1"]),
                          pad_c(p["s_bn1"]), pad_c(p["b_bn1"])]).astype(jnp.float32)
        plane2 = _conv_stage(
            planes, w_s1, aff1, None, stride=1, th=th, n_tiles=n1, w_out=wp2,
            dual=False, mask_hw=(Ho, Wo), id_off=None, out_dtype=jnp.bfloat16)
        identity = planes                   # x itself (already in a halo layout)
        id_off = (2, 2)

    # ---- stage 2: conv2 + bn2 + residual add + relu ----
    w2 = prep_w(p["w2"], cout_p)[None]
    aff2 = jnp.stack([pad_c(p["s_c2"]), pad_c(p["b_c2"]),
                      pad_c(p["s_bn2"]), pad_c(p["b_bn2"])]).astype(jnp.float32)
    out = _conv_stage(
        plane2, w2, aff2, identity,
        stride=1, th=th, n_tiles=n2, w_out=wo_pad,
        dual=False, mask_hw=None, id_off=id_off, out_dtype=jnp.float32)

    # TODO(synk): return NHWC / bf16 directly when the caller allows it — that
    #             drops the final slice+transpose HBM pass and halves store traffic.
    out = out[:, :Ho, :Wo, :Cout]
    return jnp.transpose(out, (0, 3, 1, 2))                      # NHWC -> NCHW


# ----------------------------- Pure-JAX reference -----------------------------

def reference_forward(x_nchw, p, stride=2, compute_dtype=jnp.float32):
    """Reference; compute_dtype=bfloat16 mirrors the kernel's matmul numerics."""
    x = jnp.transpose(x_nchw, (0, 2, 3, 1)).astype(jnp.float32)
    cd = compute_dtype

    def conv(v, w, s):
        return lax.conv_general_dilated(
            v.astype(cd), w.astype(cd), (s, s), ((1, 1), (1, 1)),
            dimension_numbers=("NHWC", "HWIO", "NHWC"),
            preferred_element_type=jnp.float32)

    t = jax.nn.relu(conv(x, p["w1"], stride) * p["s_c1"] + p["b_c1"])
    t = jax.nn.relu(t * p["s_bn1"] + p["b_bn1"]).astype(cd)
    if stride > 1:
        identity = jax.nn.relu(conv(x, p["w_ds"], stride) * p["s_ds"] + p["b_ds"])
        identity = identity.astype(cd)
    else:
        identity = x.astype(cd)
    u = jax.nn.relu(conv(t, p["w2"], 1) * p["s_c2"] + p["b_c2"])
    u = u * p["s_bn2"] + p["b_bn2"] + identity.astype(jnp.float32)
    return jnp.transpose(jax.nn.relu(u), (0, 3, 1, 2))


# ----------------------------- Setup & test -----------------------------

def fold_bn(gamma, beta, mean, var, eps=1e-5):
    scale = gamma / jnp.sqrt(var + eps)
    return scale, beta - mean * scale


def make_params(key, inplanes, planes):
    ks = jax.random.split(key, 8)

    def bn_params(k, c):
        k1, k2, k3, k4 = jax.random.split(k, 4)
        gamma = jax.random.uniform(k1, (c,), jnp.float32, 0.5, 1.5)
        beta = jax.random.normal(k2, (c,), jnp.float32) * 0.1
        mean = jax.random.normal(k3, (c,), jnp.float32) * 0.1
        var = jax.random.uniform(k4, (c,), jnp.float32, 0.5, 1.5)
        return fold_bn(gamma, beta, mean, var)

    p = {}
    p["w1"] = jax.random.normal(ks[0], (3, 3, inplanes, planes), jnp.float32) * 0.1
    p["w2"] = jax.random.normal(ks[1], (3, 3, planes, planes), jnp.float32) * 0.1
    p["w_ds"] = jax.random.normal(ks[2], (3, 3, inplanes, planes), jnp.float32) * 0.1
    p["s_c1"], p["b_c1"] = bn_params(ks[3], planes)     # BN inside ConvNormAct conv1
    p["s_c2"], p["b_c2"] = bn_params(ks[4], planes)     # BN inside ConvNormAct conv2
    p["s_ds"], p["b_ds"] = bn_params(ks[5], planes)     # BN inside ConvNormAct down_sample
    p["s_bn1"], p["b_bn1"] = bn_params(ks[6], planes)   # self.bn1
    p["s_bn2"], p["b_bn2"] = bn_params(ks[7], planes)   # self.bn2
    return p


if __name__ == "__main__":
    key = jax.random.PRNGKey(0)
    kx_, kp_ = jax.random.split(key)

    N, inplanes, planes_, H, W, stride = 2, 4, 8, 16, 16, 2
    x = jax.random.normal(kx_, (N, inplanes, H, W), jnp.float32)   # NCHW as in PyTorch
    params = make_params(kp_, inplanes, planes_)

    out = jax.block_until_ready(
        resnet_reduction_block_forward(x, params, stride=stride))
    assert out.shape == (N, planes_, H // stride, W // stride), out.shape

    # check vs. a reference that mirrors the kernel's bf16-operand numerics
    ref_bf16 = jax.block_until_ready(
        reference_forward(x, params, stride=stride, compute_dtype=jnp.bfloat16))
    rel = float(jnp.max(jnp.abs(out - ref_bf16) / (1.0 + jnp.abs(ref_bf16))))
    assert rel < 2e-2, f"mismatch vs bf16-matched reference: {rel}"

    # loose sanity check vs. the full-f32 reference (bf16 matmul operands in kernel)
    ref_f32 = jax.block_until_ready(
        reference_forward(x, params, stride=stride, compute_dtype=jnp.float32))
    err32 = float(jnp.max(jnp.abs(out - ref_f32)))
    assert err32 < 1e-1, f"mismatch vs f32 reference: {err32}"

    print("KERNEL_OK")
</pallas_src>

<mosaic_0001>
module attributes {stable_mosaic.version = 11 : i64} {
  func.func @kernel(%arg0: i32, %arg1: i32, %arg2: memref<1x72x18x128xbf16, #tpu.memory_space<vmem>>, %arg3: memref<2x1152x128xbf16, #tpu.memory_space<vmem>>, %arg4: memref<6x128xf32, #tpu.memory_space<vmem>>, %arg5: memref<1x8x16x128xbf16, #tpu.memory_space<vmem>>, %arg6: memref<1x8x16x128xbf16, #tpu.memory_space<vmem>>, %arg7: memref<128x1152xbf16, #tpu.memory_space<vmem>>) attributes {dimension_semantics = [#tpu.dimension_semantics<parallel>, #tpu.dimension_semantics<parallel>], iteration_bounds = array<i64: 2, 2>, scalar_prefetch = 0 : i64, scratch_operands = 1 : i64, tpu.core_type = #tpu.core_type<tc>, window_params = [{transform_indices = @transform_0, window_bounds = array<i64: 1, 72, 18, 128>}, {pipeline_mode = #tpu.pipeline_mode<synchronous>, transform_indices = @transform_1, window_bounds = array<i64: 2, 1152, 128>}, {pipeline_mode = #tpu.pipeline_mode<synchronous>, transform_indices = @transform_2, window_bounds = array<i64: 6, 128>}, {transform_indices = @transform_3, window_bounds = array<i64: 1, 8, 16, 128>}, {transform_indices = @transform_4, window_bounds = array<i64: 1, 8, 16, 128>}]} {
    %c8_i32 = arith.constant 8 : i32
    %0 = arith.muli %arg1, %c8_i32 : i32
    %c0_i32 = arith.constant 0 : i32
    %1 = arith.addi %c0_i32, %0 : i32
    %c0_i32_0 = arith.constant 0 : i32
    %2 = arith.addi %1, %c0_i32_0 : i32
    %c0 = arith.constant 0 : index
    %3 = arith.index_cast %2 : i32 to index
    %c0_1 = arith.constant 0 : index
    %c0_2 = arith.constant 0 : index
    %4 = vector.load %arg2[%c0, %3, %c0_1, %c0_2] : memref<1x72x18x128xbf16, #tpu.memory_space<vmem>>, vector<1x8x16x128xbf16>
    %5 = vector.shape_cast %4 : vector<1x8x16x128xbf16> to vector<8x16x128xbf16>
    %6 = vector.shape_cast %5 : vector<8x16x128xbf16> to vector<128x128xbf16>
    %c0_3 = arith.constant 0 : index
    %c0_4 = arith.constant 0 : index
    %7 = vector.load %arg7[%c0_3, %c0_4] : memref<128x1152xbf16, #tpu.memory_space<vmem>>, vector<128x128xbf16>
    tpu.vector_store %arg7[%c0_3, %c0_4], %6 {strides = array<i32>} : memref<128x1152xbf16, #tpu.memory_space<vmem>>, vector<128x128xbf16>,
    %c18_i32 = arith.constant 18 : i32
    %8 = arith.addi %c18_i32, %0 : i32
    %c0_i32_5 = arith.constant 0 : i32
    %9 = arith.addi %8, %c0_i32_5 : i32
    %c0_6 = arith.constant 0 : index
    %10 = arith.index_cast %9 : i32 to index
    %c0_7 = arith.constant 0 : index
    %c0_8 = arith.constant 0 : index
    %11 = vector.load %arg2[%c0_6, %10, %c0_7, %c0_8] : memref<1x72x18x128xbf16, #tpu.memory_space<vmem>>, vector<1x8x16x128xbf16>
    %12 = vector.shape_cast %11 : vector<1x8x16x128xbf16> to vector<8x16x128xbf16>
    %13 = vector.shape_cast %12 : vector<8x16x128xbf16> to vector<128x128xbf16>
    %c0_9 = arith.constant 0 : index
    %c128 = arith.constant 128 : index
    %14 = vector.load %arg7[%c0_9, %c128] : memref<128x1152xbf16, #tpu.memory_space<vmem>>, vector<128x128xbf16>
    tpu.vector_store %arg7[%c0_9, %c128], %13 {strides = array<i32>} : memref<128x1152xbf16, #tpu.memory_space<vmem>>, vector<128x128xbf16>,
    %c0_i32_10 = arith.constant 0 : i32
    %15 = arith.addi %c0_i32_10, %0 : i32
    %c0_i32_11 = arith.constant 0 : i32
    %16 = arith.addi %15, %c0_i32_11 : i32
    %c0_12 = arith.constant 0 : index
    %17 = arith.index_cast %16 : i32 to index
    %c1 = arith.constant 1 : index
    %c0_13 = arith.constant 0 : index
    %18 = vector.load %arg2[%c0_12, %17, %c1, %c0_13] : memref<1x72x18x128xbf16, #tpu.memory_space<vmem>>, vector<1x8x16x128xbf16>
    %19 = vector.shape_cast %18 : vector<1x8x16x128xbf16> to vector<8x16x128xbf16>
    %20 = vector.shape_cast %19 : vector<8x16x128xbf16> to vector<128x128xbf16>
    %c0_14 = arith.constant 0 : index
    %c256 = arith.constant 256 : index
    %21 = vector.load %arg7[%c0_14, %c256] : memref<128x1152xbf16, #tpu.memory_space<vmem>>, vector<128x128xbf16>
    tpu.vector_store %arg7[%c0_14, %c256], %20 {strides = array<i32>} : memref<128x1152xbf16, #tpu.memory_space<vmem>>, vector<128x128xbf16>,
    %c36_i32 = arith.constant 36 : i32
    %22 = arith.addi %c36_i32, %0 : i32
    %c0_i32_15 = arith.constant 0 : i32
    %23 = arith.addi %22, %c0_i32_15 : i32
    %c0_16 = arith.constant 0 : index
    %24 = arith.index_cast %23 : i32 to index
    %c0_17 = arith.constant 0 : index
    %c0_18 = arith.constant 0 : index
    %25 = vector.load %arg2[%c0_16, %24, %c0_17, %c0_18] : memref<1x72x18x128xbf16, #tpu.memory_space<vmem>>, vector<1x8x16x128xbf16>
    %26 = vector.shape_cast %25 : vector<1x8x16x128xbf16> to vector<8x16x128xbf16>
    %27 = vector.shape_cast %26 : vector<8x16x128xbf16> to vector<128x128xbf16>
    %c0_19 = arith.constant 0 : index
    %c384 = arith.constant 384 : index
    %28 = vector.load %arg7[%c0_19, %c384] : memref<128x1152xbf16, #tpu.memory_space<vmem>>, vector<128x128xbf16>
    tpu.vector_store %arg7[%c0_19, %c384], %27 {strides = array<i32>} : memref<128x1152xbf16, #tpu.memory_space<vmem>>, vector<128x128xbf16>,
    %c54_i32 = arith.constant 54 : i32
    %29 = arith.addi %c54_i32, %0 : i32
    %c0_i32_20 = arith.constant 0 : i32
    %30 = arith.addi %29, %c0_i32_20 : i32
    %c0_21 = arith.constant 0 : index
    %31 = arith.index_cast %30 : i32 to index
    %c0_22 = arith.constant 0 : index
    %c0_23 = arith.constant 0 : index
    %32 = vector.load %arg2[%c0_21, %31, %c0_22, %c0_23] : memref<1x72x18x128xbf16, #tpu.memory_space<vmem>>, vector<1x8x16x128xbf16>
    %33 = vector.shape_cast %32 : vector<1x8x16x128xbf16> to vector<8x16x128xbf16>
    %34 = vector.shape_cast %33 : vector<8x16x128xbf16> to vector<128x128xbf16>
    %c0_24 = arith.constant 0 : index
    %c512 = arith.constant 512 : index
    %35 = vector.load %arg7[%c0_24, %c512] : memref<128x1152xbf16, #tpu.memory_space<vmem>>, vector<128x128xbf16>
    tpu.vector_store %arg7[%c0_24, %c512], %34 {strides = array<i32>} : memref<128x1152xbf16, #tpu.memory_space<vmem>>, vector<128x128xbf16>,
    %c36_i32_25 = arith.constant 36 : i32
    %36 = arith.addi %c36_i32_25, %0 : i32
    %c0_i32_26 = arith.constant 0 : i32
    %37 = arith.addi %36, %c0_i32_26 : i32
    %c0_27 = arith.constant 0 : index
    %38 = arith.index_cast %37 : i32 to index
    %c1_28 = arith.constant 1 : index
    %c0_29 = arith.constant 0 : index
    %39 = vector.load %arg2[%c0_27, %38, %c1_28, %c0_29] : memref<1x72x18x128xbf16, #tpu.memory_space<vmem>>, vector<1x8x16x128xbf16>
    %40 = vector.shape_cast %39 : vector<1x8x16x128xbf16> to vector<8x16x128xbf16>
    %41 = vector.shape_cast %40 : vector<8x16x128xbf16> to vector<128x128xbf16>
    %c0_30 = arith.constant 0 : index
    %c640 = arith.constant 640 : index
    %42 = vector.load %arg7[%c0_30, %c640] : memref<128x1152xbf16, #tpu.memory_space<vmem>>, vector<128x128xbf16>
    tpu.vector_store %arg7[%c0_30, %c640], %41 {strides = array<i32>} : memref<128x1152xbf16, #tpu.memory_space<vmem>>, vector<128x128xbf16>,
    %c0_i32_31 = arith.constant 0 : i32
    %43 = arith.addi %c0_i32_31, %0 : i32
    %c1_i32 = arith.constant 1 : i32
    %44 = arith.addi %43, %c1_i32 : i32
    %c0_32 = arith.constant 0 : index
    %45 = arith.index_cast %44 : i32 to index
    %c0_33 = arith.constant 0 : index
    %c0_34 = arith.constant 0 : index
    %46 = vector.load %arg2[%c0_32, %45, %c0_33, %c0_34] : memref<1x72x18x128xbf16, #tpu.memory_space<vmem>>, vector<1x8x16x128xbf16>
    %47 = vector.shape_cast %46 : vector<1x8x16x128xbf16> to vector<8x16x128xbf16>
    %48 = vector.shape_cast %47 : vector<8x16x128xbf16> to vector<128x128xbf16>
    %c0_35 = arith.constant 0 : index
    %c768 = arith.constant 768 : index
    %49 = vector.load %arg7[%c0_35, %c768] : memref<128x1152xbf16, #tpu.memory_space<vmem>>, vector<128x128xbf16>
    tpu.vector_store %arg7[%c0_35, %c768], %48 {strides = array<i32>} : memref<128x1152xbf16, #tpu.memory_space<vmem>>, vector<128x128xbf16>,
    %c18_i32_36 = arith.constant 18 : i32
    %50 = arith.addi %c18_i32_36, %0 : i32
    %c1_i32_37 = arith.constant 1 : i32
    %51 = arith.addi %50, %c1_i32_37 : i32
    %c0_38 = arith.constant 0 : index
    %52 = arith.index_cast %51 : i32 to index
    %c0_39 = arith.constant 0 : index
    %c0_40 = arith.constant 0 : index
    %53 = vector.load %arg2[%c0_38, %52, %c0_39, %c0_40] : memref<1x72x18x128xbf16, #tpu.memory_space<vmem>>, vector<1x8x16x128xbf16>
    %54 = vector.shape_cast %53 : vector<1x8x16x128xbf16> to vector<8x16x128xbf16>
    %55 = vector.shape_cast %54 : vector<8x16x128xbf16> to vector<128x128xbf16>
    %c0_41 = arith.constant 0 : index
    %c896 = arith.constant 896 : index
    %56 = vector.load %arg7[%c0_41, %c896] : memref<128x1152xbf16, #tpu.memory_space<vmem>>, vector<128x128xbf16>
    tpu.vector_store %arg7[%c0_41, %c896], %55 {strides = array<i32>} : memref<128x1152xbf16, #tpu.memory_space<vmem>>, vector<128x128xbf16>,
    %c0_i32_42 = arith.constant 0 : i32
    %57 = arith.addi %c0_i32_42, %0 : i32
    %c1_i32_43 = arith.constant 1 : i32
    %58 = arith.addi %57, %c1_i32_43 : i32
    %c0_44 = arith.constant 0 : index
    %59 = arith.index_cast %58 : i32 to index
    %c1_45 = arith.constant 1 : index
    %c0_46 = arith.constant 0 : index
    %60 = vector.load %arg2[%c0_44, %59, %c1_45, %c0_46] : memref<1x72x18x128xbf16, #tpu.memory_space<vmem>>, vector<1x8x16x128xbf16>
    %61 = vector.shape_cast %60 : vector<1x8x16x128xbf16> to vector<8x16x128xbf16>
    %62 = vector.shape_cast %61 : vector<8x16x128xbf16> to vector<128x128xbf16>
    %c0_47 = arith.constant 0 : index
    %c1024 = arith.constant 1024 : index
    %63 = vector.load %arg7[%c0_47, %c1024] : memref<128x1152xbf16, #tpu.memory_space<vmem>>, vector<128x128xbf16>
    tpu.vector_store %arg7[%c0_47, %c1024], %62 {strides = array<i32>} : memref<128x1152xbf16, #tpu.memory_space<vmem>>, vector<128x128xbf16>,
    %c0_48 = arith.constant 0 : index
    %c0_49 = arith.constant 0 : index
    %64 = vector.load %arg7[%c0_48, %c0_49] : memref<128x1152xbf16, #tpu.memory_space<vmem>>, vector<128x1152xbf16>
    %65 = tpu.iota {dimensions = array<i32: 0>} : vector<8x16x128xi32>
    %66 = vector.broadcast %0 : i32 to vector<8x16x128xi32>
    %67 = arith.addi %65, %66 : vector<8x16x128xi32>
    %68 = tpu.iota {dimensions = array<i32: 1>} : vector<8x16x128xi32>
    %c1_i32_50 = arith.constant 1 : i32
    %69 = vector.broadcast %c1_i32_50 : i32 to vector<8x16x128xi32>
    %70 = arith.cmpi sge, %67, %69 : vector<8x16x128xi32>
    %c8_i32_51 = arith.constant 8 : i32
    %71 = vector.broadcast %c8_i32_51 : i32 to vector<8x16x128xi32>
    %72 = arith.cmpi sle, %67, %71 : vector<8x16x128xi32>
    %73 = arith.andi %70, %72 : vector<8x16x128xi1>
    %c1_i32_52 = arith.constant 1 : i32
    %74 = vector.broadcast %c1_i32_52 : i32 to vector<8x16x128xi32>
    %75 = arith.cmpi sge, %68, %74 : vector<8x16x128xi32>
    %76 = arith.andi %73, %75 : vector<8x16x128xi1>
    %c8_i32_53 = arith.constant 8 : i32
    %77 = vector.broadcast %c8_i32_53 : i32 to vector<8x16x128xi32>
    %78 = arith.cmpi sle, %68, %77 : vector<8x16x128xi32>
    %79 = arith.andi %76, %78 : vector<8x16x128xi1>
    %c0_54 = arith.constant 0 : index
    %c0_55 = arith.constant 0 : index
    %c0_56 = arith.constant 0 : index
    %80 = vector.load %arg3[%c0_54, %c0_55, %c0_56] : memref<2x1152x128xbf16, #tpu.memory_space<vmem>>, vector<1x1152x128xbf16>
    %81 = vector.shape_cast %80 : vector<1x1152x128xbf16> to vector<1152x128xbf16>
    %cst = arith.constant dense<0.000000e+00> : vector<128x128xf32>
    %82 = tpu.matmul %64, %81, %cst {dimension_numbers = #tpu.dot_dimension_numbers<[1], [0], [0], [1], [0, 0, 1, 1], [], []>} : vector<128x1152xbf16>, vector<1152x128xbf16>, vector<128x128xf32> -> vector<128x128xf32>
    %c0_57 = arith.constant 0 : index
    %c0_58 = arith.constant 0 : index
    %83 = vector.load %arg4[%c0_57, %c0_58] : memref<6x128xf32, #tpu.memory_space<vmem>>, vector<1x128xf32>
    %84 = vector.broadcast %83 : vector<1x128xf32> to vector<128x128xf32>
    %85 = arith.mulf %82, %84 : vector<128x128xf32>
    %c1_59 = arith.constant 1 : index
    %c0_60 = arith.constant 0 : index
    %86 = vector.load %arg4[%c1_59, %c0_60] : memref<6x128xf32, #tpu.memory_space<vmem>>, vector<1x128xf32>
    %87 = vector.broadcast %86 : vector<1x128xf32> to vector<128x128xf32>
    %88 = arith.addf %85, %87 : vector<128x128xf32>
    %cst_61 = arith.constant 0.000000e+00 : f32
    %89 = vector.broadcast %cst_61 : f32 to vector<128x128xf32>
    %90 = arith.maximumf %88, %89 : vector<128x128xf32>
    %c2 = arith.constant 2 : index
    %c0_62 = arith.constant 0 : index
    %91 = vector.load %arg4[%c2, %c0_62] : memref<6x128xf32, #tpu.memory_space<vmem>>, vector<1x128xf32>
    %92 = vector.broadcast %91 : vector<1x128xf32> to vector<128x128xf32>
    %93 = arith.mulf %90, %92 : vector<128x128xf32>
    %c3 = arith.constant 3 : index
    %c0_63 = arith.constant 0 : index
    %94 = vector.load %arg4[%c3, %c0_63] : memref<6x128xf32, #tpu.memory_space<vmem>>, vector<1x128xf32>
    %95 = vector.broadcast %94 : vector<1x128xf32> to vector<128x128xf32>
    %96 = arith.addf %93, %95 : vector<128x128xf32>
    %cst_64 = arith.constant 0.000000e+00 : f32
    %97 = vector.broadcast %cst_64 : f32 to vector<128x128xf32>
    %98 = arith.maximumf %96, %97 : vector<128x128xf32>
    %99 = vector.shape_cast %98 : vector<128x128xf32> to vector<8x16x128xf32>
    %cst_65 = arith.constant 0.000000e+00 : f32
    %100 = vector.broadcast %cst_65 : f32 to vector<8x16x128xf32>
    %101 = arith.select %79, %99, %100 : vector<8x16x128xi1>, vector<8x16x128xf32>
    %102 = arith.truncf %101 : vector<8x16x128xf32> to vector<8x16x128xbf16>
    %c0_66 = arith.constant 0 : index
    %c0_67 = arith.constant 0 : index
    %c0_68 = arith.constant 0 : index
    %c0_69 = arith.constant 0 : index
    %103 = vector.load %arg5[%c0_66, %c0_67, %c0_68, %c0_69] : memref<1x8x16x128xbf16, #tpu.memory_space<vmem>>, vector<1x8x16x128xbf16>
    %104 = vector.shape_cast %103 : vector<1x8x16x128xbf16> to vector<8x16x128xbf16>
    %105 = vector.shape_cast %102 : vector<8x16x128xbf16> to vector<1x8x16x128xbf16>
    tpu.vector_store %arg5[%c0_66, %c0_67, %c0_68, %c0_69], %105 {strides = array<i32>} : memref<1x8x16x128xbf16, #tpu.memory_space<vmem>>, vector<1x8x16x128xbf16>,
    %c1_70 = arith.constant 1 : index
    %c0_71 = arith.constant 0 : index
    %c0_72 = arith.constant 0 : index
    %106 = vector.load %arg3[%c1_70, %c0_71, %c0_72] : memref<2x1152x128xbf16, #tpu.memory_space<vmem>>, vector<1x1152x128xbf16>
    %107 = vector.shape_cast %106 : vector<1x1152x128xbf16> to vector<1152x128xbf16>
    %cst_73 = arith.constant dense<0.000000e+00> : vector<128x128xf32>
    %108 = tpu.matmul %64, %107, %cst_73 {dimension_numbers = #tpu.dot_dimension_numbers<[1], [0], [0], [1], [0, 0, 1, 1], [], []>} : vector<128x1152xbf16>, vector<1152x128xbf16>, vector<128x128xf32> -> vector<128x128xf32>
    %c4 = arith.constant 4 : index
    %c0_74 = arith.constant 0 : index
    %109 = vector.load %arg4[%c4, %c0_74] : memref<6x128xf32, #tpu.memory_space<vmem>>, vector<1x128xf32>
    %110 = vector.broadcast %109 : vector<1x128xf32> to vector<128x128xf32>
    %111 = arith.mulf %108, %110 : vector<128x128xf32>
    %c5 = arith.constant 5 : index
    %c0_75 = arith.constant 0 : index
    %112 = vector.load %arg4[%c5, %c0_75] : memref<6x128xf32, #tpu.memory_space<vmem>>, vector<1x128xf32>
    %113 = vector.broadcast %112 : vector<1x128xf32> to vector<128x128xf32>
    %114 = arith.addf %111, %113 : vector<128x128xf32>
    %cst_76 = arith.constant 0.000000e+00 : f32
    %115 = vector.broadcast %cst_76 : f32 to vector<128x128xf32>
    %116 = arith.maximumf %114, %115 : vector<128x128xf32>
    %117 = vector.shape_cast %116 : vector<128x128xf32> to vector<8x16x128xf32>
    %cst_77 = arith.constant 0.000000e+00 : f32
    %118 = vector.broadcast %cst_77 : f32 to vector<8x16x128xf32>
    %119 = arith.select %79, %117, %118 : vector<8x16x128xi1>, vector<8x16x128xf32>
    %120 = arith.truncf %119 : vector<8x16x128xf32> to vector<8x16x128xbf16>
    %c0_78 = arith.constant 0 : index
    %c0_79 = arith.constant 0 : index
    %c0_80 = arith.constant 0 : index
    %c0_81 = arith.constant 0 : index
    %121 = vector.load %arg6[%c0_78, %c0_79, %c0_80, %c0_81] : memref<1x8x16x128xbf16, #tpu.memory_space<vmem>>, vector<1x8x16x128xbf16>
    %122 = vector.shape_cast %121 : vector<1x8x16x128xbf16> to vector<8x16x128xbf16>
    %123 = vector.shape_cast %120 : vector<8x16x128xbf16> to vector<1x8x16x128xbf16>
    tpu.vector_store %arg6[%c0_78, %c0_79, %c0_80, %c0_81], %123 {strides = array<i32>} : memref<1x8x16x128xbf16, #tpu.memory_space<vmem>>, vector<1x8x16x128xbf16>,
    return
  }
  func.func @transform_0(%arg0: i32, %arg1: i32) -> (i32, i32, i32, i32) {
    %c0_i32 = arith.constant 0 : i32
    %c0_i32_0 = arith.constant 0 : i32
    %c0_i32_1 = arith.constant 0 : i32
    %c0_i32_2 = arith.constant 0 : i32
    return %arg0, %c0_i32, %c0_i32_0, %c0_i32_1 : i32, i32, i32, i32
  }
  func.func @transform_1(%arg0: i32, %arg1: i32) -> (i32, i32, i32) {
    %c0_i32 = arith.constant 0 : i32
    %c0_i32_0 = arith.constant 0 : i32
    %c0_i32_1 = arith.constant 0 : i32
    %c0_i32_2 = arith.constant 0 : i32
    return %c0_i32, %c0_i32_0, %c0_i32_1 : i32, i32, i32
  }
  func.func @transform_2(%arg0: i32, %arg1: i32) -> (i32, i32) {
    %c0_i32 = arith.constant 0 : i32
    %c0_i32_0 = arith.constant 0 : i32
    %c0_i32_1 = arith.constant 0 : i32
    return %c0_i32, %c0_i32_0 : i32, i32
  }
  func.func @transform_3(%arg0: i32, %arg1: i32) -> (i32, i32, i32, i32) {
    %c0_i32 = arith.constant 0 : i32
    %c0_i32_0 = arith.constant 0 : i32
    %c0_i32_1 = arith.constant 0 : i32
    return %arg0, %arg1, %c0_i32, %c0_i32_0 : i32, i32, i32, i32
  }
  func.func @transform_4(%arg0: i32, %arg1: i32) -> (i32, i32, i32, i32) {
    %c0_i32 = arith.constant 0 : i32
    %c0_i32_0 = arith.constant 0 : i32
    %c0_i32_1 = arith.constant 0 : i32
    return %arg0, %arg1, %c0_i32, %c0_i32_0 : i32, i32, i32, i32
  }
}

module attributes {stable_mosaic.version = 11 : i64} {
  func.func @kernel(%arg0: i32, %arg1: i32, %arg2: memref<1x16x16x128xbf16, #tpu.memory_space<vmem>>, %arg3: memref<1x1152x128xbf16, #tpu.memory_space<vmem>>, %arg4: memref<4x128xf32, #tpu.memory_space<vmem>>, %arg5: memref<1x16x16x128xbf16, #tpu.memory_space<vmem>>, %arg6: memref<1x8x8x128xf32, #tpu.memory_space<vmem>>, %arg7: memref<64x1152xbf16, #tpu.memory_space<vmem>>) attributes {dimension_semantics = [#tpu.dimension_semantics<parallel>, #tpu.dimension_semantics<parallel>], iteration_bounds = array<i64: 2, 1>, scalar_prefetch = 0 : i64, scratch_operands = 1 : i64, tpu.core_type = #tpu.core_type<tc>, window_params = [{transform_indices = @transform_0, window_bounds = array<i64: 1, 16, 16, 128>}, {pipeline_mode = #tpu.pipeline_mode<synchronous>, transform_indices = @transform_1, window_bounds = array<i64: 1, 1152, 128>}, {pipeline_mode = #tpu.pipeline_mode<synchronous>, transform_indices = @transform_2, window_bounds = array<i64: 4, 128>}, {transform_indices = @transform_3, window_bounds = array<i64: 1, 16, 16, 128>}, {transform_indices = @transform_4, window_bounds = array<i64: 1, 8, 8, 128>}]} {
    %c8_i32 = arith.constant 8 : i32
    %0 = arith.muli %arg1, %c8_i32 : i32
    %c0_i32 = arith.constant 0 : i32
    %1 = arith.addi %c0_i32, %0 : i32
    %c0_i32_0 = arith.constant 0 : i32
    %2 = arith.addi %1, %c0_i32_0 : i32
    %c0 = arith.constant 0 : index
    %3 = arith.index_cast %2 : i32 to index
    %c0_1 = arith.constant 0 : index
    %c0_2 = arith.constant 0 : index
    %4 = vector.load %arg2[%c0, %3, %c0_1, %c0_2] : memref<1x16x16x128xbf16, #tpu.memory_space<vmem>>, vector<1x8x8x128xbf16>
    %5 = vector.shape_cast %4 : vector<1x8x8x128xbf16> to vector<8x8x128xbf16>
    %6 = vector.shape_cast %5 : vector<8x8x128xbf16> to vector<64x128xbf16>
    %c0_3 = arith.constant 0 : index
    %c0_4 = arith.constant 0 : index
    %7 = vector.load %arg7[%c0_3, %c0_4] : memref<64x1152xbf16, #tpu.memory_space<vmem>>, vector<64x128xbf16>
    tpu.vector_store %arg7[%c0_3, %c0_4], %6 {strides = array<i32>} : memref<64x1152xbf16, #tpu.memory_space<vmem>>, vector<64x128xbf16>,
    %c0_i32_5 = arith.constant 0 : i32
    %8 = arith.addi %c0_i32_5, %0 : i32
    %c0_i32_6 = arith.constant 0 : i32
    %9 = arith.addi %8, %c0_i32_6 : i32
    %c0_7 = arith.constant 0 : index
    %10 = arith.index_cast %9 : i32 to index
    %c1 = arith.constant 1 : index
    %c0_8 = arith.constant 0 : index
    %11 = vector.load %arg2[%c0_7, %10, %c1, %c0_8] : memref<1x16x16x128xbf16, #tpu.memory_space<vmem>>, vector<1x8x8x128xbf16>
    %12 = vector.shape_cast %11 : vector<1x8x8x128xbf16> to vector<8x8x128xbf16>
    %13 = vector.shape_cast %12 : vector<8x8x128xbf16> to vector<64x128xbf16>
    %c0_9 = arith.constant 0 : index
    %c128 = arith.constant 128 : index
    %14 = vector.load %arg7[%c0_9, %c128] : memref<64x1152xbf16, #tpu.memory_space<vmem>>, vector<64x128xbf16>
    tpu.vector_store %arg7[%c0_9, %c128], %13 {strides = array<i32>} : memref<64x1152xbf16, #tpu.memory_space<vmem>>, vector<64x128xbf16>,
    %c0_i32_10 = arith.constant 0 : i32
    %15 = arith.addi %c0_i32_10, %0 : i32
    %c0_i32_11 = arith.constant 0 : i32
    %16 = arith.addi %15, %c0_i32_11 : i32
    %c0_12 = arith.constant 0 : index
    %17 = arith.index_cast %16 : i32 to index
    %c2 = arith.constant 2 : index
    %c0_13 = arith.constant 0 : index
    %18 = vector.load %arg2[%c0_12, %17, %c2, %c0_13] : memref<1x16x16x128xbf16, #tpu.memory_space<vmem>>, vector<1x8x8x128xbf16>
    %19 = vector.shape_cast %18 : vector<1x8x8x128xbf16> to vector<8x8x128xbf16>
    %20 = vector.shape_cast %19 : vector<8x8x128xbf16> to vector<64x128xbf16>
    %c0_14 = arith.constant 0 : index
    %c256 = arith.constant 256 : index
    %21 = vector.load %arg7[%c0_14, %c256] : memref<64x1152xbf16, #tpu.memory_space<vmem>>, vector<64x128xbf16>
    tpu.vector_store %arg7[%c0_14, %c256], %20 {strides = array<i32>} : memref<64x1152xbf16, #tpu.memory_space<vmem>>, vector<64x128xbf16>,
    %c0_i32_15 = arith.constant 0 : i32
    %22 = arith.addi %c0_i32_15, %0 : i32
    %c1_i32 = arith.constant 1 : i32
    %23 = arith.addi %22, %c1_i32 : i32
    %c0_16 = arith.constant 0 : index
    %24 = arith.index_cast %23 : i32 to index
    %c0_17 = arith.constant 0 : index
    %c0_18 = arith.constant 0 : index
    %25 = vector.load %arg2[%c0_16, %24, %c0_17, %c0_18] : memref<1x16x16x128xbf16, #tpu.memory_space<vmem>>, vector<1x8x8x128xbf16>
    %26 = vector.shape_cast %25 : vector<1x8x8x128xbf16> to vector<8x8x128xbf16>
    %27 = vector.shape_cast %26 : vector<8x8x128xbf16> to vector<64x128xbf16>
    %c0_19 = arith.constant 0 : index
    %c384 = arith.constant 384 : index
    %28 = vector.load %arg7[%c0_19, %c384] : memref<64x1152xbf16, #tpu.memory_space<vmem>>, vector<64x128xbf16>
    tpu.vector_store %arg7[%c0_19, %c384], %27 {strides = array<i32>} : memref<64x1152xbf16, #tpu.memory_space<vmem>>, vector<64x128xbf16>,
    %c0_i32_20 = arith.constant 0 : i32
    %29 = arith.addi %c0_i32_20, %0 : i32
    %c1_i32_21 = arith.constant 1 : i32
    %30 = arith.addi %29, %c1_i32_21 : i32
    %c0_22 = arith.constant 0 : index
    %31 = arith.index_cast %30 : i32 to index
    %c1_23 = arith.constant 1 : index
    %c0_24 = arith.constant 0 : index
    %32 = vector.load %arg2[%c0_22, %31, %c1_23, %c0_24] : memref<1x16x16x128xbf16, #tpu.memory_space<vmem>>, vector<1x8x8x128xbf16>
    %33 = vector.shape_cast %32 : vector<1x8x8x128xbf16> to vector<8x8x128xbf16>
    %34 = vector.shape_cast %33 : vector<8x8x128xbf16> to vector<64x128xbf16>
    %c0_25 = arith.constant 0 : index
    %c512 = arith.constant 512 : index
    %35 = vector.load %arg7[%c0_25, %c512] : memref<64x1152xbf16, #tpu.memory_space<vmem>>, vector<64x128xbf16>
    tpu.vector_store %arg7[%c0_25, %c512], %34 {strides = array<i32>} : memref<64x1152xbf16, #tpu.memory_space<vmem>>, vector<64x128xbf16>,
    %c0_i32_26 = arith.constant 0 : i32
    %36 = arith.addi %c0_i32_26, %0 : i32
    %c1_i32_27 = arith.constant 1 : i32
    %37 = arith.addi %36, %c1_i32_27 : i32
    %c0_28 = arith.constant 0 : index
    %38 = arith.index_cast %37 : i32 to index
    %c2_29 = arith.constant 2 : index
    %c0_30 = arith.constant 0 : index
    %39 = vector.load %arg2[%c0_28, %38, %c2_29, %c0_30] : memref<1x16x16x128xbf16, #tpu.memory_space<vmem>>, vector<1x8x8x128xbf16>
    %40 = vector.shape_cast %39 : vector<1x8x8x128xbf16> to vector<8x8x128xbf16>
    %41 = vector.shape_cast %40 : vector<8x8x128xbf16> to vector<64x128xbf16>
    %c0_31 = arith.constant 0 : index
    %c640 = arith.constant 640 : index
    %42 = vector.load %arg7[%c0_31, %c640] : memref<64x1152xbf16, #tpu.memory_space<vmem>>, vector<64x128xbf16>
    tpu.vector_store %arg7[%c0_31, %c640], %41 {strides = array<i32>} : memref<64x1152xbf16, #tpu.memory_space<vmem>>, vector<64x128xbf16>,
    %c0_i32_32 = arith.constant 0 : i32
    %43 = arith.addi %c0_i32_32, %0 : i32
    %c2_i32 = arith.constant 2 : i32
    %44 = arith.addi %43, %c2_i32 : i32
    %c0_33 = arith.constant 0 : index
    %45 = arith.index_cast %44 : i32 to index
    %c0_34 = arith.constant 0 : index
    %c0_35 = arith.constant 0 : index
    %46 = vector.load %arg2[%c0_33, %45, %c0_34, %c0_35] : memref<1x16x16x128xbf16, #tpu.memory_space<vmem>>, vector<1x8x8x128xbf16>
    %47 = vector.shape_cast %46 : vector<1x8x8x128xbf16> to vector<8x8x128xbf16>
    %48 = vector.shape_cast %47 : vector<8x8x128xbf16> to vector<64x128xbf16>
    %c0_36 = arith.constant 0 : index
    %c768 = arith.constant 768 : index
    %49 = vector.load %arg7[%c0_36, %c768] : memref<64x1152xbf16, #tpu.memory_space<vmem>>, vector<64x128xbf16>
    tpu.vector_store %arg7[%c0_36, %c768], %48 {strides = array<i32>} : memref<64x1152xbf16, #tpu.memory_space<vmem>>, vector<64x128xbf16>,
    %c0_i32_37 = arith.constant 0 : i32
    %50 = arith.addi %c0_i32_37, %0 : i32
    %c2_i32_38 = arith.constant 2 : i32
    %51 = arith.addi %50, %c2_i32_38 : i32
    %c0_39 = arith.constant 0 : index
    %52 = arith.index_cast %51 : i32 to index
    %c1_40 = arith.constant 1 : index
    %c0_41 = arith.constant 0 : index
    %53 = vector.load %arg2[%c0_39, %52, %c1_40, %c0_41] : memref<1x16x16x128xbf16, #tpu.memory_space<vmem>>, vector<1x8x8x128xbf16>
    %54 = vector.shape_cast %53 : vector<1x8x8x128xbf16> to vector<8x8x128xbf16>
    %55 = vector.shape_cast %54 : vector<8x8x128xbf16> to vector<64x128xbf16>
    %c0_42 = arith.constant 0 : index
    %c896 = arith.constant 896 : index
    %56 = vector.load %arg7[%c0_42, %c896] : memref<64x1152xbf16, #tpu.memory_space<vmem>>, vector<64x128xbf16>
    tpu.vector_store %arg7[%c0_42, %c896], %55 {strides = array<i32>} : memref<64x1152xbf16, #tpu.memory_space<vmem>>, vector<64x128xbf16>,
    %c0_i32_43 = arith.constant 0 : i32
    %57 = arith.addi %c0_i32_43, %0 : i32
    %c2_i32_44 = arith.constant 2 : i32
    %58 = arith.addi %57, %c2_i32_44 : i32
    %c0_45 = arith.constant 0 : index
    %59 = arith.index_cast %58 : i32 to index
    %c2_46 = arith.constant 2 : index
    %c0_47 = arith.constant 0 : index
    %60 = vector.load %arg2[%c0_45, %59, %c2_46, %c0_47] : memref<1x16x16x128xbf16, #tpu.memory_space<vmem>>, vector<1x8x8x128xbf16>
    %61 = vector.shape_cast %60 : vector<1x8x8x128xbf16> to vector<8x8x128xbf16>
    %62 = vector.shape_cast %61 : vector<8x8x128xbf16> to vector<64x128xbf16>
    %c0_48 = arith.constant 0 : index
    %c1024 = arith.constant 1024 : index
    %63 = vector.load %arg7[%c0_48, %c1024] : memref<64x1152xbf16, #tpu.memory_space<vmem>>, vector<64x128xbf16>
    tpu.vector_store %arg7[%c0_48, %c1024], %62 {strides = array<i32>} : memref<64x1152xbf16, #tpu.memory_space<vmem>>, vector<64x128xbf16>,
    %c0_49 = arith.constant 0 : index
    %c0_50 = arith.constant 0 : index
    %64 = vector.load %arg7[%c0_49, %c0_50] : memref<64x1152xbf16, #tpu.memory_space<vmem>>, vector<64x1152xbf16>
    %c0_51 = arith.constant 0 : index
    %c0_52 = arith.constant 0 : index
    %c0_53 = arith.constant 0 : index
    %65 = vector.load %arg3[%c0_51, %c0_52, %c0_53] : memref<1x1152x128xbf16, #tpu.memory_space<vmem>>, vector<1x1152x128xbf16>
    %66 = vector.shape_cast %65 : vector<1x1152x128xbf16> to vector<1152x128xbf16>
    %cst = arith.constant dense<0.000000e+00> : vector<64x128xf32>
    %67 = tpu.matmul %64, %66, %cst {dimension_numbers = #tpu.dot_dimension_numbers<[1], [0], [0], [1], [0, 0, 1, 1], [], []>} : vector<64x1152xbf16>, vector<1152x128xbf16>, vector<64x128xf32> -> vector<64x128xf32>
    %c0_54 = arith.constant 0 : index
    %c0_55 = arith.constant 0 : index
    %68 = vector.load %arg4[%c0_54, %c0_55] : memref<4x128xf32, #tpu.memory_space<vmem>>, vector<1x128xf32>
    %69 = vector.broadcast %68 : vector<1x128xf32> to vector<64x128xf32>
    %70 = arith.mulf %67, %69 : vector<64x128xf32>
    %c1_56 = arith.constant 1 : index
    %c0_57 = arith.constant 0 : index
    %71 = vector.load %arg4[%c1_56, %c0_57] : memref<4x128xf32, #tpu.memory_space<vmem>>, vector<1x128xf32>
    %72 = vector.broadcast %71 : vector<1x128xf32> to vector<64x128xf32>
    %73 = arith.addf %70, %72 : vector<64x128xf32>
    %cst_58 = arith.constant 0.000000e+00 : f32
    %74 = vector.broadcast %cst_58 : f32 to vector<64x128xf32>
    %75 = arith.maximumf %73, %74 : vector<64x128xf32>
    %c2_59 = arith.constant 2 : index
    %c0_60 = arith.constant 0 : index
    %76 = vector.load %arg4[%c2_59, %c0_60] : memref<4x128xf32, #tpu.memory_space<vmem>>, vector<1x128xf32>
    %77 = vector.broadcast %76 : vector<1x128xf32> to vector<64x128xf32>
    %78 = arith.mulf %75, %77 : vector<64x128xf32>
    %c3 = arith.constant 3 : index
    %c0_61 = arith.constant 0 : index
    %79 = vector.load %arg4[%c3, %c0_61] : memref<4x128xf32, #tpu.memory_space<vmem>>, vector<1x128xf32>
    %80 = vector.broadcast %79 : vector<1x128xf32> to vector<64x128xf32>
    %81 = arith.addf %78, %80 : vector<64x128xf32>
    %c1_i32_62 = arith.constant 1 : i32
    %82 = arith.addi %c1_i32_62, %0 : i32
    %c0_63 = arith.constant 0 : index
    %83 = arith.index_cast %82 : i32 to index
    %c1_64 = arith.constant 1 : index
    %c0_65 = arith.constant 0 : index
    %84 = vector.load %arg5[%c0_63, %83, %c1_64, %c0_65] : memref<1x16x16x128xbf16, #tpu.memory_space<vmem>>, vector<1x8x8x128xbf16>
    %85 = vector.shape_cast %84 : vector<1x8x8x128xbf16> to vector<8x8x128xbf16>
    %86 = vector.shape_cast %85 : vector<8x8x128xbf16> to vector<64x128xbf16>
    %87 = arith.extf %86 : vector<64x128xbf16> to vector<64x128xf32>
    %88 = arith.addf %81, %87 : vector<64x128xf32>
    %cst_66 = arith.constant 0.000000e+00 : f32
    %89 = vector.broadcast %cst_66 : f32 to vector<64x128xf32>
    %90 = arith.maximumf %88, %89 : vector<64x128xf32>
    %91 = vector.shape_cast %90 : vector<64x128xf32> to vector<8x8x128xf32>
    %c0_67 = arith.constant 0 : index
    %c0_68 = arith.constant 0 : index
    %c0_69 = arith.constant 0 : index
    %c0_70 = arith.constant 0 : index
    %92 = vector.load %arg6[%c0_67, %c0_68, %c0_69, %c0_70] : memref<1x8x8x128xf32, #tpu.memory_space<vmem>>, vector<1x8x8x128xf32>
    %93 = vector.shape_cast %92 : vector<1x8x8x128xf32> to vector<8x8x128xf32>
    %94 = vector.shape_cast %91 : vector<8x8x128xf32> to vector<1x8x8x128xf32>
    tpu.vector_store %arg6[%c0_67, %c0_68, %c0_69, %c0_70], %94 {strides = array<i32>} : memref<1x8x8x128xf32, #tpu.memory_space<vmem>>, vector<1x8x8x128xf32>,
    return
  }
  func.func @transform_0(%arg0: i32, %arg1: i32) -> (i32, i32, i32, i32) {
    %c0_i32 = arith.constant 0 : i32
    %c0_i32_0 = arith.constant 0 : i32
    %c0_i32_1 = arith.constant 0 : i32
    %c0_i32_2 = arith.constant 0 : i32
    return %arg0, %c0_i32, %c0_i32_0, %c0_i32_1 : i32, i32, i32, i32
  }
  func.func @transform_1(%arg0: i32, %arg1: i32) -> (i32, i32, i32) {
    %c0_i32 = arith.constant 0 : i32
    %c0_i32_0 = arith.constant 0 : i32
    %c0_i32_1 = arith.constant 0 : i32
    %c0_i32_2 = arith.constant 0 : i32
    return %c0_i32, %c0_i32_0, %c0_i32_1 : i32, i32, i32
  }
  func.func @transform_2(%arg0: i32, %arg1: i32) -> (i32, i32) {
    %c0_i32 = arith.constant 0 : i32
    %c0_i32_0 = arith.constant 0 : i32
    %c0_i32_1 = arith.constant 0 : i32
    return %c0_i32, %c0_i32_0 : i32, i32
  }
  func.func @transform_3(%arg0: i32, %arg1: i32) -> (i32, i32, i32, i32) {
    %c0_i32 = arith.constant 0 : i32
    %c0_i32_0 = arith.constant 0 : i32
    %c0_i32_1 = arith.constant 0 : i32
    %c0_i32_2 = arith.constant 0 : i32
    return %arg0, %c0_i32, %c0_i32_0, %c0_i32_1 : i32, i32, i32, i32
  }
  func.func @transform_4(%arg0: i32, %arg1: i32) -> (i32, i32, i32, i32) {
    %c0_i32 = arith.constant 0 : i32
    %c0_i32_0 = arith.constant 0 : i32
    %c0_i32_1 = arith.constant 0 : i32
    return %arg0, %arg1, %c0_i32, %c0_i32_0 : i32, i32, i32, i32
  }
}

</mosaic_0001>

<bundles_post_ra>
// kernel: resnet_reduction_block_forward.3
= control target key start
LH: loop header
LB: loop body
LE: loop exit
PB: predicated region body
PF: predicated region fallthrough
CT: control target
= control target key end

     0   :  { %s3961_s0 = inlined_call_operand.hbm [shape: bf16[2,16,16,128], index: 0, kind: input, shape index: {}]   ;;  %s3962_s1 = inlined_call_operand.hbm [shape: bf16[1,1152,128], index: 1, kind: input, shape index: {}]   ;;  %s3963_s2 = inlined_call_operand.hbm [shape: f32[4,128], index: 2, kind: input, shape index: {}]   ;;  %s3964_s3 = inlined_call_operand.hbm [shape: bf16[2,16,16,128], index: 3, kind: input, shape index: {}]   ;;  %s3965_s4 = inlined_call_operand.hbm [shape: f32[2,8,8,128], index: 4, kind: output, shape index: {}]  }
   0x1   :  { %3972 = sst [smem:[#allocation16_spill]] %s3961_s0 }
   0x2   :  { %3973 = sst [smem:[#allocation17_spill]] %s3962_s1 }
   0x3   :  { %3974 = sst [smem:[#allocation18_spill]] %s3963_s2 }
   0x4   :  { %9 = vsyncpa [#allocation4], 0 }
   0x5   :  { %11 = vsyncpa [#allocation4 + $0x1], 0 }
   0x6   :  { %12 = vsyncpa [#allocation7], 0 }
   0x7   :  { %13 = vsyncpa [#allocation10], 0 }
   0x8   :  { %15 = vsyncpa [#allocation10 + $0x1], 0 }
   0x9   :  { %16 = vsyncpa [#allocation5], 0 }
   0xa   :  { %18 = vsyncpa [#allocation5 + $0x1], 0  ;;  %s3332_s15 = smov 0   ;;  %s3334_s16 = smov 0  }
   0xb   :  { %s3336_s17 = smov 0   ;;  %s3338_s18 = smov 0  }
   0xc   :  { %s3340_s19 = smov 0   ;;  %s3342_s20 = smov 0  }
   0xd LB: > { %s2444_s21 = sadd.s32 4294967295, %s3296_s20   ;;  %s2445_s22 = sadd.s32 4294967294, %s3296_s20   ;;  %s3296_s20 = sphi %s3342_s20, %s24_s20   ;;  %s3292_s19 = sphi %s3340_s19, %s4002_s19   ;;  %s3288_s18 = sphi %s3338_s18, %s4001_s18   ;;  %s3284_s17 = sphi %s3336_s17, %s4000_s17   ;;  %s3280_s16 = sphi %s3334_s16, %s3999_s16   ;;  %s3276_s15 = sphi %s3332_s15, %s3998_s15  }
   0xe   : > { %p56_p0 = scmp.ne.s32.totalorder %s3280_s16, %s3276_s15  ;;  %p3366_p1 = scmp.eq.s32.totalorder %s2444_s21, 0 }
   0xf   : > { %p3370_p2 = scmp.eq.s32.totalorder %s2444_s21, 1  ;;  %p156_p3 = scmp.eq.s32.totalorder %s2445_s22, 1 }
  0x10   : > { %s3975_s23 = scalar_select %p3366_p1, 1, 0 }
  0x11   : > { %p3376_p4 = por %p3366_p1, %p56_p0  ;;  %p2446_p5 = scmp.ge.s32.totalorder %s3296_s20, 1 }
  0x12   : > { %p3381_p6 = por %p156_p3, %p56_p0  ;;  %p163_p7 = scmp.lt.s32.totalorder %s3296_s20, 3 }
  0x13   : > { %s3977_s25 = scalar_select %p3376_p4, 1, 0 }
  0x14   : > { %s3978_s26 = scalar_select %p3381_p6, 1, 0 }
  0x15   : > { %p3386_p8 = pnand %p2446_p5, %p163_p7  ;;  %s3298_s28 = smov [#allocation6]  }
  0x16   : > { %s175_s29 = sshll.u32 %s3298_s28, 4  ;;  %s3299_s5 = smov [#allocation8]   ;;  %s3390_s29 = int_to_ptr.vmem [resolvable:$true] %s175_s29 }
  0x17   : > { %p2928_p9 = pneg %p3386_p8  ;;  %s189_s6 = sshll.u32 %s3299_s5, 4  ;;  %s3401_s6 = int_to_ptr.vmem [resolvable:$true] %s189_s6 }
  0x18   : > { %s3981_s1 = sld [smem:[#allocation17_spill]] }
  0x19   : > { %p3397_p11 = pnand %p2928_p9, %p3366_p1 }
  0x1b   : > { %p3092_p13 = pneg %p3397_p11 }
  0x1e   : > { %s3090_s9 = scalar_lea.hbm %s3981_s1, 9216 }
  0x1f   : > { %p3091_p12 = scmp.ne.s32.totalorder %s3981_s1, %s3090_s9  ;;  %p3097_p5 = scmp.lt.u32.totalorder %s3090_s9, %s3981_s1 }
  0x21   : > { %p3093_p0 = pnand %p3092_p13, %p3091_p12 }
  0x23   : > { %p3094_p3 = pneg %p3093_p0 }
  0x25   : > { %p3099_p7 = pnand %p3097_p5, %p3094_p3 }
  0x27   : > { %3102 = shalt.err (!%p3099_p7)
}
  0x28   : > { %s3103_s14 = scalar_lea.vmem %s3390_s29, 9216  ;;  %p3111_p1 = scmp.lt.s32.totalorder %s3390_s29, %s3390_s29 }
  0x29   : > { %p3104_p9 = scmp.ne.s32.totalorder %s3390_s29, %s3103_s14  ;;  %p3112_p12 = scmp.lt.s32.totalorder %s3103_s14, %s3103_s14 }
  0x2b   : > { %p3106_p10 = pnand %p3104_p9, %p3092_p13  ;;  %p3113_p0 = por %p3112_p12, %p3111_p1 }
  0x2d   : > { %p3107_p6 = pneg %p3106_p10 }
  0x2f   : > { %p3114_p4 = pnand %p3113_p0, %p3107_p6 }
  0x31   : > { %3117 = shalt.err (!%p3114_p4)
}
  0x32   : > { %s3300_s21 = smov 64   ;;  %s3301_s22 = smov 4  }
  0x33   : > { %2931 = dma.hbm_to_vmem [thread:$0]  (!%p3397_p11), %s3981_s1, 9216, %s3390_s29, [#allocation7], %s3300_s21, %s3300_s21, %s3301_s22  }
  0x34   : > { %s3982_s2 = sld [smem:[#allocation18_spill]] }
  0x3a   : > { %s3118_s9 = scalar_lea.hbm %s3982_s2, 64 }
  0x3b   : > { %p3119_p1 = scmp.ne.s32.totalorder %s3982_s2, %s3118_s9  ;;  %p3125_p10 = scmp.lt.u32.totalorder %s3118_s9, %s3982_s2 }
  0x3d   : > { %p3121_p4 = pnand %p3119_p1, %p3092_p13 }
  0x3f   : > { %p3122_p6 = pneg %p3121_p4 }
  0x41   : > { %p3127_p3 = pnand %p3125_p10, %p3122_p6 }
  0x43   : > { %3130 = shalt.err (!%p3127_p3)
}
  0x44   : > { %s3131_s29 = scalar_lea.vmem %s3401_s6, 64  ;;  %p3139_p12 = scmp.lt.s32.totalorder %s3401_s6, %s3401_s6 }
  0x45   : > { %p3132_p5 = scmp.ne.s32.totalorder %s3401_s6, %s3131_s29  ;;  %p3140_p0 = scmp.lt.s32.totalorder %s3131_s29, %s3131_s29 }
  0x47   : > { %p3134_p7 = pnand %p3132_p5, %p3092_p13  ;;  %p3141_p1 = por %p3140_p0, %p3139_p12 }
  0x49   : > { %p3135_p9 = pneg %p3134_p7 }
  0x4b   : > { %p3142_p4 = pnand %p3141_p1, %p3135_p9 }
  0x4d   : > { %3145 = shalt.err (!%p3142_p4)
}
  0x4e   : > { %2934 = dma.hbm_to_vmem [thread:$0]  (!%p3397_p11), %s3982_s2, 64, %s3401_s6, [#allocation7]  }
  0x4f   : > { %s36_s5 = sadd.s32 1, %s3292_s19  ;;  %s43_s7 = sadd.s32 1, %s3284_s17 }
  0x50   : > { %p38_p13 = scmp.ge.s32.totalorder %s36_s5, 2  ;;  %p50_p6 = scmp.ne.s32.totalorder %s3284_s17, %s3280_s16 }
  0x51   : > { %p51_p10 = scmp.eq.s32.totalorder %s3296_s20, 0  ;;  %p2948_p3 = scmp.lt.s32.totalorder %s3296_s20, 2 }
  0x52   : > { %s4004_s5 = smov (%p38_p13, %s36_s5), 0  ;;  %p3468_p7 = por %p3370_p2, %p50_p6 }
  0x53   : > { %p52_p5 = por %p51_p10, %p50_p6  ;;  %s40_s8 = ssub.s32 %s3292_s19, %s4004_s5 }
  0x54   : > { %s3983_s30 = scalar_select %p3468_p7, 1, 0 }
  0x55   : > { %s3475_s9 = sand.u32 1, %s3284_s17   ;;  %p41_p11 = scmp.eq.s32.totalorder %s40_s8, 0 }
  0x56   : > { %s3969_s6 = sshll.u32 %s3475_s9, 7  ;;  %s3970_s10 = sshll.u32 %s3292_s19, 11 }
  0x57   : > { %s3480_s11 = scalar_select %p41_p11, %s3284_s17, %s43_s7  }
  0x58   : > { %s3984_s0 = sld [smem:[#allocation16_spill]]  ;;  %s204_s29 = scalar_lea.vmem [#allocation3], %s3969_s6 }
  0x59   : > { %s211_s14 = sshll.u32 %s204_s29, 4  ;;  %p3493_p2 = pnand %p2948_p3, %p52_p5  ;;  %s3497_s14 = int_to_ptr.vmem [resolvable:$true] %s211_s14 }
  0x5b   : > { %p3148_p12 = pneg %p3493_p2 }
  0x5e   : > { %s3487_s24 = scalar_lea.hbm %s3984_s0, %s3970_s10  ;;  %s3151_s29 = scalar_lea.hbm %s3984_s0, 4096 }
  0x5f   : > { %s3146_s8 = scalar_lea.hbm %s3487_s24, 2048  ;;  %p3152_p4 = scmp.lt.u32.totalorder %s3487_s24, %s3984_s0 }
  0x60   : > { %p3147_p9 = scmp.ne.s32.totalorder %s3487_s24, %s3146_s8  ;;  %p3153_p13 = scmp.lt.u32.totalorder %s3151_s29, %s3146_s8 }
  0x61   : > { %p3155_p10 = scmp.lt.u32.totalorder %s3146_s8, %s3487_s24 }
  0x62   : > { %p3149_p0 = pnand %p3148_p12, %p3147_p9  ;;  %p3154_p6 = por %p3153_p13, %p3152_p4 }
  0x64   : > { %p3150_p1 = pneg %p3149_p0  ;;  %p3156_p3 = por %p3155_p10, %p3154_p6 }
  0x66   : > { %p3157_p5 = pnand %p3156_p3, %p3150_p1 }
  0x68   : > { %3160 = shalt.err (!%p3157_p5)
}
  0x69   : > { %s3161_s7 = scalar_lea.vmem %s3497_s14, 2048  ;;  %s3302_s12 = smov [#allocation3]  }
  0x6a   : > { %p3162_p11 = scmp.ne.s32.totalorder %s3497_s14, %s3161_s7  ;;  %s3166_s13 = sshll.u32 %s3302_s12, 4  ;;  %s3167_s13 = int_to_ptr.vmem [resolvable:$false] %s3166_s13 }
  0x6b   : > { %s3168_s6 = scalar_lea.vmem %s3167_s13, 4096  ;;  %p3169_p7 = scmp.lt.s32.totalorder %s3497_s14, %s3167_s13 }
  0x6c   : > { %p3164_p9 = pnand %p3162_p11, %p3148_p12  ;;  %p3170_p4 = scmp.lt.s32.totalorder %s3168_s6, %s3161_s7 }
  0x6e   : > { %p3165_p0 = pneg %p3164_p9  ;;  %p3171_p13 = por %p3170_p4, %p3169_p7 }
  0x70   : > { %p3172_p6 = pnand %p3171_p13, %p3165_p0 }
  0x72   : > { %3175 = shalt.err (!%p3172_p6)
}
  0x73   : > { %s3986_s10 = scalar_lea.sflag [#allocation4], %s3475_s9  ;;  %s3987_s8 = sshll.u32 %s3292_s19, 11 }
  0x74   : > { %2938 = dma.hbm_to_vmem [thread:$0]  (!%p3493_p2), %s3487_s24, 2048, %s3497_s14, %s3986_s10, %s3300_s21, %s3300_s21, %s3301_s22  }
  0x75   : > { %s3535_s12 = scalar_lea.hbm %s3964_s3, %s3987_s8  ;;  %s3988_s13 = sshll.u32 %s3475_s9, 7 }
  0x76   : > { %s225_s6 = scalar_lea.vmem [#allocation9], %s3988_s13  ;;  %s222_s1 = scalar_lea.sflag [#allocation10], %s3475_s9 }
  0x77   : > { %s232_s0 = sshll.u32 %s225_s6, 4  ;;  %s3176_s2 = scalar_lea.hbm %s3535_s12, 2048  ;;  %s3539_s0 = int_to_ptr.vmem [resolvable:$true] %s232_s0 }
  0x78   : > { %p3177_p7 = scmp.ne.s32.totalorder %s3535_s12, %s3176_s2  ;;  %s3181_s10 = scalar_lea.hbm %s3964_s3, 4096 }
  0x79   : > { %p3182_p3 = scmp.lt.u32.totalorder %s3535_s12, %s3964_s3  ;;  %p3183_p5 = scmp.lt.u32.totalorder %s3181_s10, %s3176_s2 }
  0x7a   : > { %p3179_p1 = pnand %p3177_p7, %p3148_p12  ;;  %p3185_p9 = scmp.lt.u32.totalorder %s3176_s2, %s3535_s12 }
  0x7b   : > { %p3184_p11 = por %p3183_p5, %p3182_p3 }
  0x7c   : > { %p3180_p10 = pneg %p3179_p1 }
  0x7d   : > { %p3186_p0 = por %p3185_p9, %p3184_p11 }
  0x7f   : > { %p3187_p4 = pnand %p3186_p0, %p3180_p10 }
  0x81   : > { %3190 = shalt.err (!%p3187_p4)
}
  0x82   : > { %s3191_s7 = scalar_lea.vmem %s3539_s0, 2048  ;;  %s3303_s13 = smov [#allocation9]  }
  0x83   : > { %p3192_p13 = scmp.ne.s32.totalorder %s3539_s0, %s3191_s7  ;;  %s3196_s6 = sshll.u32 %s3303_s13, 4  ;;  %s3197_s6 = int_to_ptr.vmem [resolvable:$false] %s3196_s6 }
  0x84   : > { %s3198_s24 = scalar_lea.vmem %s3197_s6, 4096  ;;  %p3199_p1 = scmp.lt.s32.totalorder %s3539_s0, %s3197_s6 }
  0x85   : > { %p3194_p6 = pnand %p3192_p13, %p3148_p12  ;;  %p3200_p3 = scmp.lt.s32.totalorder %s3198_s24, %s3191_s7 }
  0x87   : > { %p3195_p7 = pneg %p3194_p6  ;;  %p3201_p5 = por %p3200_p3, %p3199_p1 }
  0x89   : > { %p3202_p11 = pnand %p3201_p5, %p3195_p7 }
  0x8b   : > { %3205 = shalt.err (!%p3202_p11)
}
  0x8c   : > { %2941 = dma.hbm_to_vmem [thread:$0]  (!%p3493_p2), %s3535_s12, 2048, %s3539_s0, %s222_s1, %s3300_s21, %s3300_s21, %s3301_s22  }
  0x8d   : > { %244 = sbr.rel (%p3386_p8) target bundleno = 508 (0x1fc), region = 36  ;;  %s3573_s2 = sand.u32 (!%p3386_p8), 1, %s3280_s16  }
  0x8e   : > { %s2457_s14 = sshll.u32 (!%p3386_p8), %s3573_s2, 7  ;;  %s247_s10 = scalar_lea.sflag (!%p3386_p8), [#allocation4], %s3573_s2 }
  0x8f   : > { %s3577_s28 = scalar_lea.vmem (!%p3386_p8), [#allocation3], %s2457_s14  ;;  %p3989_p12 = scmp.ne.s32.totalorder (!%p3386_p8), %s3977_s25, 0 }
  0x94   : > { %3259 = dma.done.wait (%p3989_p12), %s247_s10, 2048  }
  0x95   : > { %3261 = vsyncadd (%p3989_p12), %s247_s10, 4294965248  ;;  %p3990_p2 = scmp.ne.s32.totalorder %s3975_s23, 0 }
  0x97   : > { %3263 = dma.done.wait (%p3990_p2), [#allocation7], 9280  }
  0x98   : > { %3265 = vsyncadd (%p3990_p2), [#allocation7], 4294958016  ;;  %s264_s0 = scalar_lea.sflag [#allocation10], %s3573_s2  ;;  %s3588_s1 = scalar_lea.vmem [#allocation9], %s2457_s14 }
  0x99   : > { %3267 = dma.done.wait (%p3989_p12), %s264_s0, 2048  }
  0x9a   : > { %3269 = vsyncadd (%p3989_p12), %s264_s0, 4294965248  ;;  %v3006_v0 = vld [vmem:[#allocation6 + $0x40] sm:$0xff]   ;;  %v3010_v4 = vld [vmem:[#allocation6 + $0x48] sm:$0xff]   ;;  %vm355_vm0 = vsmask.f32 3328  ;;  %vm522_vm2 = vcmask 1042432  }
  0x9b   : > { %v3007_v1 = vld [vmem:[#allocation6 + $0xc0] sm:$0xff]   ;;  %2702 = vmatprep.subr.bf16.mxu0 %v3006_v0  ;;  %v3011_v5 = vld [vmem:[#allocation6 + $0xc8] sm:$0xff]   ;;  %v3014_v8 = vld [vmem:[#allocation6 + $0x50] sm:$0xff]   ;;  %vm356_vm1 = vsmask.f32 7440  ;;  %vm523_vm3 = vcmask 1046532  }
  0x9c   : > { %v3008_v2 = vld [vmem:[#allocation6] sm:$0xff]   ;;  %2742 = vmatprep.subr.bf16.mxu1 %v3007_v1  ;;  %v3012_v6 = vld [vmem:[#allocation6 + $0x8] sm:$0xff]   ;;  %v3015_v9 = vld [vmem:[#allocation6 + $0xd0] sm:$0xff]   ;;  %s2461_s23 = sshll.u32 %s3573_s2, 6  ;;  %s2701_s25 = sshll.u32 %s3288_s18, 10 }
  0x9d   : > { %v3009_v3 = vld [vmem:[#allocation6 + $0x80] sm:$0xff]   ;;  %2703 = vmatpush3.bf16.msra.mxu0 %v3008_v2  ;;  %v3013_v7 = vld [vmem:[#allocation6 + $0x88] sm:$0xff]   ;;  %v3016_v10 = vld [vmem:[#allocation6 + $0x10] sm:$0xff]   ;;  %s296_s27 = scalar_lea.vmem [#allocation11], %s2461_s23  ;;  %s3910_s9 = scalar_lea.hbm %s3965_s4, %s2701_s25 }
  0x9e   : > { %2743 = vmatpush3.bf16.msra.mxu1 %v3009_v3  ;;  %2704 = vmatprep.subr.bf16.mxu0 %v3010_v4  ;;  %v3017_v11 = vld [vmem:[#allocation6 + $0x90] sm:$0xff]   ;;  %v3018_v12 = vld [vmem:[#allocation6 + $0x58] sm:$0xff]   ;;  %v3022_v16 = vld [vmem:[#allocation6 + $0x60] sm:$0xff]   ;;  %s2304_s21 = sshll.u32 %s296_s27, 4  ;;  %s2289_s12 = scalar_lea.sflag [#allocation5], %s3573_s2  ;;  %s3912_s21 = int_to_ptr.vmem [resolvable:$true] %s2304_s21 }
  0x9f   : > { %2744 = vmatprep.subr.bf16.mxu1 %v3011_v5  ;;  %v3019_v13 = vld [vmem:[#allocation6 + $0xd8] sm:$0xff]   ;;  %v3023_v17 = vld [vmem:[#allocation6 + $0xe0] sm:$0xff]   ;;  %v3026_v20 = vld [vmem:[#allocation6 + $0x68] sm:$0xff]   ;;  %s3206_s8 = scalar_lea.vmem %s3912_s21, 1024  ;;  %p3995_p10 = scmp.ne.s32.totalorder %s3983_s30, 0 }
  0xa0   : > { %v3020_v14 = vld [vmem:[#allocation6 + $0x18] sm:$0xff]   ;;  %v3024_v18 = vld [vmem:[#allocation6 + $0x20] sm:$0xff]   ;;  %v3027_v21 = vld [vmem:[#allocation6 + $0xe8] sm:$0xff]   ;;  %p3207_p8 = scmp.ne.s32.totalorder %s3912_s21, %s3206_s8  ;;  %s3304_s29 = smov [#allocation11]  }
  0xa1   : > { %2705 = vmatpush3.bf16.msra.mxu0 %v3012_v6  ;;  %v3021_v15 = vld [vmem:[#allocation6 + $0x98] sm:$0xff]   ;;  %v3025_v19 = vld [vmem:[#allocation6 + $0xa0] sm:$0xff]   ;;  %v3028_v22 = vld [vmem:[#allocation6 + $0x28] sm:$0xff]   ;;  %s3210_s7 = sshll.u32 %s3304_s29, 4  ;;  %s3211_s7 = int_to_ptr.vmem [resolvable:$false] %s3210_s7 }
  0xa2   : > { %2745 = vmatpush3.bf16.msra.mxu1 %v3013_v7  ;;  %2706 = vmatprep.subr.bf16.mxu0 %v3014_v8  ;;  %v3029_v23 = vld [vmem:[#allocation6 + $0xa8] sm:$0xff]   ;;  %v3030_v24 = vld [vmem:[#allocation6 + $0x70] sm:$0xff]   ;;  %v3034_v28 = vld [vmem:[#allocation6 + $0x78] sm:$0xff]   ;;  %p3208_p9 = pnand %p3207_p8, %p3995_p10  ;;  %s3212_s13 = scalar_lea.vmem %s3211_s7, 2048 }
  0xa3   : > { %2746 = vmatprep.subr.bf16.mxu1 %v3015_v9  ;;  %v3031_v25 = vld [vmem:[#allocation6 + $0xf0] sm:$0xff]   ;;  %v3035_v29 = vld [vmem:[#allocation6 + $0xf8] sm:$0xff]   ;;  %v339_v32 = vld [vmem:[%s3577_s28] sm:$0xf]  ;;  %p3213_p4 = scmp.lt.s32.totalorder %s3912_s21, %s3211_s7  ;;  %p3214_p13 = scmp.lt.s32.totalorder %s3212_s13, %s3206_s8 }
  0xa4   : > { %v3032_v26 = vld [vmem:[#allocation6 + $0x30] sm:$0xff]   ;;  %v3036_v30 = vld [vmem:[#allocation6 + $0x38] sm:$0xff]   ;;  %v340_v33 = vld [vmem:[%s3577_s28 + $0x4] sm:$0x1]  ;;  %v359_v36 = vshrl.u32 %v339_v32, 16  ;;  %v362_v37 = vshll.u32 %v339_v32, 16  ;;  %p3209_p0 = pneg %p3208_p9 }
  0xa5   : > { %2707 = vmatpush3.bf16.msra.mxu0 %v3016_v10  ;;  %v3033_v27 = vld [vmem:[#allocation6 + $0xb0] sm:$0xff]   ;;  %v3037_v31 = vld [vmem:[#allocation6 + $0xb8] sm:$0xff]   ;;  %v341_v34 = vld [vmem:[%s3577_s28 + $0x8] sm:$0xf]  ;;  %v368_v38 = vshll.u32 %v340_v33, 16  ;;  %p3215_p6 = por %p3214_p13, %p3213_p4 }
  0xa6   : > { %2747 = vmatpush3.bf16.msra.mxu1 %v3017_v11  ;;  %2708 = vmatprep.subr.bf16.mxu0 %v3018_v12  ;;  %v342_v35 = vld [vmem:[%s3577_s28 + $0xc] sm:$0x1]  ;;  %v373_v39 = vshrl.u32 %v341_v34, 16  ;;  %v376_v40 = vshll.u32 %v341_v34, 16  ;;  %v361_v42 = vrot.slane %v359_v36, 4  ;;  %v364_v43 = vrot.slane %v362_v37, 5  ;;  %vm3603_vm4 = vmor %vm522_vm2, %vm523_vm3 }
  0xa7   : > { %2748 = vmatprep.subr.bf16.mxu1 %v3019_v13  ;;  %v382_v41 = vshll.u32 %v342_v35, 16  ;;  %v3038_v45 = vld [vmem:[%s3577_s28 + $0x8] ss:$8 sps:$4 sm:$0xff]   ;;  %v370_v48 = vrot.slane %v368_v38, 5  ;;  %v490_v50 = vld [vmem:[%s3577_s28] sm:$0xe]  ;;  %vm3609_vm5 = vmor %vm355_vm0, %vm356_vm1  ;;  %p3216_p7 = pnand %p3215_p6, %p3209_p0 }
  0xa8   : > { %v375_v44 = vrot.slane %v373_v39, 4  ;;  %v378_v46 = vrot.slane %v376_v40, 5  ;;  %v365_v47 = vor.u32 %v364_v43, %v361_v42  ;;  %1830 = vmatprep.mubr.bf16.mxu1 %v3038_v45  ;;  %v491_v51 = vld [vmem:[%s3577_s28 + $0x4] sm:$0x1]  ;;  %v492_v55 = vld [vmem:[%s3577_s28 + $0x8] sm:$0xe] }
  0xa9   : > { %2709 = vmatpush3.bf16.msra.mxu0 %v3020_v14  ;;  %v384_v49 = vrot.slane %v382_v41, 5  ;;  %v493_v56 = vld [vmem:[%s3577_s28 + $0xc] sm:$0x1]  ;;  %v2470_v57 = vrot.slane %v490_v50, 9  ;;  %v527_v58 = vrot.slane %v491_v51, 5  ;;  %v2471_v60 = vrot.slane %v492_v55, 9 }
  0xaa   : > { %2749 = vmatpush3.bf16.msra.mxu1 %v3021_v15  ;;  %2710 = vmatprep.subr.bf16.mxu0 %v3022_v16  ;;  %v379_v54 = vor.u32 %v378_v46, %v375_v44  ;;  %v366_v59 = vrot.slane %v365_v47, 4  ;;  %v531_v61 = vrot.slane %v493_v56, 5  ;;  %v3040_v62 = vld [vmem:[#allocation6 + $0x140] sm:$0xff]   ;;  %v3044_v10 = vld [vmem:[#allocation6 + $0x148] sm:$0xff]   ;;  %v343_v14 = vld [vmem:[%s3577_s28 + $0x10] sm:$0xf] }
  0xab   : > { %2750 = vmatprep.subr.bf16.mxu1 %v3023_v17  ;;  %v3039_v0 = vld [vmem:[%s3577_s28] ss:$8 sps:$4 sm:$0xff]   ;;  %v528_v1 = vsel %vm3603_vm4, %v2470_v57, %v527_v58  ;;  %v344_v15 = vld [vmem:[%s3577_s28 + $0x14] sm:$0x1]  ;;  %v345_v16 = vld [vmem:[%s3577_s28 + $0x18] sm:$0xf] }
  0xac   : > { %v380_v63 = vrot.slane %v379_v54, 4  ;;  %v3041_v2 = vld [vmem:[#allocation6 + $0x1c0] sm:$0xff]   ;;  %v371_v3 = vsel %vm3609_vm5, %v366_v59, %v370_v48  ;;  %v532_v4 = vsel %vm3603_vm4, %v2471_v60, %v531_v61  ;;  %v3045_v11 = vld [vmem:[#allocation6 + $0x1c8] sm:$0xff]   ;;  %v346_v17 = vld [vmem:[%s3577_s28 + $0x1c] sm:$0x1] }
  0xad   : > { %2711 = vmatpush3.bf16.msra.mxu0 %v3024_v18  ;;  %v2478_v6 = vcombine.low %v528_v1, %v532_v4  ;;  %v3042_v7 = vld [vmem:[#allocation6 + $0x100] sm:$0xff]   ;;  %v3046_v12 = vld [vmem:[#allocation6 + $0x108] sm:$0xff]   ;;  %v387_v18 = vshrl.u32 %v343_v14, 16  ;;  %v494_v32 = vld [vmem:[%s3577_s28 + $0x10] sm:$0xe] }
  0xae   : > { %2751 = vmatpush3.bf16.msra.mxu1 %v3025_v19  ;;  %2712 = vmatprep.subr.bf16.mxu0 %v3026_v20  ;;  %v385_v5 = vsel %vm3609_vm5, %v380_v63, %v384_v49  ;;  %v3043_v9 = vld [vmem:[#allocation6 + $0x180] sm:$0xff]   ;;  %v3047_v13 = vld [vmem:[#allocation6 + $0x188] sm:$0xff]   ;;  %v390_v19 = vshll.u32 %v343_v14, 16  ;;  %v396_v20 = vshll.u32 %v344_v15, 16  ;;  %v495_v34 = vld [vmem:[%s3577_s28 + $0x14] sm:$0x1] }
  0xaf   : > { %2752 = vmatprep.subr.bf16.mxu1 %v3027_v21  ;;  %v2466_v8 = vcombine.low %v371_v3, %v385_v5  ;;  %v401_v21 = vshrl.u32 %v345_v16, 16  ;;  %v496_v35 = vld [vmem:[%s3577_s28 + $0x18] sm:$0xe]  ;;  %v497_v36 = vld [vmem:[%s3577_s28 + $0x1c] sm:$0x1]  ;;  %v2472_v38 = vrot.slane %v494_v32, 9 }
  0xb0   : > { %v535_v39 = vrot.slane %v495_v34, 5  ;;  %v2473_v40 = vrot.slane %v496_v35, 9  ;;  %v3049_v42 = vld [vmem:[%s3577_s28 + $0x10] ss:$8 sps:$4 sm:$0xff]   ;;  %v539_v43 = vrot.slane %v497_v36, 5  ;;  %v3063_v34 = vld [vmem:[#allocation6 + $0x1a0] sm:$0xff]  }
  0xb1   : > { %2713 = vmatpush3.bf16.msra.mxu0 %v3028_v22  ;;  %1765 = vmatprep.mubr.bf16.mxu0 %v2466_v8  ;;  %v404_v22 = vshll.u32 %v345_v16, 16  ;;  %v3050_v44 = vld [vmem:[#allocation6 + $0x150] sm:$0xff]   ;;  %v3054_v56 = vld [vmem:[#allocation6 + $0x158] sm:$0xff]   ;;  %v347_v60 = vld [vmem:[%s3577_s28 + $0x20] sm:$0xf] }
  0xb2   : > { %2753 = vmatpush3.bf16.msra.mxu1 %v3029_v23  ;;  %2714 = vmatprep.subr.bf16.mxu0 %v3030_v24  ;;  %v410_v23 = vshll.u32 %v346_v17, 16  ;;  %v389_v24 = vrot.slane %v387_v18, 4  ;;  %v3051_v45 = vld [vmem:[#allocation6 + $0x1d0] sm:$0xff]   ;;  %v536_v47 = vsel %vm3603_vm4, %v2472_v38, %v535_v39  ;;  %v540_v49 = vsel %vm3603_vm4, %v2473_v40, %v539_v43  ;;  %v3055_v57 = vld [vmem:[#allocation6 + $0x1d8] sm:$0xff]   ;;  %v348_v61 = vld [vmem:[%s3577_s28 + $0x24] sm:$0x1] }
  0xb3   : > { %2754 = vmatprep.subr.bf16.mxu1 %v3031_v25  ;;  %v392_v25 = vrot.slane %v390_v19, 5  ;;  %v3052_v50 = vld [vmem:[#allocation6 + $0x110] sm:$0xff]   ;;  %v2479_v54 = vcombine.low %v536_v47, %v540_v49  ;;  %v3056_v58 = vld [vmem:[#allocation6 + $0x118] sm:$0xff]   ;;  %v350_v63 = vld [vmem:[%s3577_s28 + $0x2c] sm:$0x1]  ;;  %v418_v1 = vshll.u32 %v347_v60, 16 }
  0xb4   : > { %v3053_v55 = vld [vmem:[#allocation6 + $0x190] sm:$0xff]   ;;  %v3057_v59 = vld [vmem:[#allocation6 + $0x198] sm:$0xff]   ;;  %v438_v5 = vshll.u32 %v350_v63, 16  ;;  %v498_v14 = vld [vmem:[%s3577_s28 + $0x20] sm:$0xe] }
  0xb5   : > { %2715 = vmatpush3.bf16.msra.mxu0 %v3032_v26  ;;  %v3048_v26 = vld [vmem:[%s3577_s28 + $0x18] ss:$8 sps:$4 sm:$0xff]   ;;  %v420_v8 = vrot.slane %v418_v1, 5  ;;  %v499_v15 = vld [vmem:[%s3577_s28 + $0x24] sm:$0x1]  ;;  %v2474_v19 = vrot.slane %v498_v14, 9 }
  0xb6   : > { %2755 = vmatpush3.bf16.msra.mxu1 %v3033_v27  ;;  %2716 = vmatprep.subr.bf16.mxu0 %v3034_v28  ;;  %v403_v27 = vrot.slane %v401_v21, 4  ;;  %v406_v28 = vrot.slane %v404_v22, 5  ;;  %v500_v16 = vld [vmem:[%s3577_s28 + $0x28] sm:$0xe]  ;;  %v501_v18 = vld [vmem:[%s3577_s28 + $0x2c] sm:$0x1] }
  0xb7   : > { %2756 = vmatprep.subr.bf16.mxu1 %v3035_v29  ;;  %v393_v29 = vor.u32 %v392_v25, %v389_v24  ;;  %v2475_v21 = vrot.slane %v500_v16, 9  ;;  %v3060_v22 = vld [vmem:[#allocation6 + $0x160] sm:$0xff]   ;;  %v547_v24 = vrot.slane %v501_v18, 5  ;;  %v3064_v36 = vld [vmem:[#allocation6 + $0x168] sm:$0xff]   ;;  %v351_v40 = vld [vmem:[%s3577_s28 + $0x30] sm:$0xf] }
  0xb8   : > { %v407_v33 = vor.u32 %v406_v28, %v403_v27  ;;  %v3061_v28 = vld [vmem:[#allocation6 + $0x1e0] sm:$0xff]   ;;  %v3066_v38 = vld [vmem:[#allocation6 + $0x128] sm:$0xff]   ;;  %v354_v43 = vld [vmem:[%s3577_s28 + $0x3c] sm:$0x1] }
  0xb9   : > { %2717 = vmatpush3.bf16.msra.mxu0 %v3036_v30  ;;  %v398_v30 = vrot.slane %v396_v20, 5  ;;  %v394_v37 = vrot.slane %v393_v29, 4  ;;  %v543_v20 = vrot.slane %v499_v15, 5  ;;  %v3067_v39 = vld [vmem:[#allocation6 + $0x1a8] sm:$0xff]   ;;  %v466_v49 = vshll.u32 %v354_v43, 16  ;;  %v3072_v15 = vld [vmem:[#allocation6 + $0x130] sm:$0xff]  }
  0xba   : > { %2757 = vmatpush3.bf16.msra.mxu1 %v3037_v31  ;;  %2782 = vmatprep.subr.bf16.mxu0 %v3040_v62  ;;  %v412_v31 = vrot.slane %v410_v23, 5  ;;  %v408_v41 = vrot.slane %v407_v33, 4  ;;  %v349_v62 = vld [vmem:[%s3577_s28 + $0x28] sm:$0xf]  ;;  %v504_v63 = vld [vmem:[%s3577_s28 + $0x38] sm:$0xe] }
  0xbb   : > { %2822 = vmatprep.subr.bf16.mxu1 %v3041_v2  ;;  %v399_v46 = vsel %vm3609_vm5, %v394_v37, %v398_v30  ;;  %v424_v2 = vshll.u32 %v348_v61, 16  ;;  %v429_v3 = vshrl.u32 %v349_v62, 16  ;;  %v432_v4 = vshll.u32 %v349_v62, 16  ;;  %v3065_v37 = vld [vmem:[#allocation6 + $0x1e8] sm:$0xff]   ;;  %v503_v61 = vld [vmem:[%s3577_s28 + $0x34] sm:$0x1] }
  0xbc   : > { %1766 = vmatmul.mubr.bf16.vlgmr.msra.gmra.mrb[0].mxu0 %v3039_v0  ;;  %v413_v48 = vsel %vm3609_vm5, %v408_v41, %v412_v31  ;;  %v415_v0 = vshrl.u32 %v347_v60, 16  ;;  %v544_v27 = vsel %vm3603_vm4, %v2474_v19, %v543_v20  ;;  %v548_v30 = vsel %vm3603_vm4, %v2475_v21, %v547_v24  ;;  %v3062_v31 = vld [vmem:[#allocation6 + $0x120] sm:$0xff]   ;;  %v352_v41 = vld [vmem:[%s3577_s28 + $0x34] sm:$0x1]  ;;  %v502_v60 = vld [vmem:[%s3577_s28 + $0x30] sm:$0xe] }
  0xbd   : > { %1831 = vmatmul.mubr.bf16.vlgmr.msra.gmra.mrb[0].mxu1 %v2478_v6  ;;  %2783 = vmatpush3.bf16.msra.mxu0 %v3042_v7  ;;  %v2467_v51 = vcombine.low %v399_v46, %v413_v48  ;;  %v3058_v6 = vld [vmem:[%s3577_s28 + $0x28] ss:$8 sps:$4 sm:$0xff]   ;;  %v2480_v33 = vcombine.low %v544_v27, %v548_v30  ;;  %v452_v46 = vshll.u32 %v352_v41, 16  ;;  %v2476_v1 = vrot.slane %v502_v60, 9  ;;  %v3074_v18 = vld [vmem:[#allocation6 + $0x178] sm:$0xff]  }
  0xbe   : > { %2823 = vmatpush3.bf16.msra.mxu1 %v3043_v9  ;;  %2784 = vmatprep.subr.bf16.mxu0 %v3044_v10  ;;  %v417_v7 = vrot.slane %v415_v0, 4  ;;  %v431_v9 = vrot.slane %v429_v3, 4  ;;  %v426_v10 = vrot.slane %v424_v2, 5  ;;  %v505_v0 = vld [vmem:[%s3577_s28 + $0x3c] sm:$0x1]  ;;  %v551_v2 = vrot.slane %v503_v61, 5 }
  0xbf   : > { %2824 = vmatprep.subr.bf16.mxu1 %v3045_v11  ;;  %1838 = vmatprep.mubr.bf16.mxu1 %v3048_v26  ;;  %v434_v11 = vrot.slane %v432_v4, 5  ;;  %v3059_v26 = vld [vmem:[%s3577_s28 + $0x20] ss:$8 sps:$4 sm:$0xff]   ;;  %v2477_v4 = vrot.slane %v504_v63, 9  ;;  %v3075_v19 = vld [vmem:[#allocation6 + $0x1f8] sm:$0xff]  }
  0xc0   : > { %1773 = vmatprep.mubr.bf16.mxu0 %v2467_v51  ;;  %v3076_v20 = vld [vmem:[#allocation6 + $0x138] sm:$0xff]   ;;  %v2516_v24 = vld [vmem:[%s3577_s28 + $0x10] sm:$0xe]  ;;  %v2494_v41 = vld [vmem:[%s3577_s28 + $0x8] sm:$0xf] }
  0xc1   : > { %2785 = vmatpush3.bf16.msra.mxu0 %v3046_v12  ;;  %v440_v12 = vrot.slane %v438_v5, 5  ;;  %v435_v17 = vor.u32 %v434_v11, %v431_v9  ;;  %v555_v5 = vrot.slane %v505_v0, 5  ;;  %v552_v9 = vsel %vm3603_vm4, %v2476_v1, %v551_v2  ;;  %v3077_v21 = vld [vmem:[#allocation6 + $0x1b8] sm:$0xff]   ;;  %v2554_v30 = vld [vmem:[%s3577_s28 + $0x10] sm:$0xf] }
  0xc2   : > { %2825 = vmatpush3.bf16.msra.mxu1 %v3047_v13  ;;  %2786 = vmatprep.subr.bf16.mxu0 %v3050_v44  ;;  %v421_v13 = vor.u32 %v420_v8, %v417_v7  ;;  %v443_v44 = vshrl.u32 %v351_v40, 16  ;;  %v3069_v8 = vld [vmem:[%s3577_s28 + $0x30] ss:$8 sps:$4 sm:$0xff]  }
  0xc3   : > { %2826 = vmatprep.subr.bf16.mxu1 %v3051_v45  ;;  %v436_v25 = vrot.slane %v435_v17, 4  ;;  %v446_v45 = vshll.u32 %v351_v40, 16  ;;  %v3073_v17 = vld [vmem:[#allocation6 + $0x1b0] sm:$0xff]  }
  0xc4   : > { %1774 = vmatmul.mubr.bf16.gmra.mrb[4].mxu0 %v3049_v42  ;;  %v422_v23 = vrot.slane %v421_v13, 4  ;;  %v353_v42 = vld [vmem:[%s3577_s28 + $0x38] sm:$0xf] }
  0xc5   : > { %2787 = vmatpush3.bf16.msra.mxu0 %v3052_v50  ;;  %1839 = vmatmul.mubr.bf16.gmra.mrb[4].mxu1 %v2479_v54  ;;  %v441_v32 = vsel %vm3609_vm5, %v436_v25, %v440_v12  ;;  %v457_v47 = vshrl.u32 %v353_v42, 16  ;;  %v460_v48 = vshll.u32 %v353_v42, 16  ;;  %v445_v50 = vrot.slane %v443_v44, 4  ;;  %v2517_v25 = vld [vmem:[%s3577_s28 + $0x14] sm:$0x1]  ;;  %v3691_v42 = vld [vmem:[#allocation6 + $0x200] sm:$0xff]  }
  0xc6   : > { %2827 = vmatpush3.bf16.msra.mxu1 %v3053_v55  ;;  %2788 = vmatprep.subr.bf16.mxu0 %v3054_v56  ;;  %v427_v29 = vsel %vm3609_vm5, %v422_v23, %v426_v10  ;;  %v448_v51 = vrot.slane %v446_v45, 5  ;;  %v3068_v55 = vld [vmem:[%s3577_s28 + $0x38] ss:$8 sps:$4 sm:$0xff]   ;;  %v3071_v10 = vld [vmem:[#allocation6 + $0x1f0] sm:$0xff]   ;;  %v556_v12 = vsel %vm3603_vm4, %v2477_v4, %v555_v5  ;;  %v2515_v23 = vld [vmem:[%s3577_s28 + $0xc] sm:$0x1] }
  0xc7   : > { %2828 = vmatprep.subr.bf16.mxu1 %v3055_v57  ;;  %1846 = vmatprep.mubr.bf16.mxu1 %v3058_v6  ;;  %v2468_v35 = vcombine.low %v427_v29, %v441_v32  ;;  %v459_v54 = vrot.slane %v457_v47, 4  ;;  %v462_v56 = vrot.slane %v460_v48, 5  ;;  %v3070_v6 = vld [vmem:[#allocation6 + $0x170] sm:$0xff]   ;;  %v2481_v14 = vcombine.low %v552_v9, %v556_v12  ;;  %v2495_v47 = vld [vmem:[%s3577_s28 + $0xc] sm:$0x1] }
  0xc8   : > { %v449_v57 = vor.u32 %v448_v51, %v445_v50  ;;  %v799_v27 = vrot.slane %v2515_v23, 5  ;;  %v803_v29 = vrot.slane %v2517_v25, 5  ;;  %v2496_v51 = vld [vmem:[%s3577_s28 + $0x10] sm:$0xf] }
  0xc9   : > { %2789 = vmatpush3.bf16.msra.mxu0 %v3056_v58  ;;  %1781 = vmatprep.mubr.bf16.mxu0 %v2468_v35  ;;  %v454_v58 = vrot.slane %v452_v46, 5  ;;  %v463_v62 = vor.u32 %v462_v56, %v459_v54  ;;  %v906_v35 = vshrl.u32 %v2554_v30, 16  ;;  %v634_v54 = vshrl.u32 %v2494_v41, 16 }
  0xca   : > { %2829 = vmatpush3.bf16.msra.mxu1 %v3057_v59  ;;  %2790 = vmatprep.subr.bf16.mxu0 %v3060_v22  ;;  %v468_v59 = vrot.slane %v466_v49, 5  ;;  %v450_v3 = vrot.slane %v449_v57, 4  ;;  %v2514_v22 = vld [vmem:[%s3577_s28 + $0x8] sm:$0xe]  ;;  %v2497_v57 = vld [vmem:[%s3577_s28 + $0x14] sm:$0x1] }
  0xcb   : > { %2830 = vmatprep.subr.bf16.mxu1 %v3061_v28  ;;  %v464_v7 = vrot.slane %v463_v62, 4  ;;  %v2531_v28 = vrot.slane %v2516_v24, 9  ;;  %v908_v44 = vrot.slane %v906_v35, 4  ;;  %v636_v61 = vrot.slane %v634_v54, 4 }
  0xcc   : > { %1782 = vmatmul.mubr.bf16.gmra.mrb[8].mxu0 %v3059_v26  ;;  %v455_v11 = vsel %vm3609_vm5, %v450_v3, %v454_v58  ;;  %v2530_v26 = vrot.slane %v2514_v22, 9  ;;  %v637_v58 = vshll.u32 %v2494_v41, 16  ;;  %v648_v62 = vshrl.u32 %v2496_v51, 16 }
  0xcd   : > { %2791 = vmatpush3.bf16.msra.mxu0 %v3062_v31  ;;  %1847 = vmatmul.mubr.bf16.gmra.mrb[8].mxu1 %v2480_v33  ;;  %v469_v13 = vsel %vm3609_vm5, %v464_v7, %v468_v59  ;;  %v2555_v31 = vld [vmem:[%s3577_s28 + $0x14] sm:$0x1]  ;;  %v2556_v33 = vld [vmem:[%s3577_s28 + $0x18] sm:$0xf]  ;;  %v643_v59 = vshll.u32 %v2495_v47, 16  ;;  %v651_v63 = vshll.u32 %v2496_v51, 16 }
  0xce   : > { %2831 = vmatpush3.bf16.msra.mxu1 %v3063_v34  ;;  %2792 = vmatprep.subr.bf16.mxu0 %v3064_v36  ;;  %v2469_v16 = vcombine.low %v455_v11, %v469_v13  ;;  %v800_v32 = vsel %vm3603_vm4, %v2530_v26, %v799_v27  ;;  %v2557_v34 = vld [vmem:[%s3577_s28 + $0x1c] sm:$0x1]  ;;  %v909_v36 = vshll.u32 %v2554_v30, 16  ;;  %v923_v40 = vshll.u32 %v2556_v33, 16  ;;  %v2518_v13 = vld [vmem:[%s3577_s28 + $0x18] sm:$0xe] }
  0xcf   : > { %2832 = vmatprep.subr.bf16.mxu1 %v3065_v37  ;;  %1854 = vmatprep.mubr.bf16.mxu1 %v3068_v55  ;;  %v804_v37 = vsel %vm3603_vm4, %v2531_v28, %v803_v29  ;;  %v929_v46 = vshll.u32 %v2557_v34, 16  ;;  %v639_v1 = vrot.slane %v637_v58, 5  ;;  %v657_v2 = vshll.u32 %v2497_v57, 16  ;;  %v2558_v26 = vld [vmem:[%s3577_s28 + $0x20] sm:$0xf] }
  0xd0   : > { %1789 = vmatprep.mubr.bf16.mxu0 %v2469_v16  ;;  %v2538_v43 = vcombine.low %v800_v32, %v804_v37  ;;  %v911_v45 = vrot.slane %v909_v36, 5  ;;  %v925_v50 = vrot.slane %v923_v40, 5  ;;  %v650_v4 = vrot.slane %v648_v62, 4  ;;  %v2519_v16 = vld [vmem:[%s3577_s28 + $0x1c] sm:$0x1] }
  0xd1   : > { %2793 = vmatpush3.bf16.msra.mxu0 %v3066_v38  ;;  %v915_v38 = vshll.u32 %v2555_v31, 16  ;;  %v931_v56 = vrot.slane %v929_v46, 5  ;;  %v653_v5 = vrot.slane %v651_v63, 5  ;;  %v645_v9 = vrot.slane %v643_v59, 5  ;;  %v2559_v27 = vld [vmem:[%s3577_s28 + $0x24] sm:$0x1] }
  0xd2   : > { %2833 = vmatpush3.bf16.msra.mxu1 %v3067_v39  ;;  %2794 = vmatprep.subr.bf16.mxu0 %v3070_v6  ;;  %v920_v39 = vshrl.u32 %v2556_v33, 16  ;;  %v912_v55 = vor.u32 %v911_v45, %v908_v44  ;;  %v3078_v6 = vld [vmem:[%s3577_s28 + $0x10] ss:$8 sps:$4 sm:$0xff]   ;;  %v807_v22 = vrot.slane %v2519_v16, 5  ;;  %v2560_v30 = vld [vmem:[%s3577_s28 + $0x28] sm:$0xf] }
  0xd3   : > { %2834 = vmatprep.subr.bf16.mxu1 %v3071_v10  ;;  %v917_v48 = vrot.slane %v915_v38, 5  ;;  %v659_v10 = vrot.slane %v657_v2, 5  ;;  %v654_v12 = vor.u32 %v653_v5, %v650_v4  ;;  %v2561_v31 = vld [vmem:[%s3577_s28 + $0x2c] sm:$0x1]  ;;  %v934_v32 = vshrl.u32 %v2558_v26, 16  ;;  %v3082_v46 = vld [vmem:[#allocation6 + $0x210] sm:$0xff]  }
  0xd4   : > { %1790 = vmatmul.mubr.bf16.gmra.mrb[12].mxu0 %v3069_v8  ;;  %v922_v49 = vrot.slane %v920_v39, 4  ;;  %v913_v0 = vrot.slane %v912_v55, 4  ;;  %v640_v8 = vor.u32 %v639_v1, %v636_v61  ;;  %v937_v33 = vshll.u32 %v2558_v26, 16  ;;  %v2498_v38 = vld [vmem:[%s3577_s28 + $0x18] sm:$0xf]  ;;  %v3085_v26 = vld [vmem:[#allocation6 + $0x220] sm:$0xff]  }
  0xd5   : > { %1855 = vmatmul.mubr.bf16.gmra.mrb[12].mxu1 %v2481_v14  ;;  %2795 = vmatpush3.bf16.msra.mxu0 %v3072_v15  ;;  %v943_v36 = vshll.u32 %v2559_v27, 16  ;;  %v948_v37 = vshrl.u32 %v2560_v30, 16  ;;  %v2499_v39 = vld [vmem:[%s3577_s28 + $0x1c] sm:$0x1]  ;;  %v936_v41 = vrot.slane %v934_v32, 4  ;;  %v951_v44 = vshll.u32 %v2560_v30, 16 }
  0xd6   : > { %2835 = vmatpush3.bf16.msra.mxu1 %v3073_v17  ;;  %2796 = vmatprep.subr.bf16.mxu0 %v3074_v18  ;;  %v926_v60 = vor.u32 %v925_v50, %v922_v49  ;;  %v918_v7 = vsel %vm3609_vm5, %v913_v0, %v917_v48  ;;  %v641_v15 = vrot.slane %v640_v8, 4  ;;  %v2520_v17 = vld [vmem:[%s3577_s28 + $0x20] sm:$0xe]  ;;  %v2532_v18 = vrot.slane %v2518_v13, 9  ;;  %v2501_v50 = vld [vmem:[%s3577_s28 + $0x24] sm:$0x1] }
  0xd7   : > { %2836 = vmatprep.subr.bf16.mxu1 %v3075_v19  ;;  %1895 = vmatprep.mubr.bf16.mxu0 %v2538_v43  ;;  %v655_v19 = vrot.slane %v654_v12, 4  ;;  %v2533_v23 = vrot.slane %v2520_v17, 9  ;;  %v939_v43 = vrot.slane %v937_v33, 5  ;;  %v2500_v45 = vld [vmem:[%s3577_s28 + $0x20] sm:$0xf]  ;;  %v945_v47 = vrot.slane %v943_v36, 5 }
  0xd8   : > { %v927_v3 = vrot.slane %v926_v60, 4  ;;  %v646_v24 = vsel %vm3609_vm5, %v641_v15, %v645_v9  ;;  %v808_v29 = vsel %vm3603_vm4, %v2532_v18, %v807_v22  ;;  %v950_v48 = vrot.slane %v948_v37, 4  ;;  %v3083_v1 = vld [vmem:[#allocation6 + $0x218] sm:$0xff]   ;;  %v3081_v8 = vld [vmem:[%s3577_s28 + $0x20] ss:$8 sps:$4 sm:$0xff]  }
  0xd9   : > { %2797 = vmatpush3.bf16.msra.mxu0 %v3076_v20  ;;  %v3080_v20 = vld [vmem:[#allocation6 + $0x208] sm:$0xff]   ;;  %v660_v28 = vsel %vm3609_vm5, %v655_v19, %v659_v10  ;;  %v957_v49 = vshll.u32 %v2561_v31, 16  ;;  %v662_v51 = vshrl.u32 %v2498_v38, 16  ;;  %v940_v54 = vor.u32 %v939_v43, %v936_v41  ;;  %v2524_v15 = vld [vmem:[%s3577_s28 + $0x30] sm:$0xe] }
  0xda   : > { %2837 = vmatpush3.bf16.msra.mxu1 %v3077_v21  ;;  %2874 = vmatprep.subr.bf16.mxu0 %v3691_v42  ;;  %v932_v11 = vsel %vm3609_vm5, %v927_v3, %v931_v56  ;;  %v2521_v21 = vld [vmem:[%s3577_s28 + $0x24] sm:$0x1]  ;;  %v2510_v34 = vcombine.low %v646_v24, %v660_v28  ;;  %v953_v55 = vrot.slane %v951_v44, 5  ;;  %v665_v56 = vshll.u32 %v2498_v38, 16  ;;  %v2525_v19 = vld [vmem:[%s3577_s28 + $0x34] sm:$0x1] }
  0xdb   : > { %2898 = vmatprep.subr.bf16.mxu1 %v3691_v42  ;;  %v2570_v14 = vcombine.low %v918_v7, %v932_v11  ;;  %v811_v25 = vrot.slane %v2521_v21, 5  ;;  %v671_v57 = vshll.u32 %v2499_v39, 16  ;;  %v664_v58 = vrot.slane %v662_v51, 4  ;;  %v2522_v11 = vld [vmem:[%s3577_s28 + $0x28] sm:$0xe] }
  0xdc   : > { %1896 = vmatmul.mubr.bf16.vlgmr.msra.gmra.mrb[16].mxu0 %v2510_v34  ;;  %v676_v59 = vshrl.u32 %v2500_v45, 16  ;;  %v679_v60 = vshll.u32 %v2500_v45, 16  ;;  %v941_v61 = vrot.slane %v940_v54, 4  ;;  %v954_v62 = vor.u32 %v953_v55, %v950_v48  ;;  %v2562_v24 = vld [vmem:[%s3577_s28 + $0x30] sm:$0xf]  ;;  %v3086_v45 = vld [vmem:[#allocation6 + $0x228] sm:$0xff]  }
  0xdd   : > { %1960 = vmatprep.mubr.bf16.mxu1 %v2570_v14  ;;  %v812_v35 = vsel %vm3603_vm4, %v2533_v23, %v811_v25  ;;  %2875 = vmatpush3.bf16.msra.mxu0 %v3691_v42  ;;  %v959_v63 = vrot.slane %v957_v49, 5  ;;  %v667_v0 = vrot.slane %v665_v56, 5  ;;  %v685_v3 = vshll.u32 %v2501_v50, 16  ;;  %v2523_v14 = vld [vmem:[%s3577_s28 + $0x2c] sm:$0x1] }
  0xde   : > { %1961 = vmatmul.mubr.bf16.vlgmr.msra.gmra.mrb[16].mxu1 %v3078_v6  ;;  %v2539_v40 = vcombine.low %v808_v29, %v812_v35  ;;  %2876 = vmatprep.subr.bf16.mxu0 %v3080_v20  ;;  %v678_v2 = vrot.slane %v676_v59, 4  ;;  %v946_v4 = vsel %vm3609_vm5, %v941_v61, %v945_v47  ;;  %v955_v5 = vrot.slane %v954_v62, 4  ;;  %v2563_v25 = vld [vmem:[%s3577_s28 + $0x34] sm:$0x1]  ;;  %v2564_v29 = vld [vmem:[%s3577_s28 + $0x38] sm:$0xf] }
  0xdf   : > { %2906 = vmatpush3.bf16.msra.mxu1 %v3691_v42  ;;  %v681_v42 = vrot.slane %v679_v60, 5  ;;  %v668_v6 = vor.u32 %v667_v0, %v664_v58  ;;  %v673_v7 = vrot.slane %v671_v57, 5  ;;  %v687_v10 = vrot.slane %v685_v3, 5  ;;  %v2565_v30 = vld [vmem:[%s3577_s28 + $0x3c] sm:$0x1] }
  0xe0   : > { %2899 = vmatprep.subr.bf16.mxu1 %v3080_v20  ;;  %1903 = vmatprep.mubr.bf16.mxu0 %v2539_v40  ;;  %v960_v12 = vsel %vm3609_vm5, %v955_v5, %v959_v63  ;;  %v2534_v16 = vrot.slane %v2522_v11, 9  ;;  %v2535_v21 = vrot.slane %v2524_v15, 9  ;;  %v819_v23 = vrot.slane %v2525_v19, 5  ;;  %v2502_v37 = vld [vmem:[%s3577_s28 + $0x28] sm:$0xf] }
  0xe1   : > { %2877 = vmatpush3.bf16.msra.mxu0 %v3080_v20  ;;  %v682_v9 = vor.u32 %v681_v42, %v678_v2  ;;  %v669_v13 = vrot.slane %v668_v6, 4  ;;  %v2571_v17 = vcombine.low %v946_v4, %v960_v12  ;;  %v962_v31 = vshrl.u32 %v2562_v24, 16  ;;  %v2503_v38 = vld [vmem:[%s3577_s28 + $0x2c] sm:$0x1]  ;;  %v2504_v44 = vld [vmem:[%s3577_s28 + $0x30] sm:$0xf] }
  0xe2   : > { %2878 = vmatprep.subr.bf16.mxu0 %v3082_v46  ;;  %v965_v32 = vshll.u32 %v2562_v24, 16  ;;  %v820_v34 = vsel %vm3603_vm4, %v2535_v21, %v819_v23  ;;  %v971_v35 = vshll.u32 %v2563_v25, 16  ;;  %v976_v36 = vshrl.u32 %v2564_v29, 16  ;;  %v2505_v49 = vld [vmem:[%s3577_s28 + $0x34] sm:$0x1]  ;;  %v3089_v25 = vld [vmem:[#allocation6 + $0x238] sm:$0xff]  }
  0xe3   : > { %2907 = vmatpush3.bf16.msra.mxu1 %v3080_v20  ;;  %v683_v18 = vrot.slane %v682_v9, 4  ;;  %v815_v20 = vrot.slane %v2523_v14, 5  ;;  %v674_v22 = vsel %vm3609_vm5, %v669_v13, %v673_v7  ;;  %1968 = vmatprep.mubr.bf16.mxu1 %v2571_v17  ;;  %v964_v40 = vrot.slane %v962_v31, 4  ;;  %v3084_v7 = vld [vmem:[%s3577_s28 + $0x30] ss:$8 sps:$4 sm:$0xff]  }
  0xe4   : > { %2900 = vmatprep.subr.bf16.mxu1 %v3082_v46  ;;  %v967_v41 = vrot.slane %v965_v32, 5  ;;  %v979_v43 = vshll.u32 %v2564_v29, 16  ;;  %v978_v47 = vrot.slane %v976_v36, 4  ;;  %v985_v48 = vshll.u32 %v2565_v30, 16  ;;  %v2527_v13 = vld [vmem:[%s3577_s28 + $0x3c] sm:$0x1] }
  0xe5   : > { %2879 = vmatpush3.bf16.msra.mxu0 %v3082_v46  ;;  %v688_v27 = vsel %vm3609_vm5, %v683_v18, %v687_v10  ;;  %v816_v28 = vsel %vm3603_vm4, %v2534_v16, %v815_v20  ;;  %v690_v50 = vshrl.u32 %v2502_v37, 16  ;;  %v693_v55 = vshll.u32 %v2502_v37, 16  ;;  %v2526_v10 = vld [vmem:[%s3577_s28 + $0x38] sm:$0xe]  ;;  %v2528_v14 = vld [vmem:[%s3577_s28 + $0x40] sm:$0xe] }
  0xe6   : > { %2880 = vmatprep.subr.bf16.mxu0 %v3083_v1  ;;  %v2511_v33 = vcombine.low %v674_v22, %v688_v27  ;;  %1969 = vmatmul.mubr.bf16.gmra.mrb[20].mxu1 %v3081_v8  ;;  %v2540_v39 = vcombine.low %v816_v28, %v820_v34  ;;  %v968_v51 = vor.u32 %v967_v41, %v964_v40  ;;  %v981_v54 = vrot.slane %v979_v43, 5  ;;  %v2529_v18 = vld [vmem:[%s3577_s28 + $0x44] sm:$0x1]  ;;  %v2566_v23 = vld [vmem:[%s3577_s28 + $0x40] sm:$0xf] }
  0xe7   : > { %2908 = vmatpush3.bf16.msra.mxu1 %v3082_v46  ;;  %v973_v46 = vrot.slane %v971_v35, 5  ;;  %v699_v56 = vshll.u32 %v2503_v38, 16  ;;  %v692_v57 = vrot.slane %v690_v50, 4  ;;  %v704_v58 = vshrl.u32 %v2504_v44, 16  ;;  %v2567_v24 = vld [vmem:[%s3577_s28 + $0x44] sm:$0x1] }
  0xe8   : > { %2901 = vmatprep.subr.bf16.mxu1 %v3083_v1  ;;  %1904 = vmatmul.mubr.bf16.gmra.mrb[20].mxu0 %v2511_v33  ;;  %v707_v59 = vshll.u32 %v2504_v44, 16  ;;  %v969_v60 = vrot.slane %v968_v51, 4  ;;  %v982_v61 = vor.u32 %v981_v54, %v978_v47  ;;  %v987_v62 = vrot.slane %v985_v48, 5  ;;  %v2568_v28 = vld [vmem:[%s3577_s28 + $0x48] sm:$0xf] }
  0xe9   : > { %2881 = vmatpush3.bf16.msra.mxu0 %v3083_v1  ;;  %1911 = vmatprep.mubr.bf16.mxu0 %v2540_v39  ;;  %v695_v63 = vrot.slane %v693_v55, 5  ;;  %v706_v0 = vrot.slane %v704_v58, 4  ;;  %v713_v42 = vshll.u32 %v2505_v49, 16  ;;  %v701_v6 = vrot.slane %v699_v56, 5  ;;  %v2569_v29 = vld [vmem:[%s3577_s28 + $0x4c] sm:$0x1] }
  0xea   : > { %2882 = vmatprep.subr.bf16.mxu0 %v3085_v26  ;;  %v709_v2 = vrot.slane %v707_v59, 5  ;;  %v974_v3 = vsel %vm3609_vm5, %v969_v60, %v973_v46  ;;  %v983_v4 = vrot.slane %v982_v61, 4  ;;  %v2536_v15 = vrot.slane %v2526_v10, 9  ;;  %v2506_v36 = vld [vmem:[%s3577_s28 + $0x38] sm:$0xf] }
  0xeb   : > { %2909 = vmatpush3.bf16.msra.mxu1 %v3083_v1  ;;  %v3088_v1 = vld [vmem:[#allocation6 + $0x230] sm:$0xff]   ;;  %v696_v5 = vor.u32 %v695_v63, %v692_v57  ;;  %v715_v9 = vrot.slane %v713_v42, 5  ;;  %v823_v19 = vrot.slane %v2527_v13, 5  ;;  %v2537_v20 = vrot.slane %v2528_v14, 9  ;;  %v2507_v37 = vld [vmem:[%s3577_s28 + $0x3c] sm:$0x1] }
  0xec   : > { %2902 = vmatprep.subr.bf16.mxu1 %v3085_v26  ;;  %v710_v8 = vor.u32 %v709_v2, %v706_v0  ;;  %v988_v11 = vsel %vm3609_vm5, %v983_v4, %v987_v62  ;;  %v827_v22 = vrot.slane %v2529_v18, 5  ;;  %v990_v30 = vshrl.u32 %v2566_v23, 16  ;;  %v2508_v43 = vld [vmem:[%s3577_s28 + $0x40] sm:$0xf]  ;;  %v2509_v47 = vld [vmem:[%s3577_s28 + $0x44] sm:$0x1] }
  0xed   : > { %2883 = vmatpush3.bf16.msra.mxu0 %v3085_v26  ;;  %v697_v12 = vrot.slane %v696_v5, 4  ;;  %v2572_v16 = vcombine.low %v974_v3, %v988_v11  ;;  %v824_v27 = vsel %vm3603_vm4, %v2536_v15, %v823_v19  ;;  %v993_v31 = vshll.u32 %v2566_v23, 16  ;;  %v3087_v4 = vld [vmem:[%s3577_s28 + $0x40] ss:$8 sps:$4 sm:$0xff]   ;;  %v2575_v10 = vld [vmem:[%s3577_s28 + $0x14] sm:$0x1] }
  0xee   : > { %2884 = vmatprep.subr.bf16.mxu0 %v3086_v45  ;;  %v711_v17 = vrot.slane %v710_v8, 4  ;;  %v828_v33 = vsel %vm3603_vm4, %v2537_v20, %v827_v22  ;;  %v999_v34 = vshll.u32 %v2567_v24, 16  ;;  %v1004_v35 = vshrl.u32 %v2568_v28, 16  ;;  %v2576_v11 = vld [vmem:[%s3577_s28 + $0x18] sm:$0xe] }
  0xef   : > { %2910 = vmatpush3.bf16.msra.mxu1 %v3085_v26  ;;  %v702_v21 = vsel %vm3609_vm5, %v697_v12, %v701_v6  ;;  %1976 = vmatprep.mubr.bf16.mxu1 %v2572_v16  ;;  %v2541_v38 = vcombine.low %v824_v27, %v828_v33  ;;  %v992_v39 = vrot.slane %v990_v30, 4  ;;  %v995_v40 = vrot.slane %v993_v31, 5  ;;  %v2577_v15 = vld [vmem:[%s3577_s28 + $0x1c] sm:$0x1]  ;;  %v2582_v20 = vld [vmem:[%s3577_s28 + $0x30] sm:$0xe] }
  0xf0   : > { %2903 = vmatprep.subr.bf16.mxu1 %v3086_v45  ;;  %v716_v26 = vsel %vm3609_vm5, %v711_v17, %v715_v9  ;;  %1977 = vmatmul.mubr.bf16.gmra.mrb[24].mxu1 %v3084_v7  ;;  %v1007_v41 = vshll.u32 %v2568_v28, 16  ;;  %v1001_v44 = vrot.slane %v999_v34, 5  ;;  %v1013_v46 = vshll.u32 %v2569_v29, 16  ;;  %v2574_v7 = vld [vmem:[%s3577_s28 + $0x10] sm:$0xe] }
  0xf1   : > { %2885 = vmatpush3.bf16.msra.mxu0 %v3086_v45  ;;  %v2512_v32 = vcombine.low %v702_v21, %v716_v26  ;;  %v718_v48 = vshrl.u32 %v2506_v36, 16  ;;  %v996_v49 = vor.u32 %v995_v40, %v992_v39  ;;  %v721_v51 = vshll.u32 %v2506_v36, 16  ;;  %v2583_v21 = vld [vmem:[%s3577_s28 + $0x34] sm:$0x1]  ;;  %v2584_v24 = vld [vmem:[%s3577_s28 + $0x38] sm:$0xe] }
  0xf2   : > { %2886 = vmatprep.subr.bf16.mxu0 %v3088_v1  ;;  %v1009_v50 = vrot.slane %v1007_v41, 5  ;;  %v727_v54 = vshll.u32 %v2507_v37, 16  ;;  %v732_v56 = vshrl.u32 %v2508_v43, 16  ;;  %v735_v57 = vshll.u32 %v2508_v43, 16  ;;  %v2579_v33 = vld [vmem:[%s3577_s28 + $0x24] sm:$0x1] }
  0xf3   : > { %2911 = vmatpush3.bf16.msra.mxu1 %v3086_v45  ;;  %1912 = vmatmul.mubr.bf16.gmra.mrb[24].mxu0 %v2512_v32  ;;  %v1006_v45 = vrot.slane %v1004_v35, 4  ;;  %v720_v55 = vrot.slane %v718_v48, 4  ;;  %v997_v58 = vrot.slane %v996_v49, 4  ;;  %v1015_v60 = vrot.slane %v1013_v46, 5  ;;  %v2578_v32 = vld [vmem:[%s3577_s28 + $0x20] sm:$0xe] }
  0xf4   : > { %2904 = vmatprep.subr.bf16.mxu1 %v3088_v1  ;;  %1919 = vmatprep.mubr.bf16.mxu0 %v2541_v38  ;;  %v723_v61 = vrot.slane %v721_v51, 5  ;;  %v734_v62 = vrot.slane %v732_v56, 4  ;;  %v737_v63 = vrot.slane %v735_v57, 5  ;;  %v741_v0 = vshll.u32 %v2509_v47, 16  ;;  %v2580_v36 = vld [vmem:[%s3577_s28 + $0x28] sm:$0xe] }
  0xf5   : > { %2887 = vmatpush3.bf16.msra.mxu0 %v3088_v1  ;;  %v1010_v59 = vor.u32 %v1009_v50, %v1006_v45  ;;  %v1002_v2 = vsel %vm3609_vm5, %v997_v58, %v1001_v44  ;;  %v729_v3 = vrot.slane %v727_v54, 5  ;;  %v2590_v12 = vrot.slane %v2574_v7, 9  ;;  %v2581_v37 = vld [vmem:[%s3577_s28 + $0x2c] sm:$0x1]  ;;  %v2586_v44 = vld [vmem:[%s3577_s28 + $0x40] sm:$0xe] }
  0xf6   : > { %2888 = vmatprep.subr.bf16.mxu0 %v3089_v25  ;;  %v738_v5 = vor.u32 %v737_v63, %v734_v62  ;;  %v743_v6 = vrot.slane %v741_v0, 5  ;;  %v1071_v16 = vrot.slane %v2575_v10, 5  ;;  %v2591_v17 = vrot.slane %v2576_v11, 9  ;;  %v2587_v45 = vld [vmem:[%s3577_s28 + $0x44] sm:$0x1] }
  0xf7   : > { %2912 = vmatpush3.bf16.msra.mxu1 %v3088_v1  ;;  %v1011_v42 = vrot.slane %v1010_v59, 4  ;;  %v724_v1 = vor.u32 %v723_v61, %v720_v55  ;;  %v1075_v19 = vrot.slane %v2577_v15, 5  ;;  %v2594_v26 = vrot.slane %v2582_v20, 9  ;;  %v2588_v48 = vld [vmem:[%s3577_s28 + $0x48] sm:$0xe] }
  0xf8   : > { %2905 = vmatprep.subr.bf16.mxu1 %v3089_v25  ;;  %v739_v14 = vrot.slane %v738_v5, 4  ;;  %v1072_v23 = vsel %vm3603_vm4, %v2590_v12, %v1071_v16  ;;  %v1087_v27 = vrot.slane %v2583_v21, 5  ;;  %v2595_v30 = vrot.slane %v2584_v24, 9  ;;  %v2589_v49 = vld [vmem:[%s3577_s28 + $0x4c] sm:$0x1] }
  0xf9   : > { %2889 = vmatpush3.bf16.msra.mxu0 %v3089_v25  ;;  %v1016_v8 = vsel %vm3609_vm5, %v1011_v42, %v1015_v60  ;;  %v725_v9 = vrot.slane %v724_v1, 4  ;;  %v1076_v29 = vsel %vm3603_vm4, %v2591_v17, %v1075_v19  ;;  %v2592_v38 = vrot.slane %v2578_v32, 9 }
  0xfa   : > { %v2573_v13 = vcombine.low %v1002_v2, %v1016_v8  ;;  %v744_v22 = vsel %vm3609_vm5, %v739_v14, %v743_v6  ;;  %v2598_v34 = vcombine.low %v1072_v23, %v1076_v29  ;;  %v1088_v35 = vsel %vm3603_vm4, %v2594_v26, %v1087_v27 }
  0xfb   : > { %2913 = vmatpush3.bf16.msra.mxu1 %v3089_v25  ;;  %v730_v18 = vsel %vm3609_vm5, %v725_v9, %v729_v3  ;;  %v2585_v25 = vld [vmem:[%s3577_s28 + $0x3c] sm:$0x1]  ;;  %v1079_v39 = vrot.slane %v2579_v33, 5  ;;  %v2593_v41 = vrot.slane %v2580_v36, 9  ;;  %v1083_v43 = vrot.slane %v2581_v37, 5 }
  0xfc   : > { %1984 = vmatprep.mubr.bf16.mxu1 %v2573_v13  ;;  %v2513_v28 = vcombine.low %v730_v18, %v744_v22  ;;  %v1091_v31 = vrot.slane %v2585_v25, 5  ;;  %v2596_v50 = vrot.slane %v2586_v44, 9  ;;  %v1095_v51 = vrot.slane %v2587_v45, 5 }
  0xfd   : > { %1985 = vmatmul.mubr.bf16.gmra.mrb[28].mxu1 %v3087_v4  ;;  %v1080_v47 = vsel %vm3603_vm4, %v2592_v38, %v1079_v39  ;;  %v1084_v54 = vsel %vm3603_vm4, %v2593_v41, %v1083_v43  ;;  %v2597_v55 = vrot.slane %v2588_v48, 9  ;;  %v1099_v56 = vrot.slane %v2589_v49, 5 }
  0xfe   : > { %1920 = vmatmul.mubr.bf16.gmra.mrb[28].mxu0 %v2513_v28  ;;  %v1092_v40 = vsel %vm3603_vm4, %v2595_v30, %v1091_v31  ;;  %v1096_v57 = vsel %vm3603_vm4, %v2596_v50, %v1095_v51  ;;  %v2599_v58 = vcombine.low %v1080_v47, %v1084_v54 }
  0xff   : > { %2890 = vmatprep.mubr.bf16.mxu0 %v2598_v34  ;;  %v2600_v46 = vcombine.low %v1088_v35, %v1092_v40  ;;  %v1100_v59 = vsel %vm3603_vm4, %v2597_v55, %v1099_v56 }
 0x100   : > { %v2601_v60 = vcombine.low %v1096_v57, %v1100_v59 }
 0x101   : > { %2894 = vmatprep.mubr.bf16.mxu1 %v2600_v46 }
 0x105   : > { %2895 = vmatmul.mubr.bf16.vlgmr.msra.gmra.mrb[32].mxu1 %v2601_v60 }
 0x106   : > { %2891 = vmatmul.mubr.bf16.vlgmr.msra.gmra.mrb[32].mxu0 %v2599_v58 }
 0x18f   : > { %v2718_v63 = vpop.f32.mrb[0].mxu0 }
 0x190   : > { %v2758_v61 = vpop.f32.mrb[0].mxu1  ;;  %v2719_v42 = vpop.f32.mrb[1].mxu0 }
 0x191   : > { %v2759_v62 = vpop.f32.mrb[1].mxu1  ;;  %v2720_v3 = vadd.f32 %v2719_v42, %v2718_v63  ;;  %v2721_v4 = vpop.f32.mrb[2].mxu0 }
 0x192   : > { %v2760_v0 = vadd.f32 %v2759_v62, %v2758_v61  ;;  %v2761_v2 = vpop.f32.mrb[2].mxu1  ;;  %v2722_v6 = vpop.f32.mrb[3].mxu0 }
 0x193   : > { %v2762_v1 = vpop.f32.mrb[3].mxu1  ;;  %v2723_v8 = vadd.f32 %v2722_v6, %v2721_v4 }
 0x194   : > { %v2763_v5 = vadd.f32 %v2762_v1, %v2761_v2  ;;  %v1833_v7 = vadd.f32 %v2760_v0, %v2720_v3 }
 0x196   : > { %v1836_v9 = vadd.f32 %v2763_v5, %v2723_v8 }
 0x197   : > { %v2724_v52 = vpop.f32.mrb[4].mxu0 }
 0x198   : > { %v2764_v10 = vpop.f32.mrb[4].mxu1  ;;  %v2725_v12 = vpop.f32.mrb[5].mxu0 }
 0x199   : > { %v2765_v11 = vpop.f32.mrb[5].mxu1  ;;  %v2726_v15 = vadd.f32 %v2725_v12, %v2724_v52  ;;  %v2727_v16 = vpop.f32.mrb[6].mxu0 }
 0x19a   : > { %v2766_v13 = vadd.f32 %v2765_v11, %v2764_v10  ;;  %v2767_v14 = vpop.f32.mrb[6].mxu1  ;;  %v2728_v18 = vpop.f32.mrb[7].mxu0 }
 0x19b   : > { %v2768_v17 = vpop.f32.mrb[7].mxu1  ;;  %v2729_v21 = vadd.f32 %v2728_v18, %v2727_v16  ;;  %v2682_v16 = vld [vmem:[%s3588_s1 + $0x18] sm:$0xf] }
 0x19c   : > { %v2769_v19 = vadd.f32 %v2768_v17, %v2767_v14  ;;  %v1841_v20 = vadd.f32 %v2766_v13, %v2726_v15  ;;  %v2690_v18 = vld [vmem:[%s3588_s1 + $0x38] sm:$0xf] }
 0x19e   : > { %v1844_v22 = vadd.f32 %v2769_v19, %v2729_v21  ;;  %v2678_v19 = vld [vmem:[%s3588_s1 + $0x8] sm:$0xf] }
 0x19f   : > { %v2730_v25 = vpop.f32.mrb[8].mxu0 }
 0x1a0   : > { %v2770_v23 = vpop.f32.mrb[8].mxu1  ;;  %v2731_v28 = vpop.f32.mrb[9].mxu0 }
 0x1a1   : > { %v2771_v24 = vpop.f32.mrb[9].mxu1  ;;  %v2732_v30 = vadd.f32 %v2731_v28, %v2730_v25  ;;  %v2733_v31 = vpop.f32.mrb[10].mxu0  ;;  %v2168_v25 = vshll.u32 %v2682_v16, 16  ;;  %v2137_v28 = vshrl.u32 %v2678_v19, 16 }
 0x1a2   : > { %v2772_v26 = vadd.f32 %v2771_v24, %v2770_v23  ;;  %v2773_v27 = vpop.f32.mrb[10].mxu1  ;;  %v2734_v33 = vpop.f32.mrb[11].mxu0  ;;  %v2165_v24 = vshrl.u32 %v2682_v16, 16 }
 0x1a3   : > { %v2774_v29 = vpop.f32.mrb[11].mxu1  ;;  %v2735_v35 = vadd.f32 %v2734_v33, %v2733_v31  ;;  %v2684_v33 = vld [vmem:[%s3588_s1 + $0x20] sm:$0xf] }
 0x1a4   : > { %v2775_v32 = vadd.f32 %v2774_v29, %v2773_v27  ;;  %v3816_v34 = vadd.f32 %v2772_v26, %v2732_v30  ;;  %v2221_v26 = vshrl.u32 %v2690_v18, 16  ;;  %v2224_v27 = vshll.u32 %v2690_v18, 16  ;;  %v2687_v18 = vld [vmem:[%s3588_s1 + $0x2c] sm:$0x1] }
 0x1a5   : > { %v2140_v29 = vshll.u32 %v2678_v19, 16  ;;  %v2167_v31 = vrot.slane %v2165_v24, 4  ;;  %v2685_v24 = vld [vmem:[%s3588_s1 + $0x24] sm:$0x1] }
 0x1a6   : > { %v3818_v36 = vadd.f32 %v2775_v32, %v2735_v35  ;;  %v2686_v32 = vld [vmem:[%s3588_s1 + $0x28] sm:$0xf] }
 0x1a7   : > { %v2736_v39 = vpop.f32.mrb[12].mxu0 }
 0x1a8   : > { %v2776_v37 = vpop.f32.mrb[12].mxu1  ;;  %v2737_v43 = vpop.f32.mrb[13].mxu0 }
 0x1a9   : > { %v2777_v38 = vpop.f32.mrb[13].mxu1  ;;  %v2738_v45 = vadd.f32 %v2737_v43, %v2736_v39  ;;  %v2739_v46 = vpop.f32.mrb[14].mxu0  ;;  %v3847_v43 = vrot.slane %v2140_v29, 5  ;;  %v2681_v29 = vld [vmem:[%s3588_s1 + $0x14] sm:$0x1] }
 0x1aa   : > { %v2778_v40 = vadd.f32 %v2777_v38, %v2776_v37  ;;  %v2779_v41 = vpop.f32.mrb[14].mxu1  ;;  %v2740_v48 = vpop.f32.mrb[15].mxu0  ;;  %v3838_v37 = vld [vmem:[%s3588_s1 + $0x1c] sm:$0x1]  ;;  %v3843_v38 = vrot.slane %v2221_v26, 4 }
 0x1ab   : > { %v2780_v44 = vpop.f32.mrb[15].mxu1  ;;  %v2741_v50 = vadd.f32 %v2740_v48, %v2739_v46  ;;  %v2193_v48 = vshrl.u32 %v2686_v32, 16 }
 0x1ac   : > { %v2781_v47 = vadd.f32 %v2780_v44, %v2779_v41  ;;  %v3820_v49 = vadd.f32 %v2778_v40, %v2738_v45  ;;  %v2226_v40 = vrot.slane %v2224_v27, 5  ;;  %v3845_v41 = vrot.slane %v2137_v28, 4  ;;  %v2692_v44 = vld [vmem:[%s3588_s1 + $0x40] sm:$0xf] }
 0x1ae   : > { %v3822_v51 = vadd.f32 %v2781_v47, %v2741_v50  ;;  %v2196_v50 = vshll.u32 %v2686_v32, 16  ;;  %v2143_v28 = vor.u32 %v3847_v43, %v3845_v41 }
 0x1af   : > { %v2798_v58 = vpop.f32.mrb[16].mxu0 }
 0x1b0   : > { %v2799_v60 = vpop.f32.mrb[17].mxu0 }
 0x1b1   : > { %v2838_v54 = vpop.f32.mrb[16].mxu1  ;;  %v2800_v62 = vadd.f32 %v2799_v60, %v2798_v58  ;;  %v2801_v63 = vpop.f32.mrb[18].mxu0  ;;  %v2179_v58 = vshrl.u32 %v2684_v33, 16  ;;  %v2688_v60 = vld [vmem:[%s3588_s1 + $0x30] sm:$0xf] }
 0x1b2   : > { %v2839_v55 = vpop.f32.mrb[17].mxu1  ;;  %v2802_v0 = vpop.f32.mrb[19].mxu0 }
 0x1b3   : > { %v2840_v56 = vadd.f32 %v2839_v55, %v2838_v54  ;;  %v2841_v57 = vpop.f32.mrb[18].mxu1  ;;  %v1898_v2 = vadd.f32 %v2800_v62, %v1833_v7  ;;  %v2803_v42 = vadd.f32 %v2802_v0, %v2801_v63  ;;  %v2680_v54 = vld [vmem:[%s3588_s1 + $0x10] sm:$0xf]  ;;  %v2235_v0 = vshrl.u32 %v2692_v44, 16 }
 0x1b4   : > { %v2842_v59 = vpop.f32.mrb[19].mxu1 }
 0x1b5   : > { %v2843_v61 = vadd.f32 %v2842_v59, %v2841_v57  ;;  %v1901_v1 = vadd.f32 %v2803_v42, %v1836_v9  ;;  %v3824_v3 = vadd.f32 %v2840_v56, %v1898_v2  ;;  %v2182_v59 = vshll.u32 %v2684_v33, 16 }
 0x1b6   : > { %v2238_v2 = vshll.u32 %v2692_v44, 16  ;;  %v2237_v19 = vrot.slane %v2235_v0, 4  ;;  %v2188_v44 = vshll.u32 %v2685_v24, 16 }
 0x1b7   : > { %v3826_v4 = vadd.f32 %v2843_v61, %v1901_v1  ;;  %v2174_v1 = vshll.u32 %v3838_v37, 16  ;;  %v2202_v37 = vshll.u32 %v2687_v18, 16 }
 0x1b9   : > { %v2844_v5 = vpop.f32.mrb[20].mxu1 }
 0x1ba   : > { %v2845_v6 = vpop.f32.mrb[21].mxu1 }
 0x1bb   : > { %v2804_v8 = vpop.f32.mrb[20].mxu0  ;;  %v2846_v10 = vadd.f32 %v2845_v6, %v2844_v5  ;;  %v2847_v52 = vpop.f32.mrb[22].mxu1  ;;  %v2151_v6 = vshrl.u32 %v2680_v54, 16 }
 0x1bc   : > { %v2805_v11 = vpop.f32.mrb[21].mxu0  ;;  %v2848_v12 = vpop.f32.mrb[23].mxu1 }
 0x1bd   : > { %v2806_v13 = vadd.f32 %v2805_v11, %v2804_v8  ;;  %v2807_v14 = vpop.f32.mrb[22].mxu0  ;;  %v2849_v15 = vadd.f32 %v2848_v12, %v2847_v52  ;;  %v2154_v8 = vshll.u32 %v2680_v54, 16  ;;  %v2207_v11 = vshrl.u32 %v2688_v60, 16 }
 0x1be   : > { %v2808_v7 = vpop.f32.mrb[23].mxu0  ;;  %v2210_v12 = vshll.u32 %v2688_v60, 16  ;;  %v2153_v26 = vrot.slane %v2151_v6, 4  ;;  %v2144_v54 = vrot.slane %v2143_v28, 4 }
 0x1bf   : > { %v1906_v9 = vadd.f32 %v2806_v13, %v1841_v20  ;;  %v2809_v17 = vadd.f32 %v2808_v7, %v2807_v14  ;;  %v2170_v20 = vrot.slane %v2168_v25, 5  ;;  %v2195_v13 = vrot.slane %v2193_v48, 4  ;;  %v2693_v25 = vld [vmem:[%s3588_s1 + $0x44] sm:$0x1] }
 0x1c0   : > { %v2198_v14 = vrot.slane %v2196_v50, 5  ;;  %v2184_v7 = vrot.slane %v2182_v59, 5  ;;  %v2156_v27 = vrot.slane %v2154_v8, 5  ;;  %v2160_v50 = vshll.u32 %v2681_v29, 16 }
 0x1c1   : > { %v1909_v21 = vadd.f32 %v2809_v17, %v1844_v22  ;;  %v3831_v23 = vadd.f32 %v2846_v10, %v1906_v9  ;;  %v3841_v22 = vld [vmem:[%s3588_s1 + $0x3c] sm:$0x1]  ;;  %v2171_v57 = vor.u32 %v2170_v20, %v2167_v31  ;;  %v2679_v9 = vld [vmem:[%s3588_s1 + $0xc] sm:$0x1]  ;;  %v2212_v20 = vrot.slane %v2210_v12, 5 }
 0x1c2   : > { %v2230_v5 = vshll.u32 %v3841_v22, 16  ;;  %v2146_v33 = vshll.u32 %v2679_v9, 16  ;;  %v2689_v22 = vld [vmem:[%s3588_s1 + $0x34] sm:$0x1]  ;;  %v2157_v48 = vor.u32 %v2156_v27, %v2153_v26  ;;  %v2674_v26 = vld [vmem:[#allocation8] ss:$0 sm:$0xff] }
 0x1c3   : > { %v3833_v30 = vadd.f32 %v2849_v15, %v1909_v21  ;;  %v2850_v35 = vpop.f32.mrb[24].mxu1  ;;  %v2181_v15 = vrot.slane %v2179_v58, 4  ;;  %v2240_v21 = vrot.slane %v2238_v2, 5  ;;  %v2172_v32 = vrot.slane %v2171_v57, 4 }
 0x1c4   : > { %v2851_v39 = vpop.f32.mrb[25].mxu1  ;;  %v2232_v43 = vrot.slane %v2230_v5, 5  ;;  %v2148_v60 = vrot.slane %v2146_v33, 5  ;;  %v2162_v5 = vrot.slane %v2160_v50, 5 }
 0x1c5   : > { %v2852_v46 = vadd.f32 %v2851_v39, %v2850_v35  ;;  %v2853_v47 = vpop.f32.mrb[26].mxu1  ;;  %v2199_v35 = vor.u32 %v2198_v14, %v2195_v13  ;;  %v2185_v39 = vor.u32 %v2184_v7, %v2181_v15 }
 0x1c6   : > { %v2810_v45 = vpop.f32.mrb[24].mxu0  ;;  %v2854_v56 = vpop.f32.mrb[27].mxu1  ;;  %v2149_v18 = vsel %vm3609_vm5, %v2144_v54, %v2148_v60 }
 0x1c7   : > { %v2811_v55 = vpop.f32.mrb[25].mxu0  ;;  %v2855_v63 = vadd.f32 %v2854_v56, %v2853_v47  ;;  %v2216_v56 = vshll.u32 %v2689_v22, 16  ;;  %v2186_v2 = vrot.slane %v2185_v39, 4 }
 0x1c8   : > { %v2812_v61 = vadd.f32 %v2811_v55, %v2810_v45  ;;  %v2813_v62 = vpop.f32.mrb[26].mxu0 }
 0x1c9   : > { %v2814_v42 = vpop.f32.mrb[27].mxu0  ;;  %v2218_v15 = vrot.slane %v2216_v56, 5 }
 0x1ca   : > { %v1914_v10 = vadd.f32 %v2812_v61, %v3816_v34  ;;  %v2815_v52 = vadd.f32 %v2814_v42, %v2813_v62  ;;  %v2227_v34 = vor.u32 %v2226_v40, %v3843_v38  ;;  %v2241_v38 = vor.u32 %v2240_v21, %v2237_v19 }
 0x1cb   : > { %v2244_v40 = vshll.u32 %v2693_v25, 16  ;;  %v2200_v61 = vrot.slane %v2199_v35, 4  ;;  %v2204_v62 = vrot.slane %v2202_v37, 5  ;;  %v2190_v42 = vrot.slane %v2188_v44, 5  ;;  %v2675_v44 = vld [vmem:[#allocation8 + $0x1] ss:$0 sm:$0xff] }
 0x1cc   : > { %v1917_v16 = vadd.f32 %v2815_v52, %v3818_v36  ;;  %v3857_v17 = vadd.f32 %v2852_v46, %v1914_v10  ;;  %v2209_v36 = vrot.slane %v2207_v11, 4  ;;  %v2176_v46 = vrot.slane %v2174_v1, 5 }
 0x1cd   : > { %v2228_v47 = vrot.slane %v2227_v34, 4  ;;  %v2242_v6 = vrot.slane %v2241_v38, 4  ;;  %v2246_v1 = vrot.slane %v2244_v40, 5  ;;  %v2158_v11 = vrot.slane %v2157_v48, 4 }
 0x1ce   : > { %v3866_v31 = vadd.f32 %v2855_v63, %v1917_v16  ;;  %v2213_v55 = vor.u32 %v2212_v20, %v2209_v36  ;;  %v2177_v13 = vsel %vm3609_vm5, %v2172_v32, %v2176_v46  ;;  %v2205_v19 = vsel %vm3609_vm5, %v2200_v61, %v2204_v62 }
 0x1cf   : > { %v2233_v9 = vsel %vm3609_vm5, %v2228_v47, %v2232_v43  ;;  %v2191_v21 = vsel %vm3609_vm5, %v2186_v2, %v2190_v42  ;;  %v2247_v25 = vsel %vm3609_vm5, %v2242_v6, %v2246_v1  ;;  %v3885_v27 = vunpack.c.l.bf16 %v2177_v13 }
 0x1d0   : > { %v2856_v45 = vpop.f32.mrb[28].mxu1  ;;  %v2214_v14 = vrot.slane %v2213_v55, 4  ;;  %v2262_v29 = vunpack.c.l.bf16 %v2233_v9  ;;  %v3887_v36 = vunpack.c.l.bf16 %v2149_v18  ;;  %v2260_v35 = vunpack.c.l.bf16 %v2205_v19 }
 0x1d1   : > { %v2857_v41 = vpop.f32.mrb[29].mxu1  ;;  %v2816_v58 = vpop.f32.mrb[28].mxu0  ;;  %v3891_v37 = vunpack.c.l.bf16 %v2191_v21  ;;  %v2263_v46 = vunpack.c.l.bf16 %v2247_v25 }
 0x1d2   : > { %v2858_v57 = vadd.f32 %v2857_v41, %v2856_v45  ;;  %v2859_v59 = vpop.f32.mrb[30].mxu1  ;;  %v2817_v63 = vpop.f32.mrb[29].mxu0  ;;  %v2219_v20 = vsel %vm3609_vm5, %v2214_v14, %v2218_v15 }
 0x1d3   : > { %v2860_v0 = vpop.f32.mrb[31].mxu1  ;;  %v2818_v8 = vadd.f32 %v2817_v63, %v2816_v58  ;;  %v2819_v10 = vpop.f32.mrb[30].mxu0  ;;  %v2261_v54 = vunpack.c.l.bf16 %v2219_v20  ;;  %v2676_v63 = vld [vmem:[#allocation8 + $0x2] ss:$0 sm:$0xff] }
 0x1d4   : > { %v2861_v52 = vadd.f32 %v2860_v0, %v2859_v59  ;;  %v2820_v12 = vpop.f32.mrb[31].mxu0 }
 0x1d5   : > { %v1922_v7 = vadd.f32 %v2818_v8, %v3820_v49  ;;  %v2821_v16 = vadd.f32 %v2820_v12, %v2819_v10  ;;  %v2163_v49 = vsel %vm3609_vm5, %v2158_v11, %v2162_v5 }
 0x1d6   : > { %v3895_v47 = vunpack.c.l.bf16 %v2163_v49 }
 0x1d7   : > { %v1925_v34 = vadd.f32 %v2821_v16, %v3822_v51  ;;  %v1987_v24 = vadd.f32 %v2858_v57, %v1922_v7 }
 0x1d8   : > { %v2896_v28 = vpop.f32.mrb[32].mxu1 }
 0x1d9   : > { %v2892_v32 = vpop.f32.mrb[32].mxu0  ;;  %v2052_v33 = vadd.f32 %v2896_v28, %v1987_v24  ;;  %v2043_v51 = vpop.f32.mrb[33].mxu1  ;;  %v1990_v22 = vadd.f32 %v2861_v52, %v1925_v34 }
 0x1da   : > { %v2036_v39 = vadd.f32 %v2892_v32, %v3831_v23  ;;  %v2027_v38 = vpop.f32.mrb[33].mxu0  ;;  %v2044_v40 = vadd.f32 %v2043_v51, %v3857_v17  ;;  %v2897_v45 = vpop.f32.mrb[34].mxu1 }
 0x1db   : > { %v2069_v48 = vmul.f32 %v2674_v26, %v2052_v33  ;;  %v2028_v53 = vadd.f32 %v2027_v38, %v3824_v3  ;;  %v2893_v50 = vpop.f32.mrb[34].mxu0  ;;  %v2055_v41 = vadd.f32 %v2897_v45, %v1990_v22  ;;  %v2046_v43 = vpop.f32.mrb[35].mxu1 }
 0x1dc   : > { %v2065_v55 = vmul.f32 %v2674_v26, %v2036_v39  ;;  %v2067_v56 = vmul.f32 %v2674_v26, %v2044_v40  ;;  %v2039_v58 = vadd.f32 %v2893_v50, %v3833_v30  ;;  %v2030_v23 = vpop.f32.mrb[35].mxu0  ;;  %v2047_v57 = vadd.f32 %v2046_v43, %v3866_v31  ;;  %v2677_v30 = vld [vmem:[#allocation8 + $0x3] ss:$0 sm:$0xff] }
 0x1dd   : > { %v2082_v59 = vadd.f32 %v2675_v44, %v2069_v48  ;;  %v2063_v17 = vmul.f32 %v2674_v26, %v2028_v53  ;;  %v2070_v60 = vmul.f32 %v2674_v26, %v2055_v41  ;;  %v2031_v61 = vadd.f32 %v2030_v23, %v3826_v4 }
 0x1de   : > { %v2078_v62 = vadd.f32 %v2675_v44, %v2065_v55  ;;  %v2080_v0 = vadd.f32 %v2675_v44, %v2067_v56  ;;  %v2066_v3 = vmul.f32 %v2674_v26, %v2039_v58  ;;  %v2068_v2 = vmul.f32 %v2674_v26, %v2047_v57 }
 0x1df   : > { %v2090_v42 = vmax.f32 %v2082_v59, 0.0  ;;  %v2076_v6 = vadd.f32 %v2675_v44, %v2063_v17  ;;  %v2083_v1 = vadd.f32 %v2675_v44, %v2070_v60  ;;  %v2064_v8 = vmul.f32 %v2674_v26, %v2031_v61 }
 0x1e0   : > { %v2086_v10 = vmax.f32 %v2078_v62, 0.0  ;;  %v2088_v52 = vmax.f32 %v2080_v0, 0.0  ;;  %v2079_v11 = vadd.f32 %v2675_v44, %v2066_v3  ;;  %v2081_v31 = vadd.f32 %v2675_v44, %v2068_v2 }
 0x1e1   : > { %v2103_v5 = vmul.f32 %v2676_v63, %v2090_v42  ;;  %v2084_v12 = vmax.f32 %v2076_v6, 0.0  ;;  %v2091_v13 = vmax.f32 %v2083_v1, 0.0  ;;  %v2077_v14 = vadd.f32 %v2675_v44, %v2064_v8 }
 0x1e2   : > { %v2099_v4 = vmul.f32 %v2676_v63, %v2086_v10  ;;  %v2101_v15 = vmul.f32 %v2676_v63, %v2088_v52  ;;  %v2087_v7 = vmax.f32 %v2079_v11, 0.0  ;;  %v2089_v16 = vmax.f32 %v2081_v31, 0.0 }
 0x1e3   : > { %v2116_v9 = vadd.f32 %v2677_v30, %v2103_v5  ;;  %v2097_v18 = vmul.f32 %v2676_v63, %v2084_v12  ;;  %v2104_v19 = vmul.f32 %v2676_v63, %v2091_v13  ;;  %v2085_v21 = vmax.f32 %v2077_v14, 0.0 }
 0x1e4   : > { %v2112_v34 = vadd.f32 %v2677_v30, %v2099_v4  ;;  %v2114_v24 = vadd.f32 %v2677_v30, %v2101_v15  ;;  %v2100_v25 = vmul.f32 %v2676_v63, %v2087_v7  ;;  %v2102_v49 = vmul.f32 %v2676_v63, %v2089_v16 }
 0x1e5   : > { %v2270_v26 = vadd.f32 %v2262_v29, %v2116_v9  ;;  %v2110_v28 = vadd.f32 %v2677_v30, %v2097_v18  ;;  %v2117_v20 = vadd.f32 %v2677_v30, %v2104_v19  ;;  %v2098_v32 = vmul.f32 %v2676_v63, %v2085_v21 }
 0x1e6   : > { %v2266_v33 = vadd.f32 %v3885_v27, %v2112_v34  ;;  %v2268_v51 = vadd.f32 %v2260_v35, %v2114_v24  ;;  %v2113_v22 = vadd.f32 %v2677_v30, %v2100_v25  ;;  %v2115_v39 = vadd.f32 %v2677_v30, %v2102_v49 }
 0x1e7   : > { %v2278_v44 = vmax.f32 %v2270_v26, 0.0  ;;  %v2264_v38 = vadd.f32 %v3887_v36, %v2110_v28  ;;  %v2271_v40 = vadd.f32 %v2263_v46, %v2117_v20  ;;  %v2111_v45 = vadd.f32 %v2677_v30, %v2098_v32 }
 0x1e8   : > { %v2274_v48 = vmax.f32 %v2266_v33, 0.0  ;;  %v2276_v53 = vmax.f32 %v2268_v51, 0.0  ;;  %v2267_v29 = vadd.f32 %v3891_v37, %v2113_v22  ;;  %v2269_v50 = vadd.f32 %v2261_v54, %v2115_v39 }
 0x1e9   : > { %2286 = vst [vmem:[%s296_s27 + $0x30] sm:$0xff] %v2278_v44  ;;  %v2272_v41 = vmax.f32 %v2264_v38, 0.0  ;;  %v2279_v27 = vmax.f32 %v2271_v40, 0.0  ;;  %v2265_v35 = vadd.f32 %v3895_v47, %v2111_v45 }
 0x1ea   : > { %2282 = vst [vmem:[%s296_s27 + $0x10] sm:$0xff] %v2274_v48  ;;  %2284 = vst [vmem:[%s296_s27 + $0x20] sm:$0xff] %v2276_v53  ;;  %v2275_v36 = vmax.f32 %v2267_v29, 0.0  ;;  %v2277_v46 = vmax.f32 %v2269_v50, 0.0 }
 0x1eb   : > { %2280 = vst [vmem:[%s296_s27] sm:$0xff] %v2272_v41  ;;  %2287 = vst [vmem:[%s296_s27 + $0x38] sm:$0xff] %v2279_v27  ;;  %v2273_v37 = vmax.f32 %v2265_v35, 0.0 }
 0x1ec   : > { %2283 = vst [vmem:[%s296_s27 + $0x18] sm:$0xff] %v2275_v36  ;;  %2285 = vst [vmem:[%s296_s27 + $0x28] sm:$0xff] %v2277_v46 }
 0x1ed   : > { %2281 = vst [vmem:[%s296_s27 + $0x8] sm:$0xff] %v2273_v37 }
 0x1ee   : > { %3219 = shalt.err (!%p3216_p7)
}
 0x1ef   : > { %s3220_s6 = scalar_lea.hbm %s3910_s9, 1024  ;;  %s3224_s10 = scalar_lea.hbm %s3965_s4, 2048 }
 0x1f0   : > { %p3221_p1 = scmp.ne.s32.totalorder %s3910_s9, %s3220_s6  ;;  %p3225_p11 = scmp.lt.u32.totalorder %s3910_s9, %s3965_s4 }
 0x1f1   : > { %p3226_p12 = scmp.lt.u32.totalorder %s3224_s10, %s3220_s6  ;;  %p3228_p8 = scmp.lt.u32.totalorder %s3220_s6, %s3910_s9 }
 0x1f2   : > { %p3222_p3 = pnand %p3221_p1, %p3995_p10 }
 0x1f3   : > { %p3227_p2 = por %p3226_p12, %p3225_p11 }
 0x1f4   : > { %p3223_p5 = pneg %p3222_p3 }
 0x1f5   : > { %p3229_p9 = por %p3228_p8, %p3227_p2 }
 0x1f7   : > { %p3230_p0 = pnand %p3229_p9, %p3223_p5 }
 0x1f9   : > { %3233 = shalt.err (!%p3230_p0)
}
 0x1fa   : > { %s3305_s1 = smov 128   ;;  %s3306_s23 = smov 8  }
 0x1fb   : > { %2926 = dma.vmem_to_hbm [thread:$0]  (%p3995_p10), %s3912_s21, 1024, %s3910_s9, %s2289_s12, %s3305_s1, %s3305_s1, %s3306_s23  }
 0x1fc PF: > { %s2319_s25 = sand.u32 1, %s3276_s15   ;;  %p3996_p4 = scmp.ne.s32.totalorder %s3978_s26, 0 }
 0x1fd   : > { %p3997_p13 = scmp.ge.s32.totalorder %s3296_s20, 2  ;;  %s2320_s27 = scalar_lea.sflag [#allocation5], %s2319_s25 }
 0x1ff   : > { %p2943_p6 = pnand %p3997_p13, %p3996_p4 }
 0x201   : > { %3271 = dma.done.wait (!%p2943_p6), %s2320_s27, 1024  }
 0x202   : > { %3273 = vsyncadd (!%p2943_p6), %s2320_s27, 4294966272  ;;  %s24_s20 = sadd.s32 1, %s3296_s20   ;;  %s3998_s15 = smov %s3280_s16 }
 0x203   : > { %p21_p7 = scmp.ge.s32.totalorder %s24_s20, 4   ;;  %s3999_s16 = smov %s3284_s17 }
 0x204   : > { %s4000_s17 = smov %s3480_s11  ;;  %s4001_s18 = smov %s3292_s19 }
 0x205   : > { %s4002_s19 = smov %s4004_s5  ;;  %23 = sbr.rel (!%p21_p7) target bundleno = 13 (0xd), region = 106 }
 0x20c   :  { %2325 = vsyncpa [#allocation4], 1 }
 0x20d   :  { %2327 = vsyncpa [#allocation4 + $0x1], 1 }
 0x20e   :  { %2328 = vsyncpa [#allocation7], 1 }
 0x20f   :  { %2329 = vsyncpa [#allocation10], 1 }
 0x210   :  { %2331 = vsyncpa [#allocation10 + $0x1], 1 }
 0x211   :  { %2332 = vsyncpa [#allocation5], 1 }
 0x212   :  { %2334 = vsyncpa [#allocation5 + $0x1], 1 }

// kernel: resnet_reduction_block_forward.2
= control target key start
LH: loop header
LB: loop body
LE: loop exit
PB: predicated region body
PF: predicated region fallthrough
CT: control target
= control target key end

     0   :  { %s7502_s0 = inlined_call_operand.hbm [shape: bf16[2,72,18,128], index: 0, kind: input, shape index: {}]   ;;  %s7503_s1 = inlined_call_operand.hbm [shape: bf16[2,1152,128], index: 1, kind: input, shape index: {}]   ;;  %s7504_s2 = inlined_call_operand.hbm [shape: f32[6,128], index: 2, kind: input, shape index: {}]   ;;  %s7505_s3 = inlined_call_operand.hbm [shape: bf16[2,16,16,128], index: 3, kind: output, shape index: {0}]   ;;  %s7506_s4 = inlined_call_operand.hbm [shape: bf16[2,16,16,128], index: 4, kind: output, shape index: {1}]  }
   0x1   :  { %7524 = sst [smem:[#allocation20_spill]] %s7503_s1 }
   0x2   :  { %7525 = sst [smem:[#allocation21_spill]] %s7504_s2 }
   0x3   :  { %7526 = sst [smem:[#allocation22_spill]] %s7506_s4 }
   0x4   :  { %10 = vsyncpa [#allocation4], 0 }
   0x5   :  { %12 = vsyncpa [#allocation4 + $0x1], 0 }
   0x6   :  { %13 = vsyncpa [#allocation7], 0 }
   0x7   :  { %14 = vsyncpa [#allocation5], 0 }
   0x8   :  { %16 = vsyncpa [#allocation5 + $0x1], 0 }
   0x9   :  { %17 = vsyncpa [#allocation11], 0 }
   0xa   :  { %19 = vsyncpa [#allocation11 + $0x1], 0  ;;  %s6147_s15 = smov 0   ;;  %s6149_s16 = smov 0  }
   0xb   :  { %s6151_s17 = smov 0   ;;  %s6153_s18 = smov 0  }
   0xc   :  { %s6155_s19 = smov 0   ;;  %s6157_s20 = smov 0  }
   0xd   :  { %s6159_s21 = smov 0   ;;  %s6161_s22 = smov 0  }
   0xe   :  { %s6163_s23 = smov 0   ;;  %s6165_s24 = smov 0  }
   0xf   :  { %s6167_s25 = smov 0  }
  0x10 LB: > { %7527 = sst [smem:[#allocation16_spill]] %s6071_s15  ;;  %s4336_s26 = sadd.s32 4294967295, %s6111_s25   ;;  %s6111_s25 = sphi %s6167_s25, %s25_s25   ;;  %s6107_s24 = sphi %s6165_s24, %s7620_s24   ;;  %s6103_s23 = sphi %s6163_s23, %s7612_s23   ;;  %s6099_s22 = sphi %s6161_s22, %s7619_s22   ;;  %s6095_s21 = sphi %s6159_s21, %s7611_s21   ;;  %s6091_s20 = sphi %s6157_s20, %s7618_s20   ;;  %s6087_s19 = sphi %s6155_s19, %s7617_s19   ;;  %s6083_s18 = sphi %s6153_s18, %s7616_s18   ;;  %s6079_s17 = sphi %s6151_s17, %s7615_s17   ;;  %s6075_s16 = sphi %s6149_s16, %s7614_s16   ;;  %s6071_s15 = sphi %s6147_s15, %s7613_s15  }
  0x11   : > { %7528 = sst [smem:[#allocation17_spill]] %s6103_s23  ;;  %s4337_s27 = sadd.s32 4294967294, %s6111_s25  }
  0x12   : > { %p57_p0 = scmp.ne.s32.totalorder %s6087_s19, %s6083_s18  ;;  %p6203_p1 = scmp.eq.s32.totalorder %s4336_s26, 0 }
  0x13   : > { %p124_p2 = scmp.ne.s32.totalorder %s6079_s17, %s6075_s16  ;;  %p125_p4 = scmp.eq.s32.totalorder %s4336_s26, 3 }
  0x14   : > { %s7529_s28 = scalar_select %p6203_p1, 1, 0 }
  0x15   : > { %p6212_p3 = por %p6203_p1, %p57_p0  ;;  %p130_p5 = scmp.ne.s32.totalorder %s6075_s16, %s6071_s15 }
  0x16   : > { %p131_p6 = scmp.eq.s32.totalorder %s4337_s27, 3  ;;  %p6218_p7 = por %p125_p4, %p124_p2 }
  0x17   : > { %s7530_s30 = scalar_select %p6212_p3, 1, 0 }
  0x18   : > { %s7531_s5 = scalar_select %p6218_p7, 1, 0 }
  0x19   : > { %p4338_p8 = scmp.ge.s32.totalorder %s6111_s25, 1  ;;  %p6223_p9 = por %p131_p6, %p130_p5 }
  0x1a   : > { %p166_p10 = scmp.lt.s32.totalorder %s6111_s25, 5  ;;  %s6113_s8 = smov [#allocation6]  }
  0x1b   : > { %s7532_s6 = scalar_select %p6223_p9, 1, 0 }
  0x1c   : > { %p6228_p11 = pnand %p4338_p8, %p166_p10  ;;  %s178_s9 = sshll.u32 %s6113_s8, 4  ;;  %s179_s9 = int_to_ptr.vmem [resolvable:$true] %s178_s9 }
  0x1d   : > { %7533 = sst [smem:[#allocation18_spill]] %s7532_s6  ;;  %s6114_s11 = smov [#allocation8]  }
  0x1e   : > { %s7534_s7 = scalar_select %p6228_p11, 1, 0 }
  0x1f   : > { %p5509_p12 = pneg %p6228_p11  ;;  %s192_s12 = sshll.u32 %s6114_s11, 4  ;;  %s6240_s12 = int_to_ptr.vmem [resolvable:$true] %s192_s12 }
  0x20   : > { %s7536_s1 = sld [smem:[#allocation20_spill]] }
  0x21   : > { %p6236_p13 = pnand %p5509_p12, %p6203_p1 }
  0x23   : > { %p5869_p2 = pneg %p6236_p13 }
  0x26   : > { %s5867_s18 = scalar_lea.hbm %s7536_s1, 18432 }
  0x27   : > { %p5868_p0 = scmp.ne.s32.totalorder %s7536_s1, %s5867_s18  ;;  %p5874_p6 = scmp.lt.u32.totalorder %s5867_s18, %s7536_s1 }
  0x29   : > { %p5870_p4 = pnand %p5869_p2, %p5868_p0 }
  0x2b   : > { %p5871_p5 = pneg %p5870_p4 }
  0x2d   : > { %p5876_p8 = pnand %p5874_p6, %p5871_p5 }
  0x2f   : > { %5879 = shalt.err (!%p5876_p8)
}
  0x30   : > { %s5880_s11 = scalar_lea.vmem %s179_s9, 18432  ;;  %p5888_p7 = scmp.lt.s32.totalorder %s179_s9, %s179_s9 }
  0x31   : > { %p5881_p10 = scmp.ne.s32.totalorder %s179_s9, %s5880_s11  ;;  %p5889_p1 = scmp.lt.s32.totalorder %s5880_s11, %s5880_s11 }
  0x33   : > { %p5883_p12 = pnand %p5881_p10, %p5869_p2  ;;  %p5890_p3 = por %p5889_p1, %p5888_p7 }
  0x35   : > { %p5884_p9 = pneg %p5883_p12 }
  0x37   : > { %p5891_p11 = pnand %p5890_p3, %p5884_p9 }
  0x39   : > { %5894 = shalt.err (!%p5891_p11)
}
  0x3a   : > { %s7515_s13 = smov 64   ;;  %s7516_s14 = smov 4  }
  0x3b   : > { %5512 = dma.hbm_to_vmem [thread:$0]  (!%p6236_p13), %s7536_s1, 18432, %s179_s9, [#allocation7], %s7515_s13, %s7515_s13, %s7516_s14  }
  0x3c   : > { %s7537_s2 = sld [smem:[#allocation21_spill]] }
  0x42   : > { %s5895_s8 = scalar_lea.hbm %s7537_s2, 128 }
  0x43   : > { %p5896_p1 = scmp.ne.s32.totalorder %s7537_s2, %s5895_s8  ;;  %p5902_p9 = scmp.lt.u32.totalorder %s5895_s8, %s7537_s2 }
  0x45   : > { %p5898_p3 = pnand %p5896_p1, %p5869_p2 }
  0x47   : > { %p5899_p7 = pneg %p5898_p3 }
  0x49   : > { %p5904_p11 = pnand %p5902_p9, %p5899_p7 }
  0x4b   : > { %5907 = shalt.err (!%p5904_p11)
}
  0x4c   : > { %s5908_s9 = scalar_lea.vmem %s6240_s12, 128  ;;  %p5916_p6 = scmp.lt.s32.totalorder %s6240_s12, %s6240_s12 }
  0x4d   : > { %p5909_p0 = scmp.ne.s32.totalorder %s6240_s12, %s5908_s9  ;;  %p5917_p8 = scmp.lt.s32.totalorder %s5908_s9, %s5908_s9 }
  0x4f   : > { %p5911_p4 = pnand %p5909_p0, %p5869_p2  ;;  %p5918_p10 = por %p5917_p8, %p5916_p6 }
  0x51   : > { %p5912_p5 = pneg %p5911_p4 }
  0x53   : > { %p5919_p12 = pnand %p5918_p10, %p5912_p5 }
  0x55   : > { %5922 = shalt.err (!%p5919_p12)
}
  0x56   : > { %5515 = dma.hbm_to_vmem [thread:$0]  (!%p6236_p13), %s7537_s2, 128, %s6240_s12, [#allocation7]  }
  0x57   : > { %s34_s6 = sadd.s32 1, %s6103_s23  ;;  %s37_s29 = sadd.s32 1, %s6107_s24 }
  0x58   : > { %p35_p2 = scmp.ge.s32.totalorder %s34_s6, 2  ;;  %s44_s10 = sadd.s32 1, %s6091_s20 }
  0x59   : > { %p51_p1 = scmp.ne.s32.totalorder %s6091_s20, %s6087_s19  ;;  %p52_p3 = scmp.eq.s32.totalorder %s6111_s25, 0 }
  0x5a   : > { %s7622_s6 = smov (%p35_p2, %s34_s6), 0  ;;  %s7624_s29 = smov (!%p35_p2, %s37_s29), %s6107_s24 }
  0x5b   : > { %7538 = sst [smem:[#allocation19_spill]] %s7622_s6  ;;  %p6301_p7 = por %p52_p3, %p51_p1 }
  0x5c   : > { %s110_s26 = ssub.s32 %s6103_s23, %s7622_s6  ;;  %p39_p13 = scmp.ge.s32.totalorder %s7624_s29, 2 }
  0x5d   : > { %p5529_p9 = scmp.lt.s32.totalorder %s6111_s25, 4  ;;  %s203_s12 = sand.u32 1, %s6091_s20  }
  0x5e   : > { %s5493_s27 = smul.u32 13824, %s6107_s24  ;;  %s7626_s29 = smov (%p39_p13, %s7624_s29), 0 }
  0x5f   : > { %s5492_s8 = smul.u32 864, %s203_s12  ;;  %s41_s11 = ssub.s32 %s6107_s24, %s7626_s29 }
  0x60   : > { %s6317_s15 = scalar_lea.hbm %s7502_s0, %s5493_s27  ;;  %p42_p11 = scmp.eq.s32.totalorder %s41_s11, 0 }
  0x61   : > { %s111_s13 = sor.u32 %s110_s26, %s41_s11  ;;  %s7540_s1 = sadd.s32 1, %s6079_s17 }
  0x62   : > { %p112_p0 = scmp.eq.s32.totalorder %s111_s13, 0  ;;  %s207_s6 = scalar_lea.vmem [#allocation3], %s5492_s8 }
  0x63   : > { %s6320_s14 = scalar_select %p42_p11, %s6091_s20, %s44_s10  }
  0x64   : > { %s6325_s2 = scalar_select %p112_p0, %s6079_s17, %s7540_s1  }
  0x65   : > { %s214_s23 = sshll.u32 %s207_s6, 4  ;;  %p6331_p4 = pnand %p5529_p9, %p6301_p7  ;;  %s6335_s23 = int_to_ptr.vmem [resolvable:$true] %s214_s23 }
  0x66   : > { %s6337_s26 = scalar_lea.sflag [#allocation4], %s203_s12  ;;  %s5923_s13 = scalar_lea.hbm %s6317_s15, 13824 }
  0x67   : > { %p5924_p5 = scmp.ne.s32.totalorder %s6317_s15, %s5923_s13  ;;  %p5925_p6 = pneg %p6331_p4 }
  0x68   : > { %s5928_s10 = scalar_lea.hbm %s7502_s0, 27648  ;;  %p5929_p12 = scmp.lt.u32.totalorder %s6317_s15, %s7502_s0 }
  0x69   : > { %p5926_p8 = pnand %p5925_p6, %p5924_p5  ;;  %p5930_p2 = scmp.lt.u32.totalorder %s5928_s10, %s5923_s13 }
  0x6a   : > { %p5932_p3 = scmp.lt.u32.totalorder %s5923_s13, %s6317_s15 }
  0x6b   : > { %p5927_p10 = pneg %p5926_p8  ;;  %p5931_p1 = por %p5930_p2, %p5929_p12 }
  0x6d   : > { %p5933_p7 = por %p5932_p3, %p5931_p1 }
  0x6f   : > { %p5934_p13 = pnand %p5933_p7, %p5927_p10 }
  0x71   : > { %5937 = shalt.err (!%p5934_p13)
}
  0x72   : > { %s5938_s12 = scalar_lea.vmem %s6335_s23, 13824  ;;  %s6117_s8 = smov [#allocation3]  }
  0x73   : > { %p5939_p9 = scmp.ne.s32.totalorder %s6335_s23, %s5938_s12  ;;  %s5943_s11 = sshll.u32 %s6117_s8, 4  ;;  %s5944_s11 = int_to_ptr.vmem [resolvable:$false] %s5943_s11 }
  0x74   : > { %s5945_s4 = scalar_lea.vmem %s5944_s11, 27648  ;;  %p5946_p5 = scmp.lt.s32.totalorder %s6335_s23, %s5944_s11 }
  0x75   : > { %p5941_p11 = pnand %p5939_p9, %p5925_p6  ;;  %p5947_p8 = scmp.lt.s32.totalorder %s5945_s4, %s5938_s12 }
  0x77   : > { %p5942_p0 = pneg %p5941_p11  ;;  %p5948_p12 = por %p5947_p8, %p5946_p5 }
  0x79   : > { %p5949_p2 = pnand %p5948_p12, %p5942_p0 }
  0x7b   : > { %5952 = shalt.err (!%p5949_p2)
}
  0x7c   : > { %s7542_s13 = smov 4   ;;  %s7543_s1 = smov 64  }
  0x7d   : > { %5519 = dma.hbm_to_vmem [thread:$0]  (!%p6331_p4), %s6317_s15, 13824, %s6335_s23, %s6337_s26, %s7543_s1, %s7543_s1, %s7542_s13  }
  0x7e   : > { %p7544_p6 = scmp.ne.s32.totalorder %s7534_s7, 0 }
  0x7f   : > { %s228_s6 = sand.u32 (!%p7544_p6), 1, %s6087_s19   ;;  %p7545_p10 = scmp.ne.s32.totalorder (!%p7544_p6), %s7530_s30, 0 }
  0x80   : > { %226 = sbr.rel (%p7544_p6) target bundleno = 703 (0x2bf), region = 32  ;;  %s229_s18 = scalar_lea.sflag (!%p7544_p6), [#allocation4], %s228_s6 }
  0x81   : > { %s6371_s10 = smul.u32 (!%p7544_p6), 864, %s228_s6 }
  0x83   : > { %s232_s27 = scalar_lea.vmem (!%p7544_p6), [#allocation3], %s6371_s10 }
  0x87   : > { %6054 = dma.done.wait (%p7545_p10), %s229_s18, 13824  }
  0x88   : > { %6056 = vsyncadd (%p7545_p10), %s229_s18, 4294953472  ;;  %p7546_p1 = scmp.ne.s32.totalorder %s7529_s28, 0 }
  0x8a   : > { %6058 = dma.done.wait (%p7546_p1), [#allocation7], 18560  }
  0x8b   : > { %6060 = vsyncadd (%p7546_p1), [#allocation7], 4294948736  ;;  %v5627_v0 = vld [vmem:[#allocation6 + $0x40] sm:$0xff]   ;;  %v5631_v4 = vld [vmem:[#allocation6 + $0x48] sm:$0xff]   ;;  %s4755_s23 = smul.u32 96, %s6095_s21  ;;  %s4348_s30 = sshll.u32 %s6095_s21, 3 }
  0x8c   : > { %v5628_v1 = vld [vmem:[#allocation6 + $0xc0] sm:$0xff]   ;;  %4884 = vmatprep.subr.bf16.mxu0 %v5627_v0  ;;  %v5632_v5 = vld [vmem:[#allocation6 + $0xc8] sm:$0xff]   ;;  %v5635_v8 = vld [vmem:[#allocation6 + $0x50] sm:$0xff]   ;;  %vm449_vm0 = vsmask.f32 3328  ;;  %s6891_s7 = sand.u32 1, %s6075_s16  }
  0x8d   : > { %v5629_v2 = vld [vmem:[#allocation6] sm:$0xff]   ;;  %4948 = vmatprep.subr.bf16.mxu1 %v5628_v1  ;;  %v5633_v6 = vld [vmem:[#allocation6 + $0x8] sm:$0xff]   ;;  %v5636_v9 = vld [vmem:[#allocation6 + $0xd0] sm:$0xff]   ;;  %vm450_vm1 = vsmask.f32 7440  ;;  %s6385_s28 = scalar_lea.vmem %s232_s27, %s4755_s23 [#allocation3]  ;;  %s4346_s15 = sshll.u32 %s6891_s7, 6 }
  0x8e   : > { %v5630_v3 = vld [vmem:[#allocation6 + $0x80] sm:$0xff]   ;;  %4885 = vmatpush3.bf16.msra.mxu0 %v5629_v2  ;;  %v5634_v7 = vld [vmem:[#allocation6 + $0x88] sm:$0xff]   ;;  %v5637_v10 = vld [vmem:[#allocation6 + $0x10] sm:$0xff]   ;;  %s6965_s9 = scalar_lea.vmem [#allocation9], %s4346_s15  ;;  %s4788_s26 = sshll.u32 %s6095_s21, 4 }
  0x8f   : > { %4949 = vmatpush3.bf16.msra.mxu1 %v5630_v3  ;;  %4886 = vmatprep.subr.bf16.mxu0 %v5631_v4  ;;  %v5638_v11 = vld [vmem:[#allocation6 + $0x90] sm:$0xff]   ;;  %v5639_v12 = vld [vmem:[#allocation6 + $0x58] sm:$0xff]   ;;  %v5643_v16 = vld [vmem:[#allocation6 + $0x60] sm:$0xff]   ;;  %s4747_s12 = sshll.u32 %s6099_s22, 5  ;;  %s4154_s22 = sshll.u32 %s6965_s9, 4  ;;  %s7243_s22 = int_to_ptr.vmem [resolvable:$true] %s4154_s22 }
  0x90   : > { %4950 = vmatprep.subr.bf16.mxu1 %v5632_v5  ;;  %v5640_v13 = vld [vmem:[#allocation6 + $0xd8] sm:$0xff]   ;;  %v5644_v17 = vld [vmem:[#allocation6 + $0xe0] sm:$0xff]   ;;  %v5647_v20 = vld [vmem:[#allocation6 + $0x68] sm:$0xff]   ;;  %s7228_s8 = sadd.s32 %s4788_s26, %s4747_s12  ;;  %s4133_s1 = scalar_lea.sflag [#allocation5], %s6891_s7 }
  0x91   : > { %v5641_v14 = vld [vmem:[#allocation6 + $0x18] sm:$0xff]   ;;  %v5645_v18 = vld [vmem:[#allocation6 + $0x20] sm:$0xff]   ;;  %v5648_v21 = vld [vmem:[#allocation6 + $0xe8] sm:$0xff]   ;;  %s4748_s21 = sshll.u32 %s7228_s8, 6  ;;  %s5953_s6 = scalar_lea.vmem %s7243_s22, 1024 }
  0x92   : > { %4887 = vmatpush3.bf16.msra.mxu0 %v5633_v6  ;;  %v5642_v15 = vld [vmem:[#allocation6 + $0x98] sm:$0xff]   ;;  %v5646_v19 = vld [vmem:[#allocation6 + $0xa0] sm:$0xff]   ;;  %v5649_v22 = vld [vmem:[#allocation6 + $0x28] sm:$0xff]   ;;  %s7241_s13 = scalar_lea.hbm %s7505_s3, %s4748_s21  ;;  %p5954_p4 = scmp.ne.s32.totalorder %s7243_s22, %s5953_s6 }
  0x93   : > { %4951 = vmatpush3.bf16.msra.mxu1 %v5634_v7  ;;  %4888 = vmatprep.subr.bf16.mxu0 %v5635_v8  ;;  %v5650_v23 = vld [vmem:[#allocation6 + $0xa8] sm:$0xff]   ;;  %v5651_v24 = vld [vmem:[#allocation6 + $0x70] sm:$0xff]   ;;  %v5655_v28 = vld [vmem:[#allocation6 + $0x78] sm:$0xff]   ;;  %p7603_p3 = scmp.ne.s32.totalorder %s7531_s5, 0  ;;  %s6118_s10 = smov [#allocation9]  }
  0x94   : > { %4952 = vmatprep.subr.bf16.mxu1 %v5636_v9  ;;  %v5652_v25 = vld [vmem:[#allocation6 + $0xf0] sm:$0xff]   ;;  %v5656_v29 = vld [vmem:[#allocation6 + $0xf8] sm:$0xff]   ;;  %v5661_v34 = vld [vmem:[%s6385_s28] sm:$0xff]   ;;  %s5957_s18 = sshll.u32 %s6118_s10, 4  ;;  %s5958_s18 = int_to_ptr.vmem [resolvable:$false] %s5957_s18 }
  0x95   : > { %v5653_v26 = vld [vmem:[#allocation6 + $0x30] sm:$0xff]   ;;  %v5657_v30 = vld [vmem:[#allocation6 + $0x38] sm:$0xff]   ;;  %v425_v35 = vld [vmem:[%s6385_s28] sm:$0xf]  ;;  %p5955_p7 = pnand %p5954_p4, %p7603_p3  ;;  %s5959_s27 = scalar_lea.vmem %s5958_s18, 2048 }
  0x96   : > { %4889 = vmatpush3.bf16.msra.mxu0 %v5637_v10  ;;  %v5654_v27 = vld [vmem:[#allocation6 + $0xb0] sm:$0xff]   ;;  %v5658_v31 = vld [vmem:[#allocation6 + $0xb8] sm:$0xff]   ;;  %v426_v36 = vld [vmem:[%s6385_s28 + $0x4] sm:$0xf]  ;;  %v453_v38 = vshrl.u32 %v425_v35, 16  ;;  %v456_v39 = vshll.u32 %v425_v35, 16  ;;  %p5960_p9 = scmp.lt.s32.totalorder %s7243_s22, %s5958_s18  ;;  %p5961_p11 = scmp.lt.s32.totalorder %s5959_s27, %s5953_s6 }
  0x97   : > { %4953 = vmatpush3.bf16.msra.mxu1 %v5638_v11  ;;  %4890 = vmatprep.subr.bf16.mxu0 %v5639_v12  ;;  %v5659_v32 = vld [vmem:[%s6385_s28 + $0xd8] sm:$0xff]   ;;  %v5660_v33 = vld [vmem:[%s6385_s28 + $0x1b0] sm:$0xff]   ;;  %v427_v37 = vld [vmem:[%s6385_s28 + $0x8] sm:$0x1]  ;;  %v462_v40 = vshll.u32 %v426_v36, 16  ;;  %v466_v41 = vshrl.u32 %v426_v36, 16  ;;  %p5956_p13 = pneg %p5955_p7 }
  0x98   : > { %4954 = vmatprep.subr.bf16.mxu1 %v5640_v13  ;;  %2251 = vmatprep.mubr.bf16.mxu0 %v5659_v32  ;;  %v472_v42 = vshll.u32 %v427_v37, 16  ;;  %v5662_v43 = vld [vmem:[#allocation6 + $0x140] sm:$0xff]   ;;  %v455_v44 = vrot.slane %v453_v38, 4  ;;  %v458_v45 = vrot.slane %v456_v39, 5  ;;  %vm6395_vm2 = vmor %vm449_vm0, %vm450_vm1  ;;  %v5668_v61 = vld [vmem:[%s6385_s28 + $0xc] sm:$0xff]   ;;  %p5962_p0 = por %p5961_p11, %p5960_p9 }
  0x99   : > { %2348 = vmatprep.mubr.bf16.mxu1 %v5660_v33  ;;  %v464_v46 = vrot.slane %v462_v40, 5  ;;  %v468_v47 = vrot.slane %v466_v41, 4  ;;  %v5663_v48 = vld [vmem:[#allocation6 + $0x100] sm:$0xff]   ;;  %v428_v62 = vld [vmem:[%s6385_s28 + $0xc] sm:$0xf]  ;;  %v5677_v39 = vld [vmem:[#allocation6 + $0x110] sm:$0xff]  }
  0x9a   : > { %4891 = vmatpush3.bf16.msra.mxu0 %v5641_v14  ;;  %v459_v49 = vor.u32 %v458_v45, %v455_v44  ;;  %v474_v51 = vrot.slane %v472_v42, 5  ;;  %v5664_v52 = vld [vmem:[#allocation6 + $0x1c0] sm:$0xff]   ;;  %v429_v63 = vld [vmem:[%s6385_s28 + $0x10] sm:$0xf]  ;;  %v430_v1 = vld [vmem:[%s6385_s28 + $0x14] sm:$0x1]  ;;  %p5963_p5 = pnand %p5962_p0, %p5956_p13 }
  0x9b   : > { %4955 = vmatpush3.bf16.msra.mxu1 %v5642_v15  ;;  %4892 = vmatprep.subr.bf16.mxu0 %v5643_v16  ;;  %v469_v50 = vor.u32 %v468_v47, %v464_v46  ;;  %v5665_v56 = vld [vmem:[#allocation6 + $0x180] sm:$0xff]   ;;  %v477_v2 = vshrl.u32 %v428_v62, 16  ;;  %v480_v3 = vshll.u32 %v428_v62, 16  ;;  %v486_v4 = vshll.u32 %v429_v63, 16  ;;  %v5669_v5 = vld [vmem:[#allocation6 + $0x148] sm:$0xff]   ;;  %v5678_v41 = vld [vmem:[#allocation6 + $0x1d0] sm:$0xff]  }
  0x9c   : > { %4956 = vmatprep.subr.bf16.mxu1 %v5644_v17  ;;  %v460_v54 = vrot.slane %v459_v49, 4  ;;  %v5666_v57 = vld [vmem:[%s6385_s28 + $0xe4] sm:$0xff]   ;;  %v5667_v58 = vld [vmem:[%s6385_s28 + $0x1bc] sm:$0xff]   ;;  %v490_v6 = vshrl.u32 %v429_v63, 16  ;;  %v496_v7 = vshll.u32 %v430_v1, 16  ;;  %v5679_v44 = vld [vmem:[#allocation6 + $0x190] sm:$0xff]  }
  0x9d   : > { %v470_v55 = vrot.slane %v469_v50, 4  ;;  %v479_v8 = vrot.slane %v477_v2, 4  ;;  %v482_v9 = vrot.slane %v480_v3, 5  ;;  %v488_v10 = vrot.slane %v486_v4, 5  ;;  %v5670_v11 = vld [vmem:[#allocation6 + $0x108] sm:$0xff]   ;;  %v5684_v3 = vld [vmem:[#allocation6 + $0x118] sm:$0xff]  }
  0x9e   : > { %4893 = vmatpush3.bf16.msra.mxu0 %v5645_v18  ;;  %v465_v59 = vsel %vm6395_vm2, %v460_v54, %v464_v46  ;;  %v492_v12 = vrot.slane %v490_v6, 4  ;;  %v5671_v14 = vld [vmem:[#allocation6 + $0x1c8] sm:$0xff]   ;;  %v498_v16 = vrot.slane %v496_v7, 5  ;;  %v5680_v46 = vld [vmem:[%s6385_s28 + $0xfc] sm:$0xff]  }
  0x9f   : > { %4957 = vmatpush3.bf16.msra.mxu1 %v5646_v19  ;;  %4894 = vmatprep.subr.bf16.mxu0 %v5647_v20  ;;  %v475_v60 = vsel %vm6395_vm2, %v470_v55, %v474_v51  ;;  %v483_v13 = vor.u32 %v482_v9, %v479_v8  ;;  %v5672_v17 = vld [vmem:[#allocation6 + $0x188] sm:$0xff]   ;;  %v5673_v19 = vld [vmem:[%s6385_s28 + $0xf0] sm:$0xff]   ;;  %v5685_v6 = vld [vmem:[#allocation6 + $0x1d8] sm:$0xff]  }
  0xa0   : > { %4958 = vmatprep.subr.bf16.mxu1 %v5648_v21  ;;  %v6408_v0 = vcombine.low %v465_v59, %v475_v60  ;;  %v493_v15 = vor.u32 %v492_v12, %v488_v10  ;;  %v5674_v21 = vld [vmem:[%s6385_s28 + $0x1c8] sm:$0xff]   ;;  %v5683_v60 = vld [vmem:[#allocation6 + $0x158] sm:$0xff]   ;;  %v5832_v53 = vld [vmem:[%s6385_s28 + $0x120] sm:$0xff]  }
  0xa1   : > { %v484_v18 = vrot.slane %v483_v13, 4  ;;  %v5682_v50 = vld [vmem:[%s6385_s28 + $0x24] sm:$0xff]   ;;  %v436_v55 = vld [vmem:[%s6385_s28 + $0x2c] sm:$0x1]  ;;  %v5686_v9 = vld [vmem:[#allocation6 + $0x198] sm:$0xff]  }
  0xa2   : > { %4895 = vmatpush3.bf16.msra.mxu0 %v5649_v22  ;;  %v494_v20 = vrot.slane %v493_v15, 4  ;;  %v435_v54 = vld [vmem:[%s6385_s28 + $0x28] sm:$0xf]  ;;  %v544_v62 = vshll.u32 %v436_v55, 16  ;;  %v5688_v13 = vld [vmem:[%s6385_s28 + $0x1e0] sm:$0xff]   ;;  %v5689_v15 = vld [vmem:[%s6385_s28 + $0x30] sm:$0xff]  }
  0xa3   : > { %4959 = vmatpush3.bf16.msra.mxu1 %v5650_v23  ;;  %4896 = vmatprep.subr.bf16.mxu0 %v5651_v24  ;;  %v489_v22 = vsel %vm6395_vm2, %v484_v18, %v488_v10  ;;  %v5675_v23 = vld [vmem:[%s6385_s28 + $0x18] sm:$0xff]   ;;  %v534_v59 = vshll.u32 %v435_v54, 16  ;;  %v5697_v55 = vld [vmem:[#allocation6 + $0x168] sm:$0xff]  }
  0xa4   : > { %4960 = vmatprep.subr.bf16.mxu1 %v5652_v25  ;;  %v431_v24 = vld [vmem:[%s6385_s28 + $0x18] sm:$0xf]  ;;  %v499_v25 = vsel %vm6395_vm2, %v494_v20, %v498_v16  ;;  %v546_v8 = vrot.slane %v544_v62, 5  ;;  %v437_v16 = vld [vmem:[%s6385_s28 + $0x30] sm:$0xf] }
  0xa5   : > { %v536_v2 = vrot.slane %v534_v59, 5  ;;  %v549_v20 = vshrl.u32 %v437_v16, 16 }
  0xa6   : > { %4897 = vmatpush3.bf16.msra.mxu0 %v5653_v26  ;;  %v432_v26 = vld [vmem:[%s6385_s28 + $0x1c] sm:$0xf] }
  0xa7   : > { %4961 = vmatpush3.bf16.msra.mxu1 %v5654_v27  ;;  %4898 = vmatprep.subr.bf16.mxu0 %v5655_v28  ;;  %v433_v27 = vld [vmem:[%s6385_s28 + $0x20] sm:$0x1]  ;;  %v501_v28 = vshrl.u32 %v431_v24, 16  ;;  %v514_v32 = vshrl.u32 %v432_v26, 16 }
  0xa8   : > { %4962 = vmatprep.subr.bf16.mxu1 %v5656_v29  ;;  %v504_v29 = vshll.u32 %v431_v24, 16  ;;  %v520_v33 = vshll.u32 %v433_v27, 16  ;;  %v551_v27 = vrot.slane %v549_v20, 4 }
  0xa9   : > { %v503_v35 = vrot.slane %v501_v28, 4  ;;  %v516_v38 = vrot.slane %v514_v32, 4 }
  0xaa   : > { %4899 = vmatpush3.bf16.msra.mxu0 %v5657_v30  ;;  %v6422_v30 = vcombine.low %v489_v22, %v499_v25  ;;  %v506_v36 = vrot.slane %v504_v29, 5 }
  0xab   : > { %4963 = vmatpush3.bf16.msra.mxu1 %v5658_v31  ;;  %5012 = vmatprep.subr.bf16.mxu0 %v5662_v43  ;;  %v510_v31 = vshll.u32 %v432_v26, 16  ;;  %v522_v43 = vrot.slane %v520_v33, 5 }
  0xac   : > { %5076 = vmatprep.subr.bf16.mxu1 %v5664_v52  ;;  %v507_v40 = vor.u32 %v506_v36, %v503_v35  ;;  %v434_v52 = vld [vmem:[%s6385_s28 + $0x24] sm:$0xf] }
  0xad   : > { %2252 = vmatmul.mubr.bf16.vlgmr.msra.gmra.mrb[0].mxu0 %v5661_v34  ;;  %v5676_v34 = vld [vmem:[#allocation6 + $0x150] sm:$0xff]   ;;  %v512_v37 = vrot.slane %v510_v31, 5  ;;  %v5691_v31 = vld [vmem:[#allocation6 + $0x120] sm:$0xff]  }
  0xae   : > { %5013 = vmatpush3.bf16.msra.mxu0 %v5663_v48  ;;  %2259 = vmatprep.mubr.bf16.mxu0 %v5666_v57  ;;  %v508_v45 = vrot.slane %v507_v40, 4  ;;  %v5681_v48 = vld [vmem:[%s6385_s28 + $0x1d4] sm:$0xff]   ;;  %v525_v57 = vshrl.u32 %v434_v52, 16 }
  0xaf   : > { %2349 = vmatmul.mubr.bf16.vlgmr.msra.gmra.mrb[0].mxu1 %v6408_v0  ;;  %5014 = vmatprep.subr.bf16.mxu0 %v5669_v5  ;;  %v517_v42 = vor.u32 %v516_v38, %v512_v37 }
  0xb0   : > { %5077 = vmatpush3.bf16.msra.mxu1 %v5665_v56  ;;  %2356 = vmatprep.mubr.bf16.mxu1 %v5667_v58  ;;  %v513_v49 = vsel %vm6395_vm2, %v508_v45, %v512_v37  ;;  %v528_v58 = vshll.u32 %v434_v52, 16  ;;  %v527_v63 = vrot.slane %v525_v57, 4  ;;  %v5693_v37 = vld [vmem:[#allocation6 + $0x1a0] sm:$0xff]  }
  0xb1   : > { %5078 = vmatprep.subr.bf16.mxu1 %v5671_v14  ;;  %v518_v47 = vrot.slane %v517_v42, 4 }
  0xb2   : > { %5015 = vmatpush3.bf16.msra.mxu0 %v5670_v11  ;;  %v530_v1 = vrot.slane %v528_v58, 5  ;;  %v5687_v11 = vld [vmem:[%s6385_s28 + $0x108] sm:$0xff]  }
  0xb3   : > { %5016 = vmatprep.subr.bf16.mxu0 %v5676_v34  ;;  %v523_v51 = vsel %vm6395_vm2, %v518_v47, %v522_v43  ;;  %v5692_v34 = vld [vmem:[#allocation6 + $0x1e0] sm:$0xff]  }
  0xb4   : > { %5079 = vmatpush3.bf16.msra.mxu1 %v5672_v17  ;;  %v6435_v56 = vcombine.low %v513_v49, %v523_v51  ;;  %v531_v5 = vor.u32 %v530_v1, %v527_v63  ;;  %v438_v17 = vld [vmem:[%s6385_s28 + $0x34] sm:$0xf]  ;;  %v5696_v43 = vld [vmem:[%s6385_s28 + $0x3c] sm:$0xff]   ;;  %v442_v47 = vld [vmem:[%s6385_s28 + $0x44] sm:$0x1] }
  0xb5   : > { %2260 = vmatmul.mubr.bf16.gmra.mrb[4].mxu0 %v5668_v61  ;;  %5080 = vmatprep.subr.bf16.mxu1 %v5678_v41  ;;  %v538_v61 = vshrl.u32 %v435_v54, 16  ;;  %v558_v22 = vshll.u32 %v438_v17, 16  ;;  %v562_v25 = vshrl.u32 %v438_v17, 16  ;;  %v5695_v41 = vld [vmem:[%s6385_s28 + $0x1ec] sm:$0xff]   ;;  %v592_v54 = vshll.u32 %v442_v47, 16 }
  0xb6   : > { %2267 = vmatprep.mubr.bf16.mxu0 %v5673_v19  ;;  %5017 = vmatpush3.bf16.msra.mxu0 %v5677_v39  ;;  %v532_v10 = vrot.slane %v531_v5, 4  ;;  %v439_v19 = vld [vmem:[%s6385_s28 + $0x38] sm:$0x1]  ;;  %v5699_v63 = vld [vmem:[#allocation6 + $0x1e8] sm:$0xff]   ;;  %v5701_v5 = vld [vmem:[%s6385_s28 + $0x120] sm:$0xff]  }
  0xb7   : > { %2357 = vmatmul.mubr.bf16.gmra.mrb[4].mxu1 %v6422_v30  ;;  %5018 = vmatprep.subr.bf16.mxu0 %v5683_v60  ;;  %v540_v4 = vrot.slane %v538_v61, 4  ;;  %v568_v26 = vshll.u32 %v439_v19, 16  ;;  %v560_v29 = vrot.slane %v558_v22, 5  ;;  %v564_v32 = vrot.slane %v562_v25, 4  ;;  %v5694_v39 = vld [vmem:[%s6385_s28 + $0x114] sm:$0xff]   ;;  %v5698_v61 = vld [vmem:[#allocation6 + $0x128] sm:$0xff]  }
  0xb8   : > { %2364 = vmatprep.mubr.bf16.mxu1 %v5674_v21  ;;  %5081 = vmatpush3.bf16.msra.mxu1 %v5679_v44  ;;  %v537_v14 = vsel %vm6395_vm2, %v532_v10, %v536_v2  ;;  %v552_v21 = vshll.u32 %v437_v16, 16  ;;  %v440_v44 = vld [vmem:[%s6385_s28 + $0x3c] sm:$0xf]  ;;  %v5705_v25 = vld [vmem:[#allocation6 + $0x130] sm:$0xff]  }
  0xb9   : > { %v541_v7 = vor.u32 %v540_v4, %v536_v2  ;;  %5082 = vmatprep.subr.bf16.mxu1 %v5685_v6  ;;  %v565_v35 = vor.u32 %v564_v32, %v560_v29  ;;  %v570_v36 = vrot.slane %v568_v26, 5  ;;  %v576_v49 = vshll.u32 %v440_v44, 16  ;;  %v5707_v32 = vld [vmem:[#allocation6 + $0x1b0] sm:$0xff]  }
  0xba   : > { %5019 = vmatpush3.bf16.msra.mxu0 %v5684_v3  ;;  %v554_v28 = vrot.slane %v552_v21, 5  ;;  %v594_v2 = vrot.slane %v592_v54, 5  ;;  %v5700_v3 = vld [vmem:[#allocation6 + $0x1a8] sm:$0xff]  }
  0xbb   : > { %v542_v12 = vrot.slane %v541_v7, 4  ;;  %v566_v40 = vrot.slane %v565_v35, 4  ;;  %v578_v58 = vrot.slane %v576_v49, 5  ;;  %v5702_v7 = vld [vmem:[%s6385_s28 + $0x1f8] sm:$0xff]  }
  0xbc   : > { %5083 = vmatpush3.bf16.msra.mxu1 %v5686_v9  ;;  %v555_v33 = vor.u32 %v554_v28, %v551_v27  ;;  %v5703_v9 = vld [vmem:[%s6385_s28 + $0x48] sm:$0xff]   ;;  %v5706_v28 = vld [vmem:[#allocation6 + $0x1f0] sm:$0xff]  }
  0xbd   : > { %2268 = vmatmul.mubr.bf16.gmra.mrb[8].mxu0 %v5675_v23  ;;  %v547_v18 = vsel %vm6395_vm2, %v542_v12, %v546_v8  ;;  %v5690_v23 = vld [vmem:[#allocation6 + $0x160] sm:$0xff]   ;;  %5084 = vmatprep.subr.bf16.mxu1 %v5692_v34  ;;  %v571_v45 = vsel %vm6395_vm2, %v566_v40, %v570_v36  ;;  %v444_v12 = vld [vmem:[%s6385_s28 + $0x4c] sm:$0xf]  ;;  %v447_v40 = vld [vmem:[%s6385_s28 + $0x58] sm:$0xf] }
  0xbe   : > { %2275 = vmatprep.mubr.bf16.mxu0 %v5680_v46  ;;  %v6448_v24 = vcombine.low %v537_v14, %v547_v18  ;;  %5020 = vmatprep.subr.bf16.mxu0 %v5690_v23  ;;  %v556_v38 = vrot.slane %v555_v33, 4  ;;  %v441_v46 = vld [vmem:[%s6385_s28 + $0x40] sm:$0xf]  ;;  %v606_v17 = vshll.u32 %v444_v12, 16  ;;  %v5704_v18 = vld [vmem:[#allocation6 + $0x170] sm:$0xff]   ;;  %v610_v19 = vshrl.u32 %v444_v12, 16 }
  0xbf   : > { %2365 = vmatmul.mubr.bf16.gmra.mrb[8].mxu1 %v6435_v56  ;;  %5021 = vmatpush3.bf16.msra.mxu0 %v5691_v31  ;;  %v582_v51 = vshll.u32 %v441_v46, 16  ;;  %v586_v52 = vshrl.u32 %v441_v46, 16  ;;  %v5708_v34 = vld [vmem:[%s6385_s28 + $0x12c] sm:$0xff]   ;;  %v5709_v36 = vld [vmem:[%s6385_s28 + $0x204] sm:$0xff]   ;;  %v5711_v46 = vld [vmem:[#allocation6 + $0x178] sm:$0xff]  }
  0xc0   : > { %2372 = vmatprep.mubr.bf16.mxu1 %v5681_v48  ;;  %5085 = vmatpush3.bf16.msra.mxu1 %v5693_v37  ;;  %v561_v42 = vsel %vm6395_vm2, %v556_v38, %v560_v29  ;;  %v573_v48 = vshrl.u32 %v440_v44, 16  ;;  %v608_v23 = vrot.slane %v606_v17, 5  ;;  %v612_v26 = vrot.slane %v610_v19, 4  ;;  %v5710_v38 = vld [vmem:[%s6385_s28 + $0x54] sm:$0xff]   ;;  %v5715_v17 = vld [vmem:[%s6385_s28 + $0xe4] sm:$0xff]  }
  0xc1   : > { %v584_v59 = vrot.slane %v582_v51, 5  ;;  %v588_v60 = vrot.slane %v586_v52, 4  ;;  %5022 = vmatprep.subr.bf16.mxu0 %v5697_v55  ;;  %5086 = vmatprep.subr.bf16.mxu1 %v5699_v63  ;;  %v5712_v55 = vld [vmem:[#allocation6 + $0x138] sm:$0xff]   ;;  %v4445_v63 = vld [vmem:[%s6385_s28 + $0x1b0] sm:$0xf] }
  0xc2   : > { %v575_v57 = vrot.slane %v573_v48, 4  ;;  %v613_v29 = vor.u32 %v612_v26, %v608_v23  ;;  %v634_v48 = vshrl.u32 %v447_v40, 16 }
  0xc3   : > { %v589_v1 = vor.u32 %v588_v60, %v584_v59  ;;  %5023 = vmatpush3.bf16.msra.mxu0 %v5698_v61 }
  0xc4   : > { %v579_v62 = vor.u32 %v578_v58, %v575_v57  ;;  %5087 = vmatpush3.bf16.msra.mxu1 %v5700_v3  ;;  %5024 = vmatprep.subr.bf16.mxu0 %v5704_v18  ;;  %v614_v35 = vrot.slane %v613_v29, 4  ;;  %v636_v57 = vrot.slane %v634_v48, 4  ;;  %v4447_v3 = vld [vmem:[%s6385_s28 + $0x1b8] sm:$0x1]  ;;  %v4448_v29 = vld [vmem:[%s6385_s28 + $0x1bc] sm:$0xf] }
  0xc5   : > { %2276 = vmatmul.mubr.bf16.gmra.mrb[12].mxu0 %v5682_v50  ;;  %v6461_v50 = vcombine.low %v561_v42, %v571_v45  ;;  %v590_v6 = vrot.slane %v589_v1, 4  ;;  %5088 = vmatprep.subr.bf16.mxu1 %v5706_v28  ;;  %v448_v42 = vld [vmem:[%s6385_s28 + $0x5c] sm:$0x1]  ;;  %v630_v45 = vshll.u32 %v447_v40, 16  ;;  %v5717_v28 = vld [vmem:[%s6385_s28 + $0xc] sm:$0xff]  }
  0xc6   : > { %2283 = vmatprep.mubr.bf16.mxu0 %v5687_v11  ;;  %v580_v4 = vrot.slane %v579_v62, 4  ;;  %v443_v11 = vld [vmem:[%s6385_s28 + $0x48] sm:$0xf]  ;;  %v640_v49 = vshll.u32 %v448_v42, 16  ;;  %v5714_v62 = vld [vmem:[#allocation6 + $0x1b8] sm:$0xff]   ;;  %v5721_v42 = vld [vmem:[%s6385_s28 + $0xf0] sm:$0xff]  }
  0xc7   : > { %2373 = vmatmul.mubr.bf16.gmra.mrb[12].mxu1 %v6448_v24  ;;  %v595_v10 = vsel %vm6395_vm2, %v590_v6, %v594_v2  ;;  %v600_v16 = vshll.u32 %v443_v11, 16  ;;  %5025 = vmatpush3.bf16.msra.mxu0 %v5705_v25  ;;  %v632_v54 = vrot.slane %v630_v45, 5  ;;  %v4446_v2 = vld [vmem:[%s6385_s28 + $0x1b4] sm:$0xf]  ;;  %v864_v6 = vshll.u32 %v4445_v63, 16 }
  0xc8   : > { %2380 = vmatprep.mubr.bf16.mxu1 %v5688_v13  ;;  %v585_v8 = vsel %vm6395_vm2, %v580_v4, %v584_v59  ;;  %v445_v13 = vld [vmem:[%s6385_s28 + $0x50] sm:$0x1]  ;;  %5089 = vmatpush3.bf16.msra.mxu1 %v5707_v32  ;;  %v5713_v59 = vld [vmem:[#allocation6 + $0x1f8] sm:$0xff]   ;;  %v642_v61 = vrot.slane %v640_v49, 5  ;;  %v861_v4 = vshrl.u32 %v4445_v63, 16 }
  0xc9   : > { %v6474_v14 = vcombine.low %v585_v8, %v595_v10  ;;  %v616_v20 = vshll.u32 %v445_v13, 16  ;;  %v602_v22 = vrot.slane %v600_v16, 5  ;;  %5026 = vmatprep.subr.bf16.mxu0 %v5711_v46  ;;  %v637_v60 = vor.u32 %v636_v57, %v632_v54  ;;  %5090 = vmatprep.subr.bf16.mxu1 %v5713_v59  ;;  %v5723_v59 = vld [vmem:[%s6385_s28 + $0x18] sm:$0xff]   ;;  %v4452_v63 = vld [vmem:[%s6385_s28 + $0x1cc] sm:$0xf] }
  0xca   : > { %v874_v8 = vshrl.u32 %v4446_v2, 16  ;;  %v863_v10 = vrot.slane %v861_v4, 4  ;;  %v866_v13 = vrot.slane %v864_v6, 5  ;;  %v922_v6 = vshrl.u32 %v4452_v63, 16 }
  0xcb   : > { %v618_v31 = vrot.slane %v616_v20, 5  ;;  %5027 = vmatpush3.bf16.msra.mxu0 %v5712_v55  ;;  %v5718_v20 = vld [vmem:[#allocation6 + $0x200] sm:$0xff]   ;;  %v5725_v55 = vld [vmem:[#allocation6 + $0x288] sm:$0xff]  }
  0xcc   : > { %5091 = vmatpush3.bf16.msra.mxu1 %v5714_v62  ;;  %v876_v16 = vrot.slane %v874_v8, 4  ;;  %5428 = vmatprep.subr.bf16.mxu0 %v5718_v20  ;;  %v5727_v8 = vld [vmem:[%s6385_s28 + $0xfc] sm:$0xff]  }
  0xcd   : > { %2284 = vmatmul.mubr.bf16.gmra.mrb[16].mxu0 %v5689_v15  ;;  %v597_v15 = vshrl.u32 %v443_v11, 16  ;;  %v880_v11 = vshll.u32 %v4447_v3, 16 }
  0xce   : > { %2291 = vmatprep.mubr.bf16.mxu0 %v5694_v39  ;;  %v446_v39 = vld [vmem:[%s6385_s28 + $0x54] sm:$0xf] }
  0xcf   : > { %2381 = vmatmul.mubr.bf16.gmra.mrb[16].mxu1 %v6461_v50  ;;  %v599_v21 = vrot.slane %v597_v15, 4  ;;  %v624_v44 = vshll.u32 %v446_v39, 16  ;;  %v882_v19 = vrot.slane %v880_v11, 5 }
  0xd0   : > { %2388 = vmatprep.mubr.bf16.mxu1 %v5695_v41  ;;  %v619_v41 = vsel %vm6395_vm2, %v614_v35, %v618_v31  ;;  %v4449_v31 = vld [vmem:[%s6385_s28 + $0x1c0] sm:$0xf]  ;;  %v4450_v35 = vld [vmem:[%s6385_s28 + $0x1c4] sm:$0x1] }
  0xd1   : > { %v603_v27 = vor.u32 %v602_v22, %v599_v21  ;;  %v626_v52 = vrot.slane %v624_v44, 5  ;;  %v867_v21 = vor.u32 %v866_v13, %v863_v10  ;;  %v898_v40 = vshrl.u32 %v4449_v31, 16 }
  0xd2   : > { %v924_v13 = vrot.slane %v922_v6, 4 }
  0xd3   : > { %v604_v33 = vrot.slane %v603_v27, 4  ;;  %v868_v25 = vrot.slane %v867_v21, 4  ;;  %v5716_v27 = vld [vmem:[%s6385_s28 + $0x288] sm:$0xff]   ;;  %v900_v46 = vrot.slane %v898_v40, 4  ;;  %v5731_v21 = vld [vmem:[#allocation6 + $0x290] sm:$0xff]  }
  0xd5   : > { %2292 = vmatmul.mubr.bf16.gmra.mrb[20].mxu0 %v5696_v43  ;;  %v609_v37 = vsel %vm6395_vm2, %v604_v33, %v608_v23  ;;  %v621_v43 = vshrl.u32 %v446_v39, 16  ;;  %v5719_v23 = vld [vmem:[#allocation6 + $0x280] sm:$0xff]   ;;  %v894_v39 = vshll.u32 %v4449_v31, 16  ;;  %v4456_v31 = vld [vmem:[%s6385_s28 + $0x1dc] sm:$0x1] }
  0xd6   : > { %2299 = vmatprep.mubr.bf16.mxu0 %v5701_v5  ;;  %v6487_v47 = vcombine.low %v609_v37, %v619_v41  ;;  %v638_v5 = vrot.slane %v637_v60, 4  ;;  %5156 = vmatprep.subr.bf16.mxu1 %v5719_v23  ;;  %v888_v37 = vshll.u32 %v4448_v29, 16  ;;  %v904_v41 = vshll.u32 %v4450_v35, 16  ;;  %v5726_v60 = vld [vmem:[#allocation6 + $0x248] sm:$0xff]   ;;  %v5728_v23 = vld [vmem:[%s6385_s28 + $0x2a0] sm:$0xff]  }
  0xd7   : > { %2389 = vmatmul.mubr.bf16.gmra.mrb[20].mxu1 %v6474_v14  ;;  %v623_v51 = vrot.slane %v621_v43, 4  ;;  %v896_v45 = vrot.slane %v894_v39, 5  ;;  %v952_v40 = vshll.u32 %v4456_v31, 16 }
  0xd8   : > { %2396 = vmatprep.mubr.bf16.mxu1 %v5702_v7  ;;  %v870_v7 = vshll.u32 %v4446_v2, 16  ;;  %v643_v12 = vsel %vm6395_vm2, %v638_v5, %v642_v61  ;;  %v890_v44 = vrot.slane %v888_v37, 5  ;;  %v4451_v61 = vld [vmem:[%s6385_s28 + $0x1c8] sm:$0xf]  ;;  %v918_v5 = vshll.u32 %v4452_v63, 16 }
  0xd9   : > { %v627_v58 = vor.u32 %v626_v52, %v623_v51  ;;  %v901_v49 = vor.u32 %v900_v46, %v896_v45  ;;  %v906_v51 = vrot.slane %v904_v41, 5  ;;  %v5724_v52 = vld [vmem:[#allocation6 + $0x208] sm:$0xff]   ;;  %v909_v2 = vshrl.u32 %v4451_v61, 16 }
  0xda   : > { %v872_v15 = vrot.slane %v870_v7, 5  ;;  %v912_v3 = vshll.u32 %v4451_v61, 16 }
  0xdb   : > { %v628_v1 = vrot.slane %v627_v58, 4  ;;  %v902_v57 = vrot.slane %v901_v49, 4  ;;  %v5722_v58 = vld [vmem:[%s6385_s28 + $0x294] sm:$0xff]   ;;  %v911_v10 = vrot.slane %v909_v2, 4 }
  0xdc   : > { %v877_v22 = vor.u32 %v876_v16, %v872_v15  ;;  %v873_v32 = vsel %vm6395_vm2, %v868_v25, %v872_v15  ;;  %v914_v11 = vrot.slane %v912_v3, 5  ;;  %v5729_v25 = vld [vmem:[%s6385_s28 + $0x24] sm:$0xff]   ;;  %v5736_v49 = vld [vmem:[#allocation6 + $0x218] sm:$0xff]  }
  0xdd   : > { %2300 = vmatmul.mubr.bf16.gmra.mrb[24].mxu0 %v5703_v9  ;;  %v633_v9 = vsel %vm6395_vm2, %v628_v1, %v632_v54  ;;  %v4453_v1 = vld [vmem:[%s6385_s28 + $0x1d0] sm:$0x1]  ;;  %v907_v4 = vsel %vm6395_vm2, %v902_v57, %v906_v51  ;;  %v5739_v3 = vld [vmem:[%s6385_s28 + $0x114] sm:$0xff]  }
  0xde   : > { %2307 = vmatprep.mubr.bf16.mxu0 %v5708_v34  ;;  %v6498_v18 = vcombine.low %v633_v9, %v643_v12  ;;  %v878_v26 = vrot.slane %v877_v22, 4  ;;  %v5720_v34 = vld [vmem:[#allocation6 + $0x240] sm:$0xff]   ;;  %v928_v7 = vshll.u32 %v4453_v1, 16  ;;  %v920_v12 = vrot.slane %v918_v5, 5  ;;  %v5734_v57 = vld [vmem:[%s6385_s28 + $0x2ac] sm:$0xff]  }
  0xdf   : > { %2397 = vmatmul.mubr.bf16.gmra.mrb[24].mxu1 %v6487_v47  ;;  %v915_v15 = vor.u32 %v914_v11, %v911_v10 }
  0xe0   : > { %2404 = vmatprep.mubr.bf16.mxu1 %v5709_v36  ;;  %v883_v33 = vsel %vm6395_vm2, %v878_v26, %v882_v19  ;;  %v885_v36 = vshrl.u32 %v4448_v29, 16  ;;  %v925_v16 = vor.u32 %v924_v13, %v920_v12  ;;  %v5730_v19 = vld [vmem:[#allocation6 + $0x210] sm:$0xff]   ;;  %v4455_v29 = vld [vmem:[%s6385_s28 + $0x1d8] sm:$0xf] }
  0xe1   : > { %v5732_v26 = vld [vmem:[#allocation6 + $0x250] sm:$0xff]   ;;  %v942_v35 = vshll.u32 %v4455_v29, 16  ;;  %v946_v39 = vshrl.u32 %v4455_v29, 16 }
  0xe2   : > { %v887_v43 = vrot.slane %v885_v36, 4  ;;  %v926_v22 = vrot.slane %v925_v16, 4  ;;  %v5733_v36 = vld [vmem:[%s6385_s28 + $0x108] sm:$0xff]   ;;  %v4462_v29 = vld [vmem:[%s6385_s28 + $0x1f4] sm:$0x1] }
  0xe4   : > { %v891_v48 = vor.u32 %v890_v44, %v887_v43  ;;  %v944_v43 = vrot.slane %v942_v35, 5  ;;  %v948_v44 = vrot.slane %v946_v39, 4  ;;  %v5745_v39 = vld [vmem:[%s6385_s28 + $0x120] sm:$0xff]  }
  0xe5   : > { %2308 = vmatmul.mubr.bf16.gmra.mrb[28].mxu0 %v5710_v38  ;;  %v6510_v38 = vcombine.low %v873_v32, %v883_v33 }
  0xe6   : > { %v892_v54 = vrot.slane %v891_v48, 4  ;;  %v949_v46 = vor.u32 %v948_v44, %v944_v43  ;;  %v954_v48 = vrot.slane %v952_v40, 5 }
  0xe7   : > { %2405 = vmatmul.mubr.bf16.gmra.mrb[28].mxu1 %v6498_v18  ;;  %2445 = vmatprep.mubr.bf16.mxu0 %v6510_v38 }
  0xe8   : > { %2542 = vmatprep.mubr.bf16.mxu1 %v5715_v17  ;;  %v897_v62 = vsel %vm6395_vm2, %v892_v54, %v896_v45  ;;  %v930_v17 = vrot.slane %v928_v7, 5  ;;  %v5737_v54 = vld [vmem:[#allocation6 + $0x298] sm:$0xff]  }
  0xe9   : > { %v6524_v9 = vcombine.low %v897_v62, %v907_v4  ;;  %v4459_v62 = vld [vmem:[%s6385_s28 + $0x1e8] sm:$0x1] }
  0xea   : > { %v931_v32 = vsel %vm6395_vm2, %v926_v22, %v930_v17  ;;  %v976_v6 = vshll.u32 %v4459_v62, 16  ;;  %v5742_v17 = vld [vmem:[#allocation6 + $0x220] sm:$0xff]  }
  0xeb   : > { %v4465_v62 = vld [vmem:[%s6385_s28 + $0x200] sm:$0x1] }
  0xec   : > { %v978_v16 = vrot.slane %v976_v6, 5 }
  0xed   : > { %2446 = vmatmul.mubr.bf16.vlgmr.msra.gmra.mrb[32].mxu0 %v5716_v27 }
  0xee   : > { %5429 = vmatpush3.bf16.msra.mxu0 %v5718_v20  ;;  %2453 = vmatprep.mubr.bf16.mxu0 %v6524_v9  ;;  %v916_v20 = vrot.slane %v915_v15, 4 }
  0xef   : > { %2543 = vmatmul.mubr.bf16.vlgmr.msra.gmra.mrb[32].mxu1 %v5717_v28  ;;  %5430 = vmatprep.subr.bf16.mxu0 %v5724_v52  ;;  %v4454_v28 = vld [vmem:[%s6385_s28 + $0x1d4] sm:$0xf] }
  0xf0   : > { %5157 = vmatpush3.bf16.msra.mxu1 %v5720_v34  ;;  %2550 = vmatprep.mubr.bf16.mxu1 %v5721_v42  ;;  %v921_v27 = vsel %vm6395_vm2, %v916_v20, %v920_v12  ;;  %v933_v33 = vshrl.u32 %v4454_v28, 16  ;;  %v936_v34 = vshll.u32 %v4454_v28, 16  ;;  %v5741_v20 = vld [vmem:[%s6385_s28 + $0x3c] sm:$0xff]   ;;  %v4461_v28 = vld [vmem:[%s6385_s28 + $0x1f0] sm:$0xf] }
  0xf1   : > { %5158 = vmatprep.subr.bf16.mxu1 %v5725_v55  ;;  %v6537_v37 = vcombine.low %v921_v27, %v931_v32  ;;  %v950_v55 = vrot.slane %v949_v46, 4  ;;  %v994_v35 = vshrl.u32 %v4461_v28, 16 }
  0xf2   : > { %5431 = vmatpush3.bf16.msra.mxu0 %v5724_v52  ;;  %v935_v41 = vrot.slane %v933_v33, 4  ;;  %v938_v42 = vrot.slane %v936_v34, 5  ;;  %v5735_v52 = vld [vmem:[%s6385_s28 + $0x30] sm:$0xff]   ;;  %v990_v34 = vshll.u32 %v4461_v28, 16  ;;  %v4467_v28 = vld [vmem:[%s6385_s28 + $0x208] sm:$0xf] }
  0xf3   : > { %5432 = vmatprep.subr.bf16.mxu0 %v5730_v19  ;;  %v955_v4 = vsel %vm6395_vm2, %v950_v55, %v954_v48  ;;  %v996_v44 = vrot.slane %v994_v35, 4  ;;  %v5757_v35 = vld [vmem:[%s6385_s28 + $0x138] sm:$0xff]  }
  0xf4   : > { %5159 = vmatpush3.bf16.msra.mxu1 %v5726_v60  ;;  %v939_v45 = vor.u32 %v938_v42, %v935_v41  ;;  %v4458_v60 = vld [vmem:[%s6385_s28 + $0x1e4] sm:$0xf] }
  0xf5   : > { %2454 = vmatmul.mubr.bf16.gmra.mrb[36].mxu0 %v5722_v58  ;;  %5160 = vmatprep.subr.bf16.mxu1 %v5731_v21  ;;  %v5738_v58 = vld [vmem:[#allocation6 + $0x258] sm:$0xff]   ;;  %v966_v2 = vshll.u32 %v4458_v60, 16  ;;  %v970_v5 = vshrl.u32 %v4458_v60, 16  ;;  %v5743_v21 = vld [vmem:[#allocation6 + $0x2a0] sm:$0xff]  }
  0xf6   : > { %5433 = vmatpush3.bf16.msra.mxu0 %v5730_v19  ;;  %2461 = vmatprep.mubr.bf16.mxu0 %v6537_v37  ;;  %v940_v51 = vrot.slane %v939_v45, 4  ;;  %v4463_v60 = vld [vmem:[%s6385_s28 + $0x1f8] sm:$0xf] }
  0xf7   : > { %2551 = vmatmul.mubr.bf16.gmra.mrb[36].mxu1 %v5723_v59  ;;  %5434 = vmatprep.subr.bf16.mxu0 %v5736_v49  ;;  %v4457_v59 = vld [vmem:[%s6385_s28 + $0x1e0] sm:$0xf]  ;;  %v968_v11 = vrot.slane %v966_v2, 5  ;;  %v972_v12 = vrot.slane %v970_v5, 4  ;;  %v1008_v2 = vshll.u32 %v4463_v60, 16 }
  0xf8   : > { %2558 = vmatprep.mubr.bf16.mxu1 %v5727_v8  ;;  %5161 = vmatpush3.bf16.msra.mxu1 %v5732_v26  ;;  %v945_v61 = vsel %vm6395_vm2, %v940_v51, %v944_v43  ;;  %v957_v63 = vshrl.u32 %v4457_v59, 16  ;;  %v960_v1 = vshll.u32 %v4457_v59, 16  ;;  %v4460_v26 = vld [vmem:[%s6385_s28 + $0x1ec] sm:$0xf]  ;;  %v992_v43 = vrot.slane %v990_v34, 5 }
  0xf9   : > { %5162 = vmatprep.subr.bf16.mxu1 %v5737_v54  ;;  %v6550_v7 = vcombine.low %v945_v61, %v955_v4  ;;  %v973_v15 = vor.u32 %v972_v12, %v968_v11  ;;  %v981_v31 = vshrl.u32 %v4460_v26, 16  ;;  %v984_v32 = vshll.u32 %v4460_v26, 16  ;;  %v5749_v54 = vld [vmem:[#allocation6 + $0x2a8] sm:$0xff]   ;;  %v4464_v61 = vld [vmem:[%s6385_s28 + $0x1fc] sm:$0xf]  ;;  %v5756_v26 = vld [vmem:[#allocation6 + $0x270] sm:$0xff]  }
  0xfa   : > { %5435 = vmatpush3.bf16.msra.mxu0 %v5736_v49  ;;  %v959_v8 = vrot.slane %v957_v63, 4  ;;  %v962_v10 = vrot.slane %v960_v1, 5  ;;  %v997_v46 = vor.u32 %v996_v44, %v992_v43  ;;  %v5748_v49 = vld [vmem:[#allocation6 + $0x228] sm:$0xff]   ;;  %v1005_v1 = vshrl.u32 %v4463_v60, 16  ;;  %v5762_v60 = vld [vmem:[#allocation6 + $0x278] sm:$0xff]  }
  0xfb   : > { %v974_v22 = vrot.slane %v973_v15, 4  ;;  %5436 = vmatprep.subr.bf16.mxu0 %v5742_v17  ;;  %v983_v41 = vrot.slane %v981_v31, 4  ;;  %v986_v42 = vrot.slane %v984_v32, 5  ;;  %v5751_v4 = vld [vmem:[%s6385_s28 + $0x12c] sm:$0xff]   ;;  %v1018_v6 = vshrl.u32 %v4464_v61, 16 }
  0xfc   : > { %5163 = vmatpush3.bf16.msra.mxu1 %v5738_v58  ;;  %v963_v13 = vor.u32 %v962_v10, %v959_v8  ;;  %v998_v55 = vrot.slane %v997_v46, 4  ;;  %v5750_v58 = vld [vmem:[#allocation6 + $0x268] sm:$0xff]   ;;  %v1024_v8 = vshll.u32 %v4465_v62, 16  ;;  %v1007_v10 = vrot.slane %v1005_v1, 4  ;;  %v4531_v1 = vld [vmem:[%s6385_s28 + $0x14] sm:$0x1] }
  0xfd   : > { %2462 = vmatmul.mubr.bf16.gmra.mrb[40].mxu0 %v5728_v23  ;;  %v5740_v23 = vld [vmem:[%s6385_s28 + $0x2b8] sm:$0xff]   ;;  %5164 = vmatprep.subr.bf16.mxu1 %v5743_v21  ;;  %v979_v33 = vsel %vm6395_vm2, %v974_v22, %v978_v16  ;;  %v987_v45 = vor.u32 %v986_v42, %v983_v41  ;;  %v5755_v22 = vld [vmem:[#allocation6 + $0x2b0] sm:$0xff]   ;;  %v4468_v31 = vld [vmem:[%s6385_s28 + $0x20c] sm:$0x1]  ;;  %v1038_v34 = vshll.u32 %v4467_v28, 16 }
  0xfe   : > { %2469 = vmatprep.mubr.bf16.mxu0 %v6550_v7  ;;  %v964_v19 = vrot.slane %v963_v13, 4  ;;  %5437 = vmatpush3.bf16.msra.mxu0 %v5742_v17  ;;  %v1020_v13 = vrot.slane %v1018_v6, 4  ;;  %v1026_v17 = vrot.slane %v1024_v8, 5  ;;  %v1048_v41 = vshll.u32 %v4468_v31, 16 }
  0xff   : > { %2559 = vmatmul.mubr.bf16.gmra.mrb[40].mxu1 %v5729_v25  ;;  %v5744_v25 = vld [vmem:[#allocation6 + $0x260] sm:$0xff]   ;;  %v988_v51 = vrot.slane %v987_v45, 4  ;;  %5438 = vmatprep.subr.bf16.mxu0 %v5748_v49  ;;  %v1040_v45 = vrot.slane %v1038_v34, 5 }
 0x100   : > { %2566 = vmatprep.mubr.bf16.mxu1 %v5733_v36  ;;  %v969_v27 = vsel %vm6395_vm2, %v964_v19, %v968_v11  ;;  %5165 = vmatpush3.bf16.msra.mxu1 %v5744_v25  ;;  %v1000_v36 = vshll.u32 %v4462_v29, 16  ;;  %v1010_v11 = vrot.slane %v1008_v2, 5  ;;  %v5753_v19 = vld [vmem:[%s6385_s28 + $0x54] sm:$0xff]  }
 0x101   : > { %v6563_v40 = vcombine.low %v969_v27, %v979_v33  ;;  %v993_v59 = vsel %vm6395_vm2, %v988_v51, %v992_v43  ;;  %5166 = vmatprep.subr.bf16.mxu1 %v5749_v54  ;;  %v5752_v25 = vld [vmem:[%s6385_s28 + $0x2d0] sm:$0xff]   ;;  %v4466_v27 = vld [vmem:[%s6385_s28 + $0x204] sm:$0xf]  ;;  %v1050_v51 = vrot.slane %v1048_v41, 5  ;;  %v5760_v54 = vld [vmem:[#allocation6 + $0x238] sm:$0xff]  }
 0x102   : > { %v1002_v48 = vrot.slane %v1000_v36, 5  ;;  %5439 = vmatpush3.bf16.msra.mxu0 %v5748_v49  ;;  %v1011_v15 = vor.u32 %v1010_v11, %v1007_v10  ;;  %v1029_v32 = vshrl.u32 %v4466_v27, 16  ;;  %v1032_v33 = vshll.u32 %v4466_v27, 16  ;;  %v4532_v11 = vld [vmem:[%s6385_s28 + $0x18] sm:$0xf] }
 0x103   : > { %v1288_v10 = vshll.u32 %v4531_v1, 16  ;;  %v1296_v27 = vshll.u32 %v4532_v11, 16 }
 0x104   : > { %v1003_v63 = vsel %vm6395_vm2, %v998_v55, %v1002_v48  ;;  %5167 = vmatpush3.bf16.msra.mxu1 %v5750_v58  ;;  %v1012_v21 = vrot.slane %v1011_v15, 4  ;;  %v1031_v43 = vrot.slane %v1029_v32, 4  ;;  %v1034_v44 = vrot.slane %v1032_v33, 5 }
 0x105   : > { %2470 = vmatmul.mubr.bf16.gmra.mrb[44].mxu0 %v5734_v57  ;;  %v5746_v57 = vld [vmem:[%s6385_s28 + $0x2c4] sm:$0xff]   ;;  %v6576_v5 = vcombine.low %v993_v59, %v1003_v63  ;;  %5168 = vmatprep.subr.bf16.mxu1 %v5755_v22  ;;  %v5758_v59 = vld [vmem:[%s6385_s28 + $0x2dc] sm:$0xff]   ;;  %v4530_v63 = vld [vmem:[%s6385_s28 + $0x10] sm:$0xf]  ;;  %v1290_v22 = vrot.slane %v1288_v10, 5 }
 0x106   : > { %2477 = vmatprep.mubr.bf16.mxu0 %v6563_v40  ;;  %v1035_v48 = vor.u32 %v1034_v44, %v1031_v43  ;;  %v1278_v6 = vshll.u32 %v4530_v63, 16  ;;  %v1282_v8 = vshrl.u32 %v4530_v63, 16  ;;  %v5766_v44 = vld [vmem:[#allocation6 + $0x380] sm:$0xff]  }
 0x107   : > { %2567 = vmatmul.mubr.bf16.gmra.mrb[44].mxu1 %v5735_v52  ;;  %v5747_v52 = vld [vmem:[%s6385_s28 + $0x48] sm:$0xff]  }
 0x108   : > { %2574 = vmatprep.mubr.bf16.mxu1 %v5739_v3  ;;  %v1014_v3 = vshll.u32 %v4464_v61, 16  ;;  %5169 = vmatpush3.bf16.msra.mxu1 %v5756_v26  ;;  %v1036_v55 = vrot.slane %v1035_v48, 4  ;;  %v4529_v61 = vld [vmem:[%s6385_s28 + $0xc] sm:$0xf]  ;;  %v5819_v26 = vld [vmem:[%s6385_s28 + $0xd8] sm:$0xff]  }
 0x109   : > { %v1269_v2 = vshrl.u32 %v4529_v61, 16 }
 0x10a   : > { %v1016_v12 = vrot.slane %v1014_v3, 5  ;;  %v1041_v62 = vsel %vm6395_vm2, %v1036_v55, %v1040_v45  ;;  %v1272_v3 = vshll.u32 %v4529_v61, 16  ;;  %v5764_v55 = vld [vmem:[#allocation6 + $0x2c0] sm:$0xff]   ;;  %v4537_v61 = vld [vmem:[%s6385_s28 + $0x2c] sm:$0x1] }
 0x10b   : > { %v1271_v15 = vrot.slane %v1269_v2, 4 }
 0x10c   : > { %v1021_v16 = vor.u32 %v1020_v13, %v1016_v12  ;;  %v1017_v29 = vsel %vm6395_vm2, %v1012_v21, %v1016_v12  ;;  %v5763_v12 = vld [vmem:[#allocation6 + $0x300] sm:$0xff]   ;;  %v1284_v21 = vrot.slane %v1282_v8, 4  ;;  %v5765_v8 = vld [vmem:[#allocation6 + $0x308] sm:$0xff]  }
 0x10d   : > { %2478 = vmatmul.mubr.bf16.gmra.mrb[48].mxu0 %v5740_v23 }
 0x10e   : > { %2485 = vmatprep.mubr.bf16.mxu0 %v6576_v5  ;;  %v1022_v23 = vrot.slane %v1021_v16, 4  ;;  %v1274_v16 = vrot.slane %v1272_v3, 5  ;;  %v4538_v3 = vld [vmem:[%s6385_s28 + $0x30] sm:$0xf] }
 0x10f   : > { %2575 = vmatmul.mubr.bf16.gmra.mrb[48].mxu1 %v5741_v20  ;;  %v5754_v20 = vld [vmem:[#allocation6 + $0x230] sm:$0xff]  }
 0x110   : > { %2582 = vmatprep.mubr.bf16.mxu1 %v5745_v39  ;;  %5440 = vmatprep.subr.bf16.mxu0 %v5754_v20  ;;  %v1027_v36 = vsel %vm6395_vm2, %v1022_v23, %v1026_v17  ;;  %v1042_v39 = vshrl.u32 %v4467_v28, 16  ;;  %v4533_v17 = vld [vmem:[%s6385_s28 + $0x1c] sm:$0xf]  ;;  %v1293_v23 = vshrl.u32 %v4532_v11, 16 }
 0x111   : > { %5441 = vmatpush3.bf16.msra.mxu0 %v5754_v20  ;;  %v6589_v42 = vcombine.low %v1017_v29, %v1027_v36  ;;  %v1280_v20 = vrot.slane %v1278_v6, 5  ;;  %v1302_v28 = vshll.u32 %v4533_v17, 16  ;;  %v1306_v29 = vshrl.u32 %v4533_v17, 16  ;;  %v5767_v17 = vld [vmem:[#allocation6 + $0x2c8] sm:$0xff]  }
 0x112   : > { %v1044_v46 = vrot.slane %v1042_v39, 4  ;;  %5442 = vmatprep.subr.bf16.mxu0 %v5760_v54  ;;  %v1295_v32 = vrot.slane %v1293_v23, 4 }
 0x113   : > { %v1285_v31 = vor.u32 %v1284_v21, %v1280_v20  ;;  %v1304_v36 = vrot.slane %v1302_v28, 5  ;;  %v1308_v39 = vrot.slane %v1306_v29, 4  ;;  %v1341_v21 = vshrl.u32 %v4538_v3, 16 }
 0x114   : > { %v1045_v49 = vor.u32 %v1044_v46, %v1040_v45 }
 0x115   : > { %2486 = vmatmul.mubr.bf16.gmra.mrb[52].mxu0 %v5746_v57  ;;  %v5761_v57 = vld [vmem:[#allocation6 + $0x2b8] sm:$0xff]   ;;  %v1286_v41 = vrot.slane %v1285_v31, 4  ;;  %v1309_v48 = vor.u32 %v1308_v39, %v1304_v36  ;;  %v1343_v29 = vrot.slane %v1341_v21, 4  ;;  %v4546_v21 = vld [vmem:[%s6385_s28 + $0x50] sm:$0x1] }
 0x116   : > { %2493 = vmatprep.mubr.bf16.mxu0 %v6589_v42  ;;  %v1046_v58 = vrot.slane %v1045_v49, 4  ;;  %5443 = vmatpush3.bf16.msra.mxu0 %v5760_v54 }
 0x117   : > { %2583 = vmatmul.mubr.bf16.gmra.mrb[52].mxu1 %v5747_v52  ;;  %v5759_v52 = vld [vmem:[%s6385_s28 + $0x60] sm:$0xff]   ;;  %5170 = vmatprep.subr.bf16.mxu1 %v5761_v57  ;;  %v1291_v49 = vsel %vm6395_vm2, %v1286_v41, %v1290_v22  ;;  %v1310_v54 = vrot.slane %v1309_v48, 4  ;;  %v1344_v22 = vshll.u32 %v4538_v3, 16  ;;  %v5822_v48 = vld [vmem:[%s6385_s28 + $0xc] sm:$0xff]  }
 0x118   : > { %2590 = vmatprep.mubr.bf16.mxu1 %v5751_v4  ;;  %v1051_v4 = vsel %vm6395_vm2, %v1046_v58, %v1050_v51  ;;  %5171 = vmatpush3.bf16.msra.mxu1 %v5762_v60  ;;  %v5768_v57 = vld [vmem:[#allocation6 + $0x340] sm:$0xff]   ;;  %v4536_v60 = vld [vmem:[%s6385_s28 + $0x28] sm:$0xf] }
 0x119   : > { %v6602_v13 = vcombine.low %v1041_v62, %v1051_v4  ;;  %5220 = vmatprep.subr.bf16.mxu0 %v5763_v12  ;;  %5284 = vmatprep.subr.bf16.mxu1 %v5766_v44  ;;  %v5820_v58 = vld [vmem:[%s6385_s28] sm:$0xff]   ;;  %v4539_v4 = vld [vmem:[%s6385_s28 + $0x34] sm:$0xf]  ;;  %v1326_v10 = vshll.u32 %v4536_v60, 16  ;;  %v1330_v11 = vshrl.u32 %v4536_v60, 16  ;;  %v1336_v12 = vshll.u32 %v4537_v61, 16 }
 0x11a   : > { %v1346_v31 = vrot.slane %v1344_v22, 5  ;;  %v5770_v44 = vld [vmem:[#allocation6 + $0x2d0] sm:$0xff]   ;;  %v4541_v61 = vld [vmem:[%s6385_s28 + $0x3c] sm:$0xf]  ;;  %v4542_v3 = vld [vmem:[%s6385_s28 + $0x40] sm:$0xf] }
 0x11b   : > { %v1328_v23 = vrot.slane %v1326_v10, 5  ;;  %v1368_v10 = vshll.u32 %v4541_v61, 16 }
 0x11c   : > { %v1347_v41 = vor.u32 %v1346_v31, %v1343_v29 }
 0x11d   : > { %2494 = vmatmul.mubr.bf16.gmra.mrb[56].mxu0 %v5752_v25  ;;  %v1275_v25 = vor.u32 %v1274_v16, %v1271_v15  ;;  %v5821_v15 = vld [vmem:[%s6385_s28 + $0xe4] sm:$0xff]   ;;  %v4540_v16 = vld [vmem:[%s6385_s28 + $0x38] sm:$0x1] }
 0x11e   : > { %2501 = vmatprep.mubr.bf16.mxu0 %v6602_v13 }
 0x11f   : > { %2591 = vmatmul.mubr.bf16.gmra.mrb[56].mxu1 %v5753_v19  ;;  %v4534_v19 = vld [vmem:[%s6385_s28 + $0x20] sm:$0x1]  ;;  %v1276_v34 = vrot.slane %v1275_v25, 4  ;;  %v1332_v25 = vrot.slane %v1330_v11, 4  ;;  %v1374_v11 = vshll.u32 %v4542_v3, 16 }
 0x120   : > { %2598 = vmatprep.mubr.bf16.mxu1 %v5757_v35  ;;  %v1312_v33 = vshll.u32 %v4534_v19, 16  ;;  %v1298_v35 = vrot.slane %v1296_v27, 5  ;;  %v1350_v27 = vshll.u32 %v4539_v4, 16 }
 0x121   : > { %v1281_v45 = vsel %vm6395_vm2, %v1276_v34, %v1280_v20  ;;  %v1333_v34 = vor.u32 %v1332_v25, %v1328_v23  ;;  %v1370_v25 = vrot.slane %v1368_v10, 5  ;;  %v4548_v10 = vld [vmem:[%s6385_s28 + $0x58] sm:$0xf] }
 0x122   : > { %v1314_v43 = vrot.slane %v1312_v33, 5  ;;  %v1299_v46 = vor.u32 %v1298_v35, %v1295_v32  ;;  %v6612_v51 = vcombine.low %v1281_v45, %v1291_v49  ;;  %v1354_v32 = vshrl.u32 %v4539_v4, 16  ;;  %v5769_v33 = vld [vmem:[#allocation6 + $0x310] sm:$0xff]   ;;  %v5771_v49 = vld [vmem:[#allocation6 + $0x318] sm:$0xff]   ;;  %v4543_v4 = vld [vmem:[%s6385_s28 + $0x44] sm:$0x1] }
 0x123   : > { %v1352_v35 = vrot.slane %v1350_v27, 5  ;;  %v1334_v45 = vrot.slane %v1333_v34, 4 }
 0x124   : > { %v1315_v63 = vsel %vm6395_vm2, %v1310_v54, %v1314_v43  ;;  %v1356_v43 = vrot.slane %v1354_v32, 4 }
 0x125   : > { %2502 = vmatmul.mubr.bf16.gmra.mrb[60].mxu0 %v5758_v59  ;;  %v4535_v59 = vld [vmem:[%s6385_s28 + $0x24] sm:$0xf] }
 0x126   : > { %5444 = vmatprep.mubr.bf16.mxu0 %v6612_v51  ;;  %v1317_v1 = vshrl.u32 %v4535_v59, 16  ;;  %v1320_v2 = vshll.u32 %v4535_v59, 16  ;;  %v5823_v59 = vld [vmem:[%s6385_s28 + $0xf0] sm:$0xff]  }
 0x127   : > { %2599 = vmatmul.mubr.bf16.gmra.mrb[60].mxu1 %v5759_v52  ;;  %v1300_v52 = vrot.slane %v1299_v46, 4 }
 0x128   : > { %3525 = vmatprep.mubr.bf16.mxu1 %v5819_v26  ;;  %v1319_v19 = vrot.slane %v1317_v1, 4  ;;  %v1322_v20 = vrot.slane %v1320_v2, 5  ;;  %v1338_v26 = vrot.slane %v1336_v12, 5  ;;  %v5773_v2 = vld [vmem:[#allocation6 + $0x2d8] sm:$0xff]   ;;  %v1378_v12 = vshrl.u32 %v4542_v3, 16  ;;  %v5780_v3 = vld [vmem:[#allocation6 + $0x350] sm:$0xff]  }
 0x129   : > { %v1305_v62 = vsel %vm6395_vm2, %v1300_v52, %v1304_v36  ;;  %v1360_v36 = vshll.u32 %v4540_v16, 16  ;;  %v5772_v52 = vld [vmem:[#allocation6 + $0x388] sm:$0xff]  }
 0x12a   : > { %v6625_v6 = vcombine.low %v1305_v62, %v1315_v63  ;;  %v1323_v28 = vor.u32 %v1322_v20, %v1319_v19  ;;  %v1339_v60 = vsel %vm6395_vm2, %v1334_v45, %v1338_v26  ;;  %v4544_v16 = vld [vmem:[%s6385_s28 + $0x48] sm:$0xf]  ;;  %v4545_v20 = vld [vmem:[%s6385_s28 + $0x4c] sm:$0xf]  ;;  %v1376_v26 = vrot.slane %v1374_v11, 5  ;;  %v5776_v45 = vld [vmem:[#allocation6 + $0x2e0] sm:$0xff]  }
 0x12b   : > { %v1362_v46 = vrot.slane %v1360_v36, 5  ;;  %v1389_v22 = vshrl.u32 %v4544_v16, 16  ;;  %v1380_v27 = vrot.slane %v1378_v12, 4  ;;  %v1392_v32 = vshll.u32 %v4544_v16, 16  ;;  %v5781_v11 = vld [vmem:[#allocation6 + $0x330] sm:$0xff]  }
 0x12c   : > { %v1324_v39 = vrot.slane %v1323_v28, 4  ;;  %v5775_v28 = vld [vmem:[#allocation6 + $0x320] sm:$0xff]   ;;  %v1402_v36 = vshrl.u32 %v4545_v20, 16 }
 0x12d   : > { %5445 = vmatmul.mubr.bf16.vlgmr.msra.gmra.mrb[64].mxu0 %v6625_v6  ;;  %v1391_v31 = vrot.slane %v1389_v22, 4  ;;  %v1426_v22 = vshrl.u32 %v4548_v10, 16 }
 0x12e   : > { %5221 = vmatpush3.bf16.msra.mxu0 %v5764_v55  ;;  %v1329_v54 = vsel %vm6395_vm2, %v1324_v39, %v1328_v23  ;;  %v1348_v55 = vrot.slane %v1347_v41, 4  ;;  %v1408_v39 = vshll.u32 %v4546_v21, 16  ;;  %v5824_v41 = vld [vmem:[%s6385_s28 + $0x18] sm:$0xff]  }
 0x12f   : > { %3526 = vmatmul.mubr.bf16.vlgmr.msra.gmra.mrb[64].mxu1 %v5820_v58  ;;  %5222 = vmatprep.subr.bf16.mxu0 %v5765_v8  ;;  %v5774_v58 = vld [vmem:[#allocation6 + $0x348] sm:$0xff]   ;;  %v6637_v62 = vcombine.low %v1329_v54, %v1339_v60  ;;  %v1365_v8 = vshrl.u32 %v4541_v61, 16 }
 0x130   : > { %5285 = vmatpush3.bf16.msra.mxu1 %v5768_v57  ;;  %3533 = vmatprep.mubr.bf16.mxu1 %v5821_v15  ;;  %v1357_v57 = vor.u32 %v1356_v43, %v1352_v35  ;;  %v1353_v63 = vsel %vm6395_vm2, %v1348_v55, %v1352_v35  ;;  %v1384_v15 = vshll.u32 %v4543_v4, 16  ;;  %v1381_v35 = vor.u32 %v1380_v27, %v1376_v26  ;;  %v5777_v54 = vld [vmem:[#allocation6 + $0x328] sm:$0xff]   ;;  %v4551_v27 = vld [vmem:[%s6385_s28 + $0x64] sm:$0xf] }
 0x131   : > { %5286 = vmatprep.subr.bf16.mxu1 %v5772_v52  ;;  %5448 = vmatprep.mubr.bf16.mxu0 %v6637_v62  ;;  %v1367_v19 = vrot.slane %v1365_v8, 4  ;;  %v1394_v43 = vrot.slane %v1392_v32, 5  ;;  %v1404_v52 = vrot.slane %v1402_v36, 4  ;;  %v1410_v61 = vrot.slane %v1408_v39, 5  ;;  %v4547_v8 = vld [vmem:[%s6385_s28 + $0x54] sm:$0xf] }
 0x132   : > { %5223 = vmatpush3.bf16.msra.mxu0 %v5767_v17  ;;  %v1358_v1 = vrot.slane %v1357_v57, 4  ;;  %v1386_v29 = vrot.slane %v1384_v15, 5  ;;  %v5778_v57 = vld [vmem:[#allocation6 + $0x390] sm:$0xff]   ;;  %v4549_v15 = vld [vmem:[%s6385_s28 + $0x5c] sm:$0x1]  ;;  %v1413_v16 = vshrl.u32 %v4547_v8, 16 }
 0x133   : > { %5224 = vmatprep.subr.bf16.mxu0 %v5769_v33  ;;  %v1398_v33 = vshll.u32 %v4545_v20, 16  ;;  %v1371_v34 = vor.u32 %v1370_v25, %v1367_v19  ;;  %v1395_v55 = vor.u32 %v1394_v43, %v1391_v31  ;;  %v1422_v19 = vshll.u32 %v4548_v10, 16  ;;  %v5782_v20 = vld [vmem:[#allocation6 + $0x2f0] sm:$0xff]   ;;  %v5827_v36 = vld [vmem:[%s6385_s28 + $0x108] sm:$0xff]  }
 0x134   : > { %5287 = vmatpush3.bf16.msra.mxu1 %v5774_v58  ;;  %v1363_v17 = vsel %vm6395_vm2, %v1358_v1, %v1362_v46  ;;  %v5825_v46 = vld [vmem:[%s6385_s28 + $0xfc] sm:$0xff]   ;;  %v1432_v25 = vshll.u32 %v4549_v15, 16  ;;  %v1415_v31 = vrot.slane %v1413_v16, 4  ;;  %v1428_v39 = vrot.slane %v1426_v22, 4  ;;  %v5828_v15 = vld [vmem:[%s6385_s28 + $0x30] sm:$0xff]  }
 0x135   : > { %v6649_v23 = vcombine.low %v1353_v63, %v1363_v17  ;;  %v5779_v63 = vld [vmem:[#allocation6 + $0x2e8] sm:$0xff]   ;;  %5288 = vmatprep.subr.bf16.mxu1 %v5778_v57  ;;  %v1416_v17 = vshll.u32 %v4547_v8, 16 }
 0x136   : > { %5225 = vmatpush3.bf16.msra.mxu0 %v5770_v44  ;;  %v1400_v44 = vrot.slane %v1398_v33, 5  ;;  %v1424_v33 = vrot.slane %v1422_v19, 5  ;;  %v5787_v19 = vld [vmem:[#allocation6 + $0x400] sm:$0xff]  }
 0x137   : > { %3534 = vmatmul.mubr.bf16.gmra.mrb[68].mxu1 %v5822_v48  ;;  %5226 = vmatprep.subr.bf16.mxu0 %v5771_v49  ;;  %v1372_v48 = vrot.slane %v1371_v34, 4  ;;  %v1382_v49 = vrot.slane %v1381_v35, 4  ;;  %v1418_v32 = vrot.slane %v1416_v17, 5  ;;  %v4552_v34 = vld [vmem:[%s6385_s28 + $0x68] sm:$0x1]  ;;  %v5783_v35 = vld [vmem:[#allocation6 + $0x338] sm:$0xff]  }
 0x138   : > { %3541 = vmatprep.mubr.bf16.mxu1 %v5823_v59  ;;  %5449 = vmatmul.mubr.bf16.gmra.mrb[68].mxu0 %v6649_v23  ;;  %v1405_v60 = vor.u32 %v1404_v52, %v1400_v44  ;;  %v5784_v52 = vld [vmem:[#allocation6 + $0x398] sm:$0xff]  }
 0x139   : > { %v1377_v58 = vsel %vm6395_vm2, %v1372_v48, %v1376_v26  ;;  %v1387_v59 = vsel %vm6395_vm2, %v1382_v49, %v1386_v29  ;;  %5289 = vmatpush3.bf16.msra.mxu1 %v5780_v3  ;;  %v4550_v26 = vld [vmem:[%s6385_s28 + $0x60] sm:$0xf]  ;;  %v1450_v48 = vshrl.u32 %v4551_v27, 16  ;;  %v1456_v49 = vshll.u32 %v4552_v34, 16  ;;  %v5785_v3 = vld [vmem:[#allocation6 + $0x2f8] sm:$0xff]  }
 0x13a   : > { %5227 = vmatpush3.bf16.msra.mxu0 %v5773_v2  ;;  %v6658_v1 = vcombine.low %v1377_v58, %v1387_v59  ;;  %v1396_v2 = vrot.slane %v1395_v55, 4  ;;  %v1406_v4 = vrot.slane %v1405_v60, 4  ;;  %v1437_v43 = vshrl.u32 %v4550_v26, 16  ;;  %5290 = vmatprep.subr.bf16.mxu1 %v5784_v52  ;;  %v5788_v34 = vld [vmem:[#allocation6 + $0x3c0] sm:$0xff]   ;;  %v5796_v52 = vld [vmem:[#allocation6 + $0x3d0] sm:$0xff]  }
 0x13b   : > { %5228 = vmatprep.subr.bf16.mxu0 %v5775_v28  ;;  %v5826_v28 = vld [vmem:[%s6385_s28 + $0x24] sm:$0xff]   ;;  %v1452_v60 = vrot.slane %v1450_v48, 4  ;;  %v5802_v48 = vld [vmem:[#allocation6 + $0x378] sm:$0xff]  }
 0x13c   : > { %5452 = vmatprep.mubr.bf16.mxu0 %v6658_v1  ;;  %v1401_v12 = vsel %vm6395_vm2, %v1396_v2, %v1400_v44  ;;  %v1411_v21 = vsel %vm6395_vm2, %v1406_v4, %v1410_v61  ;;  %v1440_v44 = vshll.u32 %v4550_v26, 16  ;;  %v1439_v55 = vrot.slane %v1437_v43, 4  ;;  %v5795_v43 = vld [vmem:[#allocation6 + $0x410] sm:$0xff]  }
 0x13d   : > { %v6671_v29 = vcombine.low %v1401_v12, %v1411_v21  ;;  %v1458_v61 = vrot.slane %v1456_v49, 5  ;;  %v5786_v12 = vld [vmem:[#allocation6 + $0x358] sm:$0xff]   ;;  %v5835_v49 = vld [vmem:[%s6385_s28 + $0x12c] sm:$0xff]  }
 0x13e   : > { %5229 = vmatpush3.bf16.msra.mxu0 %v5776_v45  ;;  %v1419_v45 = vor.u32 %v1418_v32, %v1415_v31  ;;  %v1442_v57 = vrot.slane %v1440_v44, 5  ;;  %5291 = vmatpush3.bf16.msra.mxu1 %v5786_v12  ;;  %v5793_v31 = vld [vmem:[#allocation6 + $0x3a8] sm:$0xff]   ;;  %v5831_v32 = vld [vmem:[%s6385_s28 + $0x3c] sm:$0xff]  }
 0x13f   : > { %3542 = vmatmul.mubr.bf16.gmra.mrb[72].mxu1 %v5824_v41  ;;  %5230 = vmatprep.subr.bf16.mxu0 %v5777_v54  ;;  %v1434_v41 = vrot.slane %v1432_v25, 5  ;;  %v1429_v54 = vor.u32 %v1428_v39, %v1424_v33  ;;  %v5789_v25 = vld [vmem:[#allocation6 + $0x3a0] sm:$0xff]   ;;  %v5798_v39 = vld [vmem:[#allocation6 + $0x370] sm:$0xff]  }
 0x140   : > { %3549 = vmatprep.mubr.bf16.mxu1 %v5825_v46  ;;  %5453 = vmatmul.mubr.bf16.gmra.mrb[72].mxu0 %v6671_v29  ;;  %v1446_v46 = vshll.u32 %v4551_v27, 16  ;;  %v1420_v58 = vrot.slane %v1419_v45, 4  ;;  %v1443_v2 = vor.u32 %v1442_v57, %v1439_v55  ;;  %v5790_v27 = vld [vmem:[#allocation6 + $0x360] sm:$0xff]   ;;  %v5801_v45 = vld [vmem:[#allocation6 + $0x3b8] sm:$0xff]   ;;  %v5836_v55 = vld [vmem:[%s6385_s28 + $0x1c8] sm:$0xff]  }
 0x141   : > { %5292 = vmatprep.subr.bf16.mxu1 %v5789_v25  ;;  %v5833_v44 = vld [vmem:[%s6385_s28 + $0x1bc] sm:$0xff]   ;;  %v5841_v25 = vld [vmem:[%s6385_s28 + $0x294] sm:$0xff]  }
 0x142   : > { %5231 = vmatpush3.bf16.msra.mxu0 %v5779_v63  ;;  %v1448_v59 = vrot.slane %v1446_v46, 5  ;;  %v1430_v63 = vrot.slane %v1429_v54, 4  ;;  %v1425_v4 = vsel %vm6395_vm2, %v1420_v58, %v1424_v33  ;;  %5293 = vmatpush3.bf16.msra.mxu1 %v5790_v27  ;;  %v5794_v33 = vld [vmem:[#allocation6 + $0x368] sm:$0xff]   ;;  %v5805_v54 = vld [vmem:[#allocation6 + $0x440] sm:$0xff]   ;;  %v5800_v57 = vld [vmem:[#allocation6 + $0x3d8] sm:$0xff]  }
 0x143   : > { %5232 = vmatprep.subr.bf16.mxu0 %v5781_v11  ;;  %v1444_v11 = vrot.slane %v1443_v2, 4  ;;  %5294 = vmatprep.subr.bf16.mxu1 %v5793_v31  ;;  %v5834_v46 = vld [vmem:[%s6385_s28 + $0x48] sm:$0xff]   ;;  %v5837_v58 = vld [vmem:[%s6385_s28 + $0x54] sm:$0xff]  }
 0x144   : > { %v1453_v8 = vor.u32 %v1452_v60, %v1448_v59  ;;  %v1435_v10 = vsel %vm6395_vm2, %v1430_v63, %v1434_v41  ;;  %v5792_v41 = vld [vmem:[#allocation6 + $0x3c8] sm:$0xff]   ;;  %v5804_v60 = vld [vmem:[#allocation6 + $0x3e0] sm:$0xff]   ;;  %v5838_v2 = vld [vmem:[%s6385_s28 + $0x1d4] sm:$0xff]  }
 0x145   : > { %v6681_v16 = vcombine.low %v1425_v4, %v1435_v10  ;;  %v1449_v21 = vsel %vm6395_vm2, %v1444_v11, %v1448_v59  ;;  %v5803_v59 = vld [vmem:[#allocation6 + $0x420] sm:$0xff]   ;;  %v5808_v63 = vld [vmem:[#allocation6 + $0x448] sm:$0xff]   ;;  %v5809_v10 = vld [vmem:[#allocation6 + $0x430] sm:$0xff]  }
 0x146   : > { %5233 = vmatpush3.bf16.msra.mxu0 %v5782_v20  ;;  %v1454_v17 = vrot.slane %v1453_v8, 4  ;;  %v5829_v20 = vld [vmem:[%s6385_s28 + $0x114] sm:$0xff]   ;;  %5295 = vmatpush3.bf16.msra.mxu1 %v5794_v33  ;;  %v5839_v8 = vld [vmem:[%s6385_s28 + $0x288] sm:$0xff]   ;;  %v5815_v33 = vld [vmem:[#allocation6 + $0x460] sm:$0xff]  }
 0x147   : > { %3550 = vmatmul.mubr.bf16.gmra.mrb[76].mxu1 %v5826_v28  ;;  %5234 = vmatprep.subr.bf16.mxu0 %v5783_v35  ;;  %v5830_v28 = vld [vmem:[%s6385_s28 + $0x1b0] sm:$0xff]   ;;  %v5791_v35 = vld [vmem:[#allocation6 + $0x408] sm:$0xff]  }
 0x148   : > { %3557 = vmatprep.mubr.bf16.mxu1 %v5827_v36  ;;  %5456 = vmatprep.mubr.bf16.mxu0 %v6681_v16  ;;  %v1459_v22 = vsel %vm6395_vm2, %v1454_v17, %v1458_v61  ;;  %v5797_v36 = vld [vmem:[#allocation6 + $0x3b0] sm:$0xff]   ;;  %v5806_v61 = vld [vmem:[#allocation6 + $0x428] sm:$0xff]  }
 0x149   : > { %v6689_v26 = vcombine.low %v1449_v21, %v1459_v22  ;;  %5296 = vmatprep.subr.bf16.mxu1 %v5797_v36  ;;  %v5810_v17 = vld [vmem:[#allocation6 + $0x3f0] sm:$0xff]   ;;  %v5840_v21 = vld [vmem:[%s6385_s28 + $0x1e0] sm:$0xff]   ;;  %v5813_v22 = vld [vmem:[#allocation6 + $0x3f8] sm:$0xff]  }
 0x14a   : > { %5235 = vmatpush3.bf16.msra.mxu0 %v5785_v3  ;;  %5297 = vmatpush3.bf16.msra.mxu1 %v5798_v39  ;;  %v5807_v3 = vld [vmem:[#allocation6 + $0x3e8] sm:$0xff]  }
 0x14b   : > { %5348 = vmatprep.subr.bf16.mxu0 %v5787_v19  ;;  %5457 = vmatmul.mubr.bf16.gmra.mrb[76].mxu0 %v6689_v26  ;;  %v5812_v19 = vld [vmem:[#allocation6 + $0x438] sm:$0xff]  }
 0x14c   : > { %3622 = vmatprep.mubr.bf16.mxu0 %v5830_v28  ;;  %5298 = vmatprep.subr.bf16.mxu1 %v5801_v45 }
 0x14e   : > { %5299 = vmatpush3.bf16.msra.mxu1 %v5802_v48 }
 0x14f   : > { %3558 = vmatmul.mubr.bf16.gmra.mrb[80].mxu1 %v5828_v15  ;;  %5460 = vmatprep.subr.bf16.mxu1 %v5805_v54 }
 0x150   : > { %3565 = vmatprep.mubr.bf16.mxu1 %v5829_v20  ;;  %v5814_v20 = vld [vmem:[#allocation6 + $0x458] sm:$0xff]  }
 0x153   : > { %3623 = vmatmul.mubr.bf16.vlgmr.msra.gmra.mrb[80].mxu0 %v6408_v0  ;;  %v5799_v0 = vld [vmem:[#allocation6 + $0x418] sm:$0xff]  }
 0x154   : > { %5349 = vmatpush3.bf16.msra.mxu0 %v5788_v34  ;;  %3630 = vmatprep.mubr.bf16.mxu0 %v5833_v44  ;;  %v5842_v44 = vld [vmem:[%s6385_s28 + $0x1ec] sm:$0xff]  }
 0x155   : > { %5350 = vmatprep.subr.bf16.mxu0 %v5791_v35 }
 0x157   : > { %3566 = vmatmul.mubr.bf16.gmra.mrb[84].mxu1 %v5831_v32 }
 0x158   : > { %3573 = vmatprep.mubr.bf16.mxu1 %v5832_v53  ;;  %5351 = vmatpush3.bf16.msra.mxu0 %v5792_v41 }
 0x159   : > { %5352 = vmatprep.subr.bf16.mxu0 %v5795_v43 }
 0x15b   : > { %3631 = vmatmul.mubr.bf16.gmra.mrb[84].mxu0 %v6422_v30 }
 0x15c   : > { %3638 = vmatprep.mubr.bf16.mxu0 %v5836_v55  ;;  %5353 = vmatpush3.bf16.msra.mxu0 %v5796_v52  ;;  %v5817_v52 = vld [vmem:[#allocation6 + $0x470] sm:$0xff]  }
 0x15d   : > { %5354 = vmatprep.subr.bf16.mxu0 %v5799_v0 }
 0x15f   : > { %3574 = vmatmul.mubr.bf16.gmra.mrb[88].mxu1 %v5834_v46  ;;  %v5843_v46 = vld [vmem:[%s6385_s28 + $0x2a0] sm:$0xff]  }
 0x160   : > { %3581 = vmatprep.mubr.bf16.mxu1 %v5835_v49  ;;  %5355 = vmatpush3.bf16.msra.mxu0 %v5800_v57 }
 0x161   : > { %5356 = vmatprep.subr.bf16.mxu0 %v5803_v59 }
 0x163   : > { %3639 = vmatmul.mubr.bf16.gmra.mrb[88].mxu0 %v6435_v56  ;;  %v5811_v56 = vld [vmem:[#allocation6 + $0x450] sm:$0xff]  }
 0x164   : > { %3646 = vmatprep.mubr.bf16.mxu0 %v5838_v2  ;;  %5357 = vmatpush3.bf16.msra.mxu0 %v5804_v60 }
 0x165   : > { %5358 = vmatprep.subr.bf16.mxu0 %v5806_v61 }
 0x167   : > { %3582 = vmatmul.mubr.bf16.gmra.mrb[92].mxu1 %v5837_v58 }
 0x168   : > { %3719 = vmatprep.mubr.bf16.mxu1 %v6510_v38  ;;  %5359 = vmatpush3.bf16.msra.mxu0 %v5807_v3  ;;  %v5845_v3 = vld [vmem:[%s6385_s28 + $0x2ac] sm:$0xff]  }
 0x169   : > { %5360 = vmatprep.subr.bf16.mxu0 %v5809_v10 }
 0x16b   : > { %3647 = vmatmul.mubr.bf16.gmra.mrb[92].mxu0 %v6448_v24 }
 0x16c   : > { %3654 = vmatprep.mubr.bf16.mxu0 %v5840_v21  ;;  %5361 = vmatpush3.bf16.msra.mxu0 %v5810_v17  ;;  %v5847_v21 = vld [vmem:[%s6385_s28 + $0x2b8] sm:$0xff]  }
 0x16d   : > { %5362 = vmatprep.subr.bf16.mxu0 %v5812_v19 }
 0x16f   : > { %3720 = vmatmul.mubr.bf16.vlgmr.msra.gmra.mrb[96].mxu1 %v5839_v8 }
 0x170   : > { %5461 = vmatpush3.bf16.msra.mxu1 %v5805_v54  ;;  %3727 = vmatprep.mubr.bf16.mxu1 %v6524_v9 }
 0x171   : > { %5462 = vmatprep.subr.bf16.mxu1 %v5808_v63  ;;  %5363 = vmatpush3.bf16.msra.mxu0 %v5813_v22 }
 0x173   : > { %3655 = vmatmul.mubr.bf16.gmra.mrb[96].mxu0 %v6461_v50 }
 0x174   : > { %5463 = vmatpush3.bf16.msra.mxu1 %v5808_v63  ;;  %3662 = vmatprep.mubr.bf16.mxu0 %v5842_v44  ;;  %v5844_v63 = vld [vmem:[%s6385_s28 + $0x1f8] sm:$0xff]  }
 0x175   : > { %5464 = vmatprep.subr.bf16.mxu1 %v5811_v56 }
 0x177   : > { %3728 = vmatmul.mubr.bf16.gmra.mrb[100].mxu1 %v5841_v25 }
 0x178   : > { %3735 = vmatprep.mubr.bf16.mxu1 %v6537_v37  ;;  %5465 = vmatpush3.bf16.msra.mxu1 %v5811_v56  ;;  %v5816_v37 = vld [vmem:[#allocation6 + $0x468] sm:$0xff]  }
 0x179   : > { %5466 = vmatprep.subr.bf16.mxu1 %v5814_v20 }
 0x17b   : > { %3663 = vmatmul.mubr.bf16.gmra.mrb[100].mxu0 %v6474_v14 }
 0x17c   : > { %5467 = vmatpush3.bf16.msra.mxu1 %v5814_v20  ;;  %3670 = vmatprep.mubr.bf16.mxu0 %v5844_v63  ;;  %v5846_v20 = vld [vmem:[%s6385_s28 + $0x204] sm:$0xff]  }
 0x17d   : > { %5468 = vmatprep.subr.bf16.mxu1 %v5815_v33 }
 0x17f   : > { %3736 = vmatmul.mubr.bf16.gmra.mrb[104].mxu1 %v5843_v46  ;;  %v5850_v46 = vld [vmem:[%s6385_s28 + $0xc] sm:$0xff]  }
 0x180   : > { %v4900_v30 = vpop.f32.mrb[0].mxu0  ;;  %3743 = vmatprep.mubr.bf16.mxu1 %v6550_v7  ;;  %5469 = vmatpush3.bf16.msra.mxu1 %v5815_v33  ;;  %v5818_v7 = vld [vmem:[#allocation6 + $0x478] sm:$0xff]  }
 0x181   : > { %v4901_v4 = vpop.f32.mrb[1].mxu0  ;;  %5470 = vmatprep.subr.bf16.mxu1 %v5816_v37 }
 0x182   : > { %v4902_v11 = vadd.f32 %v4901_v4, %v4900_v30  ;;  %v4903_v38 = vpop.f32.mrb[2].mxu0  ;;  %v4964_v27 = vpop.f32.mrb[0].mxu1 }
 0x183   : > { %v4904_v12 = vpop.f32.mrb[3].mxu0  ;;  %v4965_v31 = vpop.f32.mrb[1].mxu1  ;;  %3671 = vmatmul.mubr.bf16.gmra.mrb[104].mxu0 %v6487_v47 }
 0x184   : > { %v4905_v15 = vadd.f32 %v4904_v12, %v4903_v38  ;;  %v4966_v34 = vadd.f32 %v4965_v31, %v4964_v27  ;;  %v4967_v53 = vpop.f32.mrb[2].mxu1  ;;  %5471 = vmatpush3.bf16.msra.mxu1 %v5816_v37  ;;  %3678 = vmatprep.mubr.bf16.mxu0 %v5846_v20 }
 0x185   : > { %v4968_v36 = vpop.f32.mrb[3].mxu1  ;;  %5472 = vmatprep.subr.bf16.mxu1 %v5817_v52 }
 0x186   : > { %v6711_v41 = vadd.f32 %v4966_v34, %v4902_v11  ;;  %v4969_v43 = vadd.f32 %v4968_v36, %v4967_v53  ;;  %v5849_v53 = vld [vmem:[%s6385_s28 + $0x2c4] sm:$0xff]  }
 0x187   : > { %3744 = vmatmul.mubr.bf16.gmra.mrb[108].mxu1 %v5845_v3 }
 0x188   : > { %v4906_v9 = vpop.f32.mrb[4].mxu0  ;;  %v6715_v45 = vadd.f32 %v4969_v43, %v4905_v15  ;;  %3751 = vmatprep.mubr.bf16.mxu1 %v6563_v40  ;;  %5473 = vmatpush3.bf16.msra.mxu1 %v5817_v52 }
 0x189   : > { %v4907_v28 = vpop.f32.mrb[5].mxu0  ;;  %5474 = vmatprep.subr.bf16.mxu1 %v5818_v7 }
 0x18a   : > { %v4908_v32 = vadd.f32 %v4907_v28, %v4906_v9  ;;  %v4909_v24 = vpop.f32.mrb[6].mxu0  ;;  %v4970_v54 = vpop.f32.mrb[4].mxu1 }
 0x18b   : > { %v4910_v35 = vpop.f32.mrb[7].mxu0  ;;  %v4971_v55 = vpop.f32.mrb[5].mxu1  ;;  %3679 = vmatmul.mubr.bf16.gmra.mrb[108].mxu0 %v6498_v18 }
 0x18c   : > { %v4911_v39 = vadd.f32 %v4910_v35, %v4909_v24  ;;  %v4972_v58 = vadd.f32 %v4971_v55, %v4970_v54  ;;  %v4973_v59 = vpop.f32.mrb[6].mxu1  ;;  %5475 = vmatpush3.bf16.msra.mxu1 %v5818_v7  ;;  %v5848_v24 = vld [vmem:[%s6385_s28 + $0xe4] sm:$0xff]  }
 0x18d   : > { %v4974_v61 = vpop.f32.mrb[7].mxu1  ;;  %3816 = vmatprep.mubr.bf16.mxu0 %v5848_v24 }
 0x18e   : > { %v6721_v30 = vadd.f32 %v4972_v58, %v4908_v32  ;;  %v4975_v2 = vadd.f32 %v4974_v61, %v4973_v59 }
 0x18f   : > { %3752 = vmatmul.mubr.bf16.gmra.mrb[112].mxu1 %v5847_v21 }
 0x190   : > { %v4912_v48 = vpop.f32.mrb[8].mxu0  ;;  %v6724_v4 = vadd.f32 %v4975_v2, %v4911_v39  ;;  %3759 = vmatprep.mubr.bf16.mxu1 %v6576_v5  ;;  %v5853_v2 = vld [vmem:[%s6385_s28 + $0x18] sm:$0xff]  }
 0x191   : > { %v4913_v49 = vpop.f32.mrb[9].mxu0 }
 0x192   : > { %v4914_v0 = vadd.f32 %v4913_v49, %v4912_v48  ;;  %v4915_v50 = vpop.f32.mrb[10].mxu0  ;;  %v4976_v10 = vpop.f32.mrb[8].mxu1  ;;  %v5851_v49 = vld [vmem:[%s6385_s28 + $0xf0] sm:$0xff]  }
 0x193   : > { %v4916_v57 = vpop.f32.mrb[11].mxu0  ;;  %v4977_v12 = vpop.f32.mrb[9].mxu1  ;;  %3817 = vmatmul.mubr.bf16.vlgmr.msra.gmra.mrb[112].mxu0 %v5850_v46 }
 0x194   : > { %v4917_v60 = vadd.f32 %v4916_v57, %v4915_v50  ;;  %v4978_v15 = vadd.f32 %v4977_v12, %v4976_v10  ;;  %v4979_v17 = vpop.f32.mrb[10].mxu1  ;;  %3824 = vmatprep.mubr.bf16.mxu0 %v5851_v49  ;;  %v5852_v50 = vld [vmem:[%s6385_s28 + $0x2d0] sm:$0xff]   ;;  %v5855_v10 = vld [vmem:[%s6385_s28 + $0x2dc] sm:$0xff]  }
 0x195   : > { %v4980_v40 = vpop.f32.mrb[11].mxu1 }
 0x196   : > { %v6730_v22 = vadd.f32 %v4978_v15, %v4914_v0  ;;  %v4981_v25 = vadd.f32 %v4980_v40, %v4979_v17 }
 0x197   : > { %3760 = vmatmul.mubr.bf16.gmra.mrb[116].mxu1 %v5849_v53 }
 0x198   : > { %v4918_v8 = vpop.f32.mrb[12].mxu0  ;;  %v6733_v9 = vadd.f32 %v4981_v25, %v4917_v60  ;;  %3767 = vmatprep.mubr.bf16.mxu1 %v6589_v42  ;;  %v5856_v25 = vld [vmem:[%s6385_s28 + $0x24] sm:$0xff]  }
 0x199   : > { %v4919_v14 = vpop.f32.mrb[13].mxu0 }
 0x19a   : > { %v4920_v11 = vadd.f32 %v4919_v14, %v4918_v8  ;;  %v4921_v38 = vpop.f32.mrb[14].mxu0  ;;  %v4982_v47 = vpop.f32.mrb[12].mxu1  ;;  %v5854_v8 = vld [vmem:[%s6385_s28 + $0xfc] sm:$0xff]  }
 0x19b   : > { %v4922_v56 = vpop.f32.mrb[15].mxu0  ;;  %v4983_v33 = vpop.f32.mrb[13].mxu1  ;;  %3825 = vmatmul.mubr.bf16.gmra.mrb[116].mxu0 %v5853_v2 }
 0x19c   : > { %v4923_v19 = vadd.f32 %v4922_v56, %v4921_v38  ;;  %v4984_v35 = vadd.f32 %v4983_v33, %v4982_v47  ;;  %v4985_v36 = vpop.f32.mrb[14].mxu1  ;;  %3832 = vmatprep.mubr.bf16.mxu0 %v5854_v8 }
 0x19d   : > { %v4986_v39 = vpop.f32.mrb[15].mxu1 }
 0x19e   : > { %v6739_v43 = vadd.f32 %v4984_v35, %v4920_v11  ;;  %v4987_v18 = vadd.f32 %v4986_v39, %v4985_v36  ;;  %v5858_v39 = vld [vmem:[%s6385_s28 + $0x30] sm:$0xff]  }
 0x19f   : > { %3768 = vmatmul.mubr.bf16.gmra.mrb[120].mxu1 %v5852_v50  ;;  %v5861_v50 = vld [vmem:[%s6385_s28 + $0x120] sm:$0xff]  }
 0x1a0   : > { %v4924_v27 = vpop.f32.mrb[16].mxu0  ;;  %v6741_v37 = vadd.f32 %v4987_v18, %v4923_v19  ;;  %3775 = vmatprep.mubr.bf16.mxu1 %v6602_v13 }
 0x1a1   : > { %v4925_v28 = vpop.f32.mrb[17].mxu0 }
 0x1a2   : > { %v4926_v31 = vadd.f32 %v4925_v28, %v4924_v27  ;;  %v4927_v32 = vpop.f32.mrb[18].mxu0  ;;  %v4988_v52 = vpop.f32.mrb[16].mxu1  ;;  %v5857_v28 = vld [vmem:[%s6385_s28 + $0x108] sm:$0xff]  }
 0x1a3   : > { %v4928_v34 = vpop.f32.mrb[19].mxu0  ;;  %v4989_v55 = vpop.f32.mrb[17].mxu1  ;;  %3833 = vmatmul.mubr.bf16.gmra.mrb[120].mxu0 %v5856_v25 }
 0x1a4   : > { %v4929_v5 = vadd.f32 %v4928_v34, %v4927_v32  ;;  %v4990_v57 = vadd.f32 %v4989_v55, %v4988_v52  ;;  %v4991_v58 = vpop.f32.mrb[18].mxu1  ;;  %3840 = vmatprep.mubr.bf16.mxu0 %v5857_v28 }
 0x1a5   : > { %v4992_v60 = vpop.f32.mrb[19].mxu1 }
 0x1a6   : > { %v6747_v61 = vadd.f32 %v4990_v57, %v4926_v31  ;;  %v4993_v7 = vadd.f32 %v4992_v60, %v4991_v58 }
 0x1a7   : > { %3776 = vmatmul.mubr.bf16.gmra.mrb[124].mxu1 %v5855_v10 }
 0x1a8   : > { %v4930_v44 = vpop.f32.mrb[20].mxu0  ;;  %v6749_v63 = vadd.f32 %v4993_v7, %v4929_v5  ;;  %5476 = vmatprep.mubr.bf16.mxu1 %v6612_v51 }
 0x1a9   : > { %v4931_v48 = vpop.f32.mrb[21].mxu0 }
 0x1aa   : > { %v4932_v54 = vadd.f32 %v4931_v48, %v4930_v44  ;;  %v4933_v0 = vpop.f32.mrb[22].mxu0  ;;  %v4994_v11 = vpop.f32.mrb[20].mxu1  ;;  %v5859_v44 = vld [vmem:[%s6385_s28 + $0x114] sm:$0xff]  }
 0x1ab   : > { %v4934_v42 = vpop.f32.mrb[23].mxu0  ;;  %v4995_v12 = vpop.f32.mrb[21].mxu1  ;;  %3841 = vmatmul.mubr.bf16.gmra.mrb[124].mxu0 %v5858_v39 }
 0x1ac   : > { %v4935_v59 = vadd.f32 %v4934_v42, %v4933_v0  ;;  %v4996_v15 = vadd.f32 %v4995_v12, %v4994_v11  ;;  %v4997_v17 = vpop.f32.mrb[22].mxu1  ;;  %3848 = vmatprep.mubr.bf16.mxu0 %v5859_v44 }
 0x1ad   : > { %v4998_v20 = vpop.f32.mrb[23].mxu1 }
 0x1ae   : > { %v6755_v40 = vadd.f32 %v4996_v15, %v4932_v54  ;;  %v4999_v21 = vadd.f32 %v4998_v20, %v4997_v17  ;;  %v5860_v54 = vld [vmem:[%s6385_s28 + $0x3c] sm:$0xff]  }
 0x1af   : > { %5477 = vmatmul.mubr.bf16.vlgmr.msra.gmra.mrb[128].mxu1 %v6625_v6 }
 0x1b0   : > { %v4936_v3 = vpop.f32.mrb[24].mxu0  ;;  %v6758_v27 = vadd.f32 %v4999_v21, %v4935_v59  ;;  %5480 = vmatprep.mubr.bf16.mxu1 %v6637_v62 }
 0x1b1   : > { %v4937_v14 = vpop.f32.mrb[25].mxu0 }
 0x1b2   : > { %v4938_v38 = vadd.f32 %v4937_v14, %v4936_v3  ;;  %v4939_v13 = vpop.f32.mrb[26].mxu0  ;;  %v5000_v31 = vpop.f32.mrb[24].mxu1  ;;  %v5862_v14 = vld [vmem:[%s6385_s28 + $0x48] sm:$0xff]  }
 0x1b3   : > { %v4940_v56 = vpop.f32.mrb[27].mxu0  ;;  %v5001_v33 = vpop.f32.mrb[25].mxu1  ;;  %3849 = vmatmul.mubr.bf16.gmra.mrb[128].mxu0 %v5860_v54 }
 0x1b4   : > { %v4941_v19 = vadd.f32 %v4940_v56, %v4939_v13  ;;  %v5002_v53 = vadd.f32 %v5001_v33, %v5000_v31  ;;  %v5003_v35 = vpop.f32.mrb[26].mxu1  ;;  %3856 = vmatprep.mubr.bf16.mxu0 %v5861_v50 }
 0x1b5   : > { %v5004_v5 = vpop.f32.mrb[27].mxu1 }
 0x1b6   : > { %v6764_v18 = vadd.f32 %v5002_v53, %v4938_v38  ;;  %v5005_v6 = vadd.f32 %v5004_v5, %v5003_v35  ;;  %v5863_v38 = vld [vmem:[%s6385_s28 + $0x12c] sm:$0xff]  }
 0x1b7   : > { %5481 = vmatmul.mubr.bf16.gmra.mrb[132].mxu1 %v6649_v23 }
 0x1b8   : > { %v4942_v47 = vpop.f32.mrb[28].mxu0  ;;  %v6767_v62 = vadd.f32 %v5005_v6, %v4941_v19  ;;  %5484 = vmatprep.mubr.bf16.mxu1 %v6658_v1 }
 0x1b9   : > { %v4943_v51 = vpop.f32.mrb[29].mxu0 }
 0x1ba   : > { %v4944_v32 = vadd.f32 %v4943_v51, %v4942_v47  ;;  %v4945_v24 = vpop.f32.mrb[30].mxu0  ;;  %v5006_v46 = vpop.f32.mrb[28].mxu1  ;;  %v5864_v47 = vld [vmem:[%s6385_s28 + $0x54] sm:$0xff]  }
 0x1bb   : > { %v4946_v34 = vpop.f32.mrb[31].mxu0  ;;  %v5007_v48 = vpop.f32.mrb[29].mxu1  ;;  %3857 = vmatmul.mubr.bf16.gmra.mrb[132].mxu0 %v5862_v14 }
 0x1bc   : > { %v4947_v36 = vadd.f32 %v4946_v34, %v4945_v24  ;;  %v5008_v49 = vadd.f32 %v5007_v48, %v5006_v46  ;;  %v5009_v52 = vpop.f32.mrb[30].mxu1  ;;  %3864 = vmatprep.mubr.bf16.mxu0 %v5863_v38 }
 0x1bd   : > { %v5010_v0 = vpop.f32.mrb[31].mxu1 }
 0x1be   : > { %v6773_v55 = vadd.f32 %v5008_v49, %v4944_v32  ;;  %v5011_v42 = vadd.f32 %v5010_v0, %v5009_v52  ;;  %v5866_v49 = vld [vmem:[%s6385_s28 + $0x60] sm:$0xff]  }
 0x1bf   : > { %5485 = vmatmul.mubr.bf16.gmra.mrb[136].mxu1 %v6671_v29 }
 0x1c0   : > { %v6776_v57 = vadd.f32 %v5011_v42, %v4947_v36  ;;  %5488 = vmatprep.mubr.bf16.mxu1 %v6681_v16  ;;  %v5028_v23 = vpop.f32.mrb[32].mxu0 }
 0x1c1   : > { %v5029_v1 = vpop.f32.mrb[33].mxu0 }
 0x1c2   : > { %v5092_v58 = vpop.f32.mrb[32].mxu1  ;;  %v5030_v59 = vadd.f32 %v5029_v1, %v5028_v23  ;;  %v5031_v60 = vpop.f32.mrb[34].mxu0 }
 0x1c3   : > { %v5093_v7 = vpop.f32.mrb[33].mxu1  ;;  %v5032_v2 = vpop.f32.mrb[35].mxu0  ;;  %3865 = vmatmul.mubr.bf16.gmra.mrb[136].mxu0 %v5864_v47 }
 0x1c4   : > { %v5094_v3 = vadd.f32 %v5093_v7, %v5092_v58  ;;  %v5095_v8 = vpop.f32.mrb[34].mxu1  ;;  %v2448_v10 = vadd.f32 %v5030_v59, %v6711_v41  ;;  %v5033_v11 = vadd.f32 %v5032_v2, %v5031_v60 }
 0x1c5   : > { %v5096_v29 = vpop.f32.mrb[35].mxu1 }
 0x1c6   : > { %v5097_v13 = vadd.f32 %v5096_v29, %v5095_v8  ;;  %v2451_v16 = vadd.f32 %v5033_v11, %v6715_v45  ;;  %v6784_v12 = vadd.f32 %v5094_v3, %v2448_v10  ;;  %v5865_v45 = vld [vmem:[%s6385_s28 + $0x138] sm:$0xff]  }
 0x1c7   : > { %5489 = vmatmul.mubr.bf16.gmra.mrb[140].mxu1 %v6689_v26  ;;  %3872 = vmatprep.mubr.bf16.mxu0 %v5865_v45 }
 0x1c8   : > { %v6786_v56 = vadd.f32 %v5097_v13, %v2451_v16  ;;  %v5034_v15 = vpop.f32.mrb[36].mxu0 }
 0x1c9   : > { %v5035_v19 = vpop.f32.mrb[37].mxu0 }
 0x1ca   : > { %v5098_v17 = vpop.f32.mrb[36].mxu1  ;;  %v5036_v41 = vadd.f32 %v5035_v19, %v5034_v15  ;;  %v5037_v21 = vpop.f32.mrb[38].mxu0 }
 0x1cb   : > { %v5099_v20 = vpop.f32.mrb[37].mxu1  ;;  %v5038_v51 = vpop.f32.mrb[39].mxu0  ;;  %3873 = vmatmul.mubr.bf16.gmra.mrb[140].mxu0 %v5866_v49 }
 0x1cc   : > { %v5100_v25 = vadd.f32 %v5099_v20, %v5098_v17  ;;  %v5101_v28 = vpop.f32.mrb[38].mxu1  ;;  %v2456_v26 = vadd.f32 %v5036_v41, %v6721_v30  ;;  %v5039_v32 = vadd.f32 %v5038_v51, %v5037_v21 }
 0x1cd   : > { %v5102_v31 = vpop.f32.mrb[39].mxu1 }
 0x1ce   : > { %v5103_v24 = vadd.f32 %v5102_v31, %v5101_v28  ;;  %v2459_v33 = vadd.f32 %v5039_v32, %v6724_v4  ;;  %v6792_v34 = vadd.f32 %v5100_v25, %v2456_v26 }
 0x1d0   : > { %v5040_v53 = vpop.f32.mrb[40].mxu0  ;;  %v6794_v36 = vadd.f32 %v5103_v24, %v2459_v33 }
 0x1d1   : > { %v5041_v5 = vpop.f32.mrb[41].mxu0 }
 0x1d2   : > { %v5104_v35 = vpop.f32.mrb[40].mxu1  ;;  %v5042_v6 = vadd.f32 %v5041_v5, %v5040_v53  ;;  %v5043_v44 = vpop.f32.mrb[42].mxu0 }
 0x1d3   : > { %v5105_v39 = vpop.f32.mrb[41].mxu1  ;;  %v5044_v52 = vpop.f32.mrb[43].mxu0 }
 0x1d4   : > { %v5106_v46 = vadd.f32 %v5105_v39, %v5104_v35  ;;  %v5107_v48 = vpop.f32.mrb[42].mxu1  ;;  %v2464_v54 = vadd.f32 %v5042_v6, %v6730_v22  ;;  %v5045_v0 = vadd.f32 %v5044_v52, %v5043_v44 }
 0x1d5   : > { %v5108_v30 = vpop.f32.mrb[43].mxu1 }
 0x1d6   : > { %v5109_v4 = vadd.f32 %v5108_v30, %v5107_v48  ;;  %v2467_v50 = vadd.f32 %v5045_v0, %v6733_v9  ;;  %v6799_v42 = vadd.f32 %v5106_v46, %v2464_v54 }
 0x1d8   : > { %v6801_v1 = vadd.f32 %v5109_v4, %v2467_v50  ;;  %v5046_v58 = vpop.f32.mrb[44].mxu0 }
 0x1d9   : > { %v5047_v60 = vpop.f32.mrb[45].mxu0 }
 0x1da   : > { %v5110_v23 = vpop.f32.mrb[44].mxu1  ;;  %v5048_v3 = vadd.f32 %v5047_v60, %v5046_v58  ;;  %v5049_v8 = vpop.f32.mrb[46].mxu0 }
 0x1db   : > { %v5111_v59 = vpop.f32.mrb[45].mxu1  ;;  %v5050_v10 = vpop.f32.mrb[47].mxu0 }
 0x1dc   : > { %v5112_v7 = vadd.f32 %v5111_v59, %v5110_v23  ;;  %v5113_v2 = vpop.f32.mrb[46].mxu1  ;;  %v2472_v22 = vadd.f32 %v5048_v3, %v6739_v43  ;;  %v5051_v29 = vadd.f32 %v5050_v10, %v5049_v8 }
 0x1dd   : > { %v5114_v14 = vpop.f32.mrb[47].mxu1 }
 0x1de   : > { %v5115_v11 = vadd.f32 %v5114_v14, %v5113_v2  ;;  %v2475_v9 = vadd.f32 %v5051_v29, %v6741_v37  ;;  %v6805_v38 = vadd.f32 %v5112_v7, %v2472_v22 }
 0x1e0   : > { %v5052_v16 = vpop.f32.mrb[48].mxu0  ;;  %v6807_v17 = vadd.f32 %v5115_v11, %v2475_v9 }
 0x1e1   : > { %v5053_v19 = vpop.f32.mrb[49].mxu0 }
 0x1e2   : > { %v5116_v13 = vpop.f32.mrb[48].mxu1  ;;  %v5054_v21 = vadd.f32 %v5053_v19, %v5052_v16  ;;  %v5055_v25 = vpop.f32.mrb[50].mxu0 }
 0x1e3   : > { %v5117_v15 = vpop.f32.mrb[49].mxu1  ;;  %v5056_v47 = vpop.f32.mrb[51].mxu0 }
 0x1e4   : > { %v5118_v20 = vadd.f32 %v5117_v15, %v5116_v13  ;;  %v5119_v41 = vpop.f32.mrb[50].mxu1  ;;  %v2480_v43 = vadd.f32 %v5054_v21, %v6747_v61  ;;  %v5057_v31 = vadd.f32 %v5056_v47, %v5055_v25 }
 0x1e5   : > { %v5120_v28 = vpop.f32.mrb[51].mxu1 }
 0x1e6   : > { %v5121_v51 = vadd.f32 %v5120_v28, %v5119_v41  ;;  %v2483_v37 = vadd.f32 %v5057_v31, %v6749_v63  ;;  %v6811_v45 = vadd.f32 %v5118_v20, %v2480_v43 }
 0x1e8   : > { %v5058_v32 = vpop.f32.mrb[52].mxu0  ;;  %v6813_v33 = vadd.f32 %v5121_v51, %v2483_v37  ;;  %v6834_v37 = vstv %s4348_s30 }
 0x1e9   : > { %v5059_v53 = vpop.f32.mrb[53].mxu0  ;;  %vm1583_vm5 = vcmp.ge.s32.totalorder %v6834_v37, 1  ;;  %vm1591_vm6 = vcmp.le.s32.totalorder %v6834_v37, 8 }
 0x1ea   : > { %v5122_v26 = vpop.f32.mrb[52].mxu1  ;;  %v5060_v39 = vadd.f32 %v5059_v53, %v5058_v32  ;;  %v5061_v6 = vpop.f32.mrb[54].mxu0  ;;  %vm6884_vm9 = vmand %vm1583_vm5, %vm1591_vm6 }
 0x1eb   : > { %v5123_v24 = vpop.f32.mrb[53].mxu1  ;;  %v5062_v46 = vpop.f32.mrb[55].mxu0 }
 0x1ec   : > { %v5124_v35 = vadd.f32 %v5123_v24, %v5122_v26  ;;  %v5125_v5 = vpop.f32.mrb[54].mxu1  ;;  %v2488_v61 = vadd.f32 %v5060_v39, %v6755_v40  ;;  %v5063_v49 = vadd.f32 %v5062_v46, %v5061_v6  ;;  %v1580_v26 = vlaneseq  ;;  %v6844_v6 = vld [vmem:[#allocation8 + $0x1] ss:$0 sm:$0xff] }
 0x1ed   : > { %v5126_v44 = vpop.f32.mrb[55].mxu1  ;;  %v1573_v39 = vadd.s32 1, %v6834_v37 }
 0x1ee   : > { %v5127_v48 = vadd.f32 %v5126_v44, %v5125_v5  ;;  %v2491_v63 = vadd.f32 %v5063_v49, %v6758_v27  ;;  %v6817_v52 = vadd.f32 %v5124_v35, %v2488_v61  ;;  %v6838_v35 = vld [vmem:[#allocation8] ss:$0 sm:$0xff] }
 0x1ef   : > { %vm1584_vm3 = vcmp.ge.s32.totalorder %v1573_v39, 1  ;;  %vm1592_vm4 = vcmp.le.s32.totalorder %v1573_v39, 8  ;;  %v6919_v39 = vadd.s32 5, %v6834_v37 }
 0x1f0   : > { %v6819_v0 = vadd.f32 %v5127_v48, %v2491_v63  ;;  %v5064_v4 = vpop.f32.mrb[56].mxu0  ;;  %v6847_v48 = vshrl.u32 %v1580_v26, 7  ;;  %vm6879_vm8 = vmand %vm1584_vm3, %vm1592_vm4 }
 0x1f1   : > { %v5065_v58 = vpop.f32.mrb[57].mxu0  ;;  %vm1588_vm4 = vcmp.ge.s32.totalorder %v6919_v39, 1  ;;  %vm1596_vm5 = vcmp.le.s32.totalorder %v6919_v39, 8 }
 0x1f2   : > { %v5128_v30 = vpop.f32.mrb[56].mxu1  ;;  %v5066_v60 = vadd.f32 %v5065_v58, %v5064_v4  ;;  %v5067_v7 = vpop.f32.mrb[58].mxu0  ;;  %vm7519_vm7 = vcmp.ge.s32.totalorder %v6847_v48, 1 }
 0x1f3   : > { %v5129_v54 = vpop.f32.mrb[57].mxu1  ;;  %v5068_v3 = vpop.f32.mrb[59].mxu0  ;;  %vm6900_vm11 = vmand %vm6879_vm8, %vm7519_vm7 }
 0x1f4   : > { %v5130_v50 = vadd.f32 %v5129_v54, %v5128_v30  ;;  %v5131_v23 = vpop.f32.mrb[58].mxu1  ;;  %v2496_v40 = vadd.f32 %v5066_v60, %v6764_v18  ;;  %v5069_v8 = vadd.f32 %v5068_v3, %v5067_v7  ;;  %v6862_v7 = vadd.s32 8, %v6847_v48  ;;  %vm6914_vm13 = vmand %vm6884_vm9, %vm7519_vm7 }
 0x1f5   : > { %v5132_v59 = vpop.f32.mrb[59].mxu1 }
 0x1f6   : > { %v5133_v2 = vadd.f32 %v5132_v59, %v5131_v23  ;;  %v2499_v27 = vadd.f32 %v5069_v8, %v6767_v62  ;;  %v6823_v10 = vadd.f32 %v5130_v50, %v2496_v40  ;;  %v6867_v40 = vld [vmem:[#allocation8 + $0x3] ss:$0 sm:$0xff]  ;;  %vm7520_vm10 = vcmp.le.s32.totalorder %v6862_v7, 8 }
 0x1f7   : > { %vm6930_vm14 = vmand %vm6879_vm8, %vm7520_vm10 }
 0x1f8   : > { %v5070_v22 = vpop.f32.mrb[60].mxu0  ;;  %v6825_v13 = vadd.f32 %v5133_v2, %v2499_v27  ;;  %vm6942_vm15 = vmand %vm6884_vm9, %vm7520_vm10 }
 0x1f9   : > { %v5071_v16 = vpop.f32.mrb[61].mxu0 }
 0x1fa   : > { %v5134_v14 = vpop.f32.mrb[60].mxu1  ;;  %v5072_v19 = vadd.f32 %v5071_v16, %v5070_v22  ;;  %v5073_v20 = vpop.f32.mrb[62].mxu0 }
 0x1fb   : > { %v5135_v11 = vpop.f32.mrb[61].mxu1  ;;  %v5074_v21 = vpop.f32.mrb[63].mxu0 }
 0x1fc   : > { %v5136_v29 = vadd.f32 %v5135_v11, %v5134_v14  ;;  %v5137_v9 = vpop.f32.mrb[62].mxu1  ;;  %v2504_v18 = vadd.f32 %v5072_v19, %v6773_v55  ;;  %v5075_v25 = vadd.f32 %v5074_v21, %v5073_v20  ;;  %v6873_v11 = vadd.s32 3, %v6834_v37 }
 0x1fd   : > { %v5138_v15 = vpop.f32.mrb[63].mxu1 }
 0x1fe   : > { %v5139_v41 = vadd.f32 %v5138_v15, %v5137_v9  ;;  %v2507_v62 = vadd.f32 %v5075_v25, %v6776_v57  ;;  %v6830_v47 = vadd.f32 %v5136_v29, %v2504_v18  ;;  %vm1586_vm12 = vcmp.ge.s32.totalorder %v6873_v11, 1 }
 0x1ff   : > { %vm1594_vm0 = vcmp.le.s32.totalorder %v6873_v11, 8 }
 0x200   : > { %v6836_v32 = vadd.f32 %v5139_v41, %v2507_v62  ;;  %v5446_v53 = vpop.f32.mrb[64].mxu0  ;;  %vm6982_vm3 = vmand %vm1586_vm12, %vm1594_vm0 }
 0x201   : > { %v2650_v57 = vadd.f32 %v5446_v53, %v6792_v34  ;;  %v2641_v5 = vpop.f32.mrb[65].mxu0  ;;  %vm7012_vm8 = vmand %vm6982_vm3, %vm7519_vm7 }
 0x202   : > { %v5172_v28 = vpop.f32.mrb[64].mxu1  ;;  %v2642_v44 = vadd.f32 %v2641_v5, %v6784_v12  ;;  %v5447_v46 = vpop.f32.mrb[66].mxu0  ;;  %v6855_v12 = vld [vmem:[#allocation8 + $0x2] ss:$0 sm:$0xff]  ;;  %vm7024_vm12 = vmand %vm6982_vm3, %vm7520_vm10 }
 0x203   : > { %v5173_v51 = vpop.f32.mrb[65].mxu1  ;;  %v2711_v61 = vmul.f32 %v6838_v35, %v2650_v57  ;;  %v2653_v49 = vadd.f32 %v5447_v46, %v6794_v36  ;;  %v2644_v63 = vpop.f32.mrb[67].mxu0  ;;  %vm7074_vm3 = vmand %vm1588_vm4, %vm1596_vm5 }
 0x204   : > { %v6832_v43 = vadd.f32 %v5173_v51, %v5172_v28  ;;  %v5175_v31 = vpop.f32.mrb[66].mxu1  ;;  %v2709_v30 = vmul.f32 %v6838_v35, %v2642_v44  ;;  %v2645_v54 = vadd.f32 %v2644_v63, %v6786_v56  ;;  %v6906_v51 = vadd.s32 2, %v6834_v37 }
 0x205   : > { %v5176_v24 = vpop.f32.mrb[67].mxu1  ;;  %v2732_v4 = vadd.f32 %v6844_v6, %v2711_v61  ;;  %v2712_v50 = vmul.f32 %v6838_v35, %v2653_v49 }
 0x206   : > { %v6840_v55 = vadd.f32 %v5176_v24, %v5175_v31  ;;  %v2730_v58 = vadd.f32 %v6844_v6, %v2709_v30  ;;  %v2710_v59 = vmul.f32 %v6838_v35, %v2645_v54  ;;  %vm1585_vm1 = vcmp.ge.s32.totalorder %v6906_v51, 1 }
 0x207   : > { %v2748_v56 = vmax.f32 %v2732_v4, 0.0  ;;  %v2733_v2 = vadd.f32 %v6844_v6, %v2712_v50  ;;  %vm1593_vm2 = vcmp.le.s32.totalorder %v6906_v51, 8 }
 0x208   : > { %v2746_v8 = vmax.f32 %v2730_v58, 0.0  ;;  %v2731_v27 = vadd.f32 %v6844_v6, %v2710_v59  ;;  %vm7002_vm6 = vmand %vm1585_vm1, %vm1593_vm2 }
 0x209   : > { %v2769_v22 = vmul.f32 %v6855_v12, %v2748_v56  ;;  %v2749_v29 = vmax.f32 %v2733_v2, 0.0  ;;  %vm7035_vm1 = vmand %vm7002_vm6, %vm7519_vm7 }
 0x20a   : > { %v5178_v34 = vpop.f32.mrb[68].mxu1  ;;  %v2767_v16 = vmul.f32 %v6855_v12, %v2746_v8  ;;  %v2747_v15 = vmax.f32 %v2731_v27, 0.0  ;;  %vm7045_vm2 = vmand %vm7002_vm6, %vm7520_vm10 }
 0x20b   : > { %v5179_v23 = vpop.f32.mrb[69].mxu1  ;;  %v2790_v20 = vadd.f32 %v6867_v40, %v2769_v22  ;;  %v2770_v41 = vmul.f32 %v6855_v12, %v2749_v29  ;;  %v5450_v25 = vpop.f32.mrb[68].mxu0 }
 0x20c   : > { %v6859_v36 = vadd.f32 %v5179_v23, %v5178_v34  ;;  %v5181_v60 = vpop.f32.mrb[70].mxu1  ;;  %v2788_v21 = vadd.f32 %v6867_v40, %v2767_v16  ;;  %v2768_v18 = vmul.f32 %v6855_v12, %v2747_v15  ;;  %v2666_v24 = vadd.f32 %v5450_v25, %v6805_v38  ;;  %v2657_v53 = vpop.f32.mrb[69].mxu0 }
 0x20d   : > { %v5182_v3 = vpop.f32.mrb[71].mxu1  ;;  %v2806_v31 = vmax.f32 %v2790_v20, 0.0  ;;  %v2791_v26 = vadd.f32 %v6867_v40, %v2770_v41  ;;  %v2658_v61 = vadd.f32 %v2657_v53, %v6799_v42  ;;  %v5451_v49 = vpop.f32.mrb[70].mxu0 }
 0x20e   : > { %v6870_v14 = vadd.f32 %v5182_v3, %v5181_v60  ;;  %v2804_v44 = vmax.f32 %v2788_v21, 0.0  ;;  %v2789_v46 = vadd.f32 %v6867_v40, %v2768_v18  ;;  %v2715_v34 = vmul.f32 %v6838_v35, %v2666_v24  ;;  %v2660_v50 = vpop.f32.mrb[71].mxu0 }
 0x20f   : > { %v2807_v54 = vmax.f32 %v2791_v26, 0.0  ;;  %v2669_v4 = vadd.f32 %v5451_v49, %v6807_v17  ;;  %v2822_v23 = vsel %vm6900_vm11, %v2806_v31, 0.0  ;;  %v2713_v60 = vmul.f32 %v6838_v35, %v2658_v61 }
 0x210   : > { %v2805_v59 = vmax.f32 %v2789_v46, 0.0  ;;  %v2661_v56 = vadd.f32 %v2660_v50, %v6801_v1  ;;  %v2736_v17 = vadd.f32 %v6844_v6, %v2715_v34  ;;  %v2820_v8 = vsel %vm6914_vm13, %v2804_v44, 0.0 }
 0x211   : > { %v2716_v3 = vmul.f32 %v6838_v35, %v2669_v4  ;;  %v2823_v27 = vsel %vm6930_vm14, %v2807_v54, 0.0  ;;  %v2734_v22 = vadd.f32 %v6844_v6, %v2713_v60  ;;  %v6973_v31 = vadd.s32 4, %v6834_v37 }
 0x212   : > { %v5184_v62 = vpop.f32.mrb[72].mxu1  ;;  %v2714_v29 = vmul.f32 %v6838_v35, %v2661_v56  ;;  %v4798_v9 = vpack.c.bf16 %v2823_v27, %v2822_v23  ;;  %v2821_v1 = vsel %vm6942_vm15, %v2805_v59, 0.0  ;;  %v2752_v16 = vmax.f32 %v2736_v17, 0.0 }
 0x213   : > { %v5185_v57 = vpop.f32.mrb[73].mxu1  ;;  %v2737_v15 = vadd.f32 %v6844_v6, %v2716_v3  ;;  %v4793_v19 = vpack.c.bf16 %v2821_v1, %v2820_v8  ;;  %v2750_v20 = vmax.f32 %v2734_v22, 0.0  ;;  %v5454_v49 = vpop.f32.mrb[72].mxu0  ;;  %vm1587_vm9 = vcmp.ge.s32.totalorder %v6973_v31, 1 }
 0x214   : > { %v6923_v38 = vadd.f32 %v5185_v57, %v5184_v62  ;;  %v5187_v63 = vpop.f32.mrb[74].mxu1  ;;  %v2735_v41 = vadd.f32 %v6844_v6, %v2714_v29  ;;  %4870 = vst [vmem:[%s6965_s9 + $0x8] sm:$0xff] %v4798_v9   ;;  %v2773_v18 = vmul.f32 %v6855_v12, %v2752_v16  ;;  %v2682_v4 = vadd.f32 %v5454_v49, %v6817_v52  ;;  %v2673_v50 = vpop.f32.mrb[73].mxu0 }
 0x215   : > { %v5188_v42 = vpop.f32.mrb[75].mxu1  ;;  %v2753_v25 = vmax.f32 %v2737_v15, 0.0  ;;  %4794 = vst [vmem:[%s6965_s9] sm:$0xff] %v4793_v19   ;;  %v2771_v26 = vmul.f32 %v6855_v12, %v2750_v20  ;;  %v2674_v56 = vadd.f32 %v2673_v50, %v6811_v45  ;;  %v5455_v17 = vpop.f32.mrb[74].mxu0  ;;  %vm1595_vm0 = vcmp.le.s32.totalorder %v6973_v31, 8 }
 0x216   : > { %v6948_v2 = vadd.f32 %v5188_v42, %v5187_v63  ;;  %v2751_v24 = vmax.f32 %v2735_v41, 0.0  ;;  %v2794_v46 = vadd.f32 %v6867_v40, %v2773_v18  ;;  %v6990_v63 = vadd.s32 7, %v6834_v37  ;;  %v2676_v27 = vpop.f32.mrb[75].mxu0  ;;  %vm7083_vm6 = vmand %vm1587_vm9, %vm1595_vm0 }
 0x217   : > { %v2774_v61 = vmul.f32 %v6855_v12, %v2753_v25  ;;  %v2792_v34 = vadd.f32 %v6867_v40, %v2771_v26  ;;  %v2719_v3 = vmul.f32 %v6838_v35, %v2682_v4  ;;  %v2685_v8 = vadd.f32 %v5455_v17, %v6819_v0  ;;  %vm7099_vm9 = vmand %vm7074_vm3, %vm7519_vm7 }
 0x218   : > { %v2772_v11 = vmul.f32 %v6855_v12, %v2751_v24  ;;  %v2810_v59 = vmax.f32 %v2794_v46, 0.0  ;;  %v2717_v9 = vmul.f32 %v6838_v35, %v2674_v56  ;;  %v2677_v1 = vadd.f32 %v2676_v27, %v6813_v33  ;;  %vm7110_vm4 = vmand %vm7083_vm6, %vm7519_vm7 }
 0x219   : > { %v2795_v60 = vadd.f32 %v6867_v40, %v2774_v61  ;;  %v2808_v22 = vmax.f32 %v2792_v34, 0.0  ;;  %v2740_v15 = vadd.f32 %v6844_v6, %v2719_v3  ;;  %v2720_v19 = vmul.f32 %v6838_v35, %v2685_v8  ;;  %vm7122_vm0 = vmand %vm7074_vm3, %vm7520_vm10 }
 0x21a   : > { %v5190_v21 = vpop.f32.mrb[76].mxu1  ;;  %v2793_v51 = vadd.f32 %v6867_v40, %v2772_v11  ;;  %v7050_v41 = vadd.s32 6, %v6834_v37  ;;  %v2718_v18 = vmul.f32 %v6838_v35, %v2677_v1  ;;  %vm7134_vm7 = vmand %vm7083_vm6, %vm7520_vm10  ;;  %vm7585_vm3 = vcmp.le.s32.totalorder %v6990_v63, 8 }
 0x21b   : > { %v5191_v62 = vpop.f32.mrb[77].mxu1  ;;  %v2811_v29 = vmax.f32 %v2795_v60, 0.0  ;;  %v2756_v24 = vmax.f32 %v2740_v15, 0.0  ;;  %v2824_v34 = vsel %vm7035_vm1, %v2808_v22, 0.0  ;;  %vm7586_vm6 = vcmp.ge.s32.totalorder %v6990_v63, 1 }
 0x21c   : > { %v6976_v53 = vadd.f32 %v5191_v62, %v5190_v21  ;;  %v5193_v57 = vpop.f32.mrb[78].mxu1  ;;  %v2809_v16 = vmax.f32 %v2793_v51, 0.0  ;;  %v2738_v21 = vadd.f32 %v6844_v6, %v2717_v9  ;;  %v2826_v62 = vsel %vm7012_vm8, %v2810_v59, 0.0  ;;  %vm7158_vm10 = vmand %vm7586_vm6, %vm7585_vm3 }
 0x21d   : > { %v5194_v54 = vpop.f32.mrb[79].mxu1  ;;  %v2827_v26 = vsel %vm7024_vm12, %v2811_v29, 0.0  ;;  %v2739_v49 = vadd.f32 %v6844_v6, %v2718_v18  ;;  %v2777_v4 = vmul.f32 %v6855_v12, %v2756_v24  ;;  %v7577_v9 = vmov 0 }
 0x21e   : > { %v6996_v42 = vadd.f32 %v5194_v54, %v5193_v57  ;;  %v2741_v57 = vadd.f32 %v6844_v6, %v2720_v19  ;;  %v4808_v37 = vpack.c.bf16 %v2827_v26, %v2826_v62  ;;  %v2754_v61 = vmax.f32 %v2738_v21, 0.0  ;;  %v5458_v39 = vpop.f32.mrb[76].mxu0 }
 0x21f   : > { %v2825_v11 = vsel %vm7045_vm2, %v2809_v16, 0.0  ;;  %v2755_v17 = vmax.f32 %v2739_v49, 0.0  ;;  %v2798_v3 = vadd.f32 %v6867_v40, %v2777_v4  ;;  %v2698_v31 = vadd.f32 %v5458_v39, %v6830_v47  ;;  %v2689_v29 = vpop.f32.mrb[77].mxu0 }
 0x220   : > { %v2757_v50 = vmax.f32 %v2741_v57, 0.0  ;;  %4872 = vst [vmem:[%s6965_s9 + $0x18] sm:$0xff] %v4808_v37   ;;  %v4803_v59 = vpack.c.bf16 %v2825_v11, %v2824_v34  ;;  %v2775_v56 = vmul.f32 %v6855_v12, %v2754_v61  ;;  %v7578_v9 = vsel %vm7099_vm9, 4294967295, %v7577_v9  ;;  %v5459_v19 = vpop.f32.mrb[78].mxu0 }
 0x221   : > { %v2776_v22 = vmul.f32 %v6855_v12, %v2755_v17  ;;  %v2814_v1 = vmax.f32 %v2798_v3, 0.0  ;;  %v2690_v15 = vadd.f32 %v2689_v29, %v6823_v10  ;;  %vm1597_vm5 = vcmp.le.s32.totalorder %v7050_v41, 8  ;;  %v2692_v10 = vpop.f32.mrb[79].mxu0 }
 0x222   : > { %v5196_v20 = vpop.f32.mrb[80].mxu1  ;;  %v2778_v8 = vmul.f32 %v6855_v12, %v2757_v50  ;;  %4871 = vst [vmem:[%s6965_s9 + $0x10] sm:$0xff] %v4803_v59   ;;  %v2796_v27 = vadd.f32 %v6867_v40, %v2775_v56  ;;  %v2701_v62 = vadd.f32 %v5459_v19, %v6836_v32  ;;  %v7581_v24 = vmov 0 }
 0x223   : > { %v5197_v25 = vpop.f32.mrb[81].mxu1  ;;  %v2797_v18 = vadd.f32 %v6867_v40, %v2776_v22  ;;  %v7582_v24 = vsel %vm7122_vm0, 4294967295, %v7581_v24  ;;  %v2693_v37 = vadd.f32 %v2692_v10, %v6825_v13  ;;  %v7583_v32 = vmov 0 }
 0x224   : > { %v7059_v44 = vadd.f32 %v5197_v25, %v5196_v20  ;;  %v5199_v46 = vpop.f32.mrb[82].mxu1  ;;  %v2799_v16 = vadd.f32 %v6867_v40, %v2778_v8  ;;  %v2812_v21 = vmax.f32 %v2796_v27, 0.0  ;;  %v2723_v25 = vmul.f32 %v6838_v35, %v2698_v31 }
 0x225   : > { %v5200_v54 = vpop.f32.mrb[83].mxu1  ;;  %v7584_v32 = vsel %vm7134_vm7, 4294967295, %v7583_v32  ;;  %v2724_v11 = vmul.f32 %v6838_v35, %v2701_v62  ;;  %v2830_v13 = vsel %vm7099_vm9, %v2814_v1, 0.0  ;;  %v2722_v59 = vmul.f32 %v6838_v35, %v2693_v37 }
 0x226   : > { %v7067_v23 = vadd.f32 %v5200_v54, %v5199_v46  ;;  %v2815_v57 = vmax.f32 %v2799_v16, 0.0  ;;  %v2721_v46 = vmul.f32 %v6838_v35, %v2690_v15  ;;  %v2813_v54 = vmax.f32 %v2797_v18, 0.0  ;;  %v5236_v35 = vpop.f32.mrb[80].mxu0 }
 0x227   : > { %v2744_v34 = vadd.f32 %v6844_v6, %v2723_v25  ;;  %v2828_v56 = vsel %vm7110_vm4, %v2812_v21, 0.0  ;;  %v2745_v51 = vadd.f32 %v6844_v6, %v2724_v11  ;;  %v2743_v27 = vadd.f32 %v6844_v6, %v2722_v59  ;;  %v5237_v15 = vpop.f32.mrb[81].mxu0 }
 0x228   : > { %v2742_v50 = vadd.f32 %v6844_v6, %v2721_v46  ;;  %v2831_v3 = vsel %vm7122_vm0, %v2815_v57, 0.0  ;;  %v2829_v8 = vsel %vm7134_vm7, %v2813_v54, 0.0  ;;  %v5238_v21 = vadd.f32 %v5237_v15, %v5236_v35  ;;  %v5239_v6 = vpop.f32.mrb[82].mxu0 }
 0x229   : > { %v2760_v17 = vmax.f32 %v2744_v34, 0.0  ;;  %v4818_v22 = vpack.c.bf16 %v2831_v3, %v2830_v13  ;;  %v4813_v31 = vpack.c.bf16 %v2829_v8, %v2828_v56  ;;  %v2761_v16 = vmax.f32 %v2745_v51, 0.0  ;;  %v5240_v62 = vpop.f32.mrb[83].mxu0 }
 0x22a   : > { %v5202_v20 = vpop.f32.mrb[84].mxu1  ;;  %v2758_v39 = vmax.f32 %v2742_v50, 0.0  ;;  %vm7589_vm3 = vcmp.ge.s32.totalorder %v7050_v41, 1  ;;  %vm7592_vm0 = vcmp.ge.s32.totalorder %v6847_v48, 1  ;;  %v5241_v41 = vadd.f32 %v5240_v62, %v5239_v6 }
 0x22b   : > { %v5203_v26 = vpop.f32.mrb[85].mxu1  ;;  %v2781_v1 = vmul.f32 %v6855_v12, %v2760_v17  ;;  %4874 = vst [vmem:[%s6965_s9 + $0x28] sm:$0xff] %v4818_v22   ;;  %4873 = vst [vmem:[%s6965_s9 + $0x20] sm:$0xff] %v4813_v31   ;;  %v2782_v63 = vmul.f32 %v6855_v12, %v2761_v16 }
 0x22c   : > { %v7128_v61 = vadd.f32 %v5203_v26, %v5202_v20  ;;  %v5205_v49 = vpop.f32.mrb[86].mxu1  ;;  %v2779_v19 = vmul.f32 %v6855_v12, %v2758_v39  ;;  %v2759_v20 = vmax.f32 %v2743_v27, 0.0  ;;  %vm7172_vm6 = vmand %vm7589_vm3, %vm1597_vm5  ;;  %vm7595_vm5 = vcmp.le.s32.totalorder %v6862_v7, 8 }
 0x22d   : > { %v5206_v4 = vpop.f32.mrb[87].mxu1  ;;  %v2802_v25 = vadd.f32 %v6867_v40, %v2781_v1  ;;  %vm7180_vm9 = vmand %vm7158_vm10, %vm7592_vm0  ;;  %v7202_v59 = vadd.f32 %v5241_v41, %v6840_v55  ;;  %vm7598_vm3 = vcmp.ge.s32.totalorder %v6847_v48, 1 }
 0x22e   : > { %v7144_v60 = vadd.f32 %v5206_v4, %v5205_v49  ;;  %v2800_v46 = vadd.f32 %v6867_v40, %v2779_v19  ;;  %v2780_v37 = vmul.f32 %v6855_v12, %v2759_v20  ;;  %v7187_v49 = vadd.f32 %v5238_v21, %v6832_v43  ;;  %vm7193_vm0 = vmand %vm7158_vm10, %vm7595_vm5  ;;  %v5242_v3 = vpop.f32.mrb[84].mxu0 }
 0x22f   : > { %v2818_v34 = vmax.f32 %v2802_v25, 0.0  ;;  %v2803_v4 = vadd.f32 %v6867_v40, %v2782_v63  ;;  %vm7210_vm10 = vmand %vm7172_vm6, %vm7598_vm3  ;;  %v5243_v39 = vpop.f32.mrb[85].mxu0 }
 0x230   : > { %v2816_v43 = vmax.f32 %v2800_v46, 0.0  ;;  %v2801_v50 = vadd.f32 %v6867_v40, %v2780_v37  ;;  %vm7218_vm7 = vmand %vm7172_vm6, %vm7595_vm5  ;;  %v5244_v27 = vadd.f32 %v5243_v39, %v5242_v3  ;;  %v5245_v35 = vpop.f32.mrb[86].mxu0 }
 0x231   : > { %v2819_v51 = vmax.f32 %v2803_v4, 0.0  ;;  %v2834_v48 = vsel %vm7180_vm9, %v2818_v34, 0.0  ;;  %v5246_v1 = vpop.f32.mrb[87].mxu0 }
 0x232   : > { %v5208_v18 = vpop.f32.mrb[88].mxu1  ;;  %v2817_v55 = vmax.f32 %v2801_v50, 0.0  ;;  %v2832_v31 = vsel %vm7210_vm10, %v2816_v43, 0.0  ;;  %v7247_v19 = vadd.f32 %v5244_v27, %v6859_v36  ;;  %v5247_v20 = vadd.f32 %v5246_v1, %v5245_v35 }
 0x233   : > { %v5209_v10 = vpop.f32.mrb[89].mxu1  ;;  %v2835_v8 = vsel %vm7193_vm0, %v2819_v51, 0.0 }
 0x234   : > { %v5211_v54 = vpop.f32.mrb[90].mxu1  ;;  %v7198_v13 = vadd.f32 %v5209_v10, %v5208_v18  ;;  %v4828_v7 = vpack.c.bf16 %v2835_v8, %v2834_v48  ;;  %v2833_v29 = vsel %vm7218_vm7, %v2817_v55, 0.0  ;;  %v7253_v25 = vadd.f32 %v5247_v20, %v6870_v14 }
 0x235   : > { %v5212_v12 = vpop.f32.mrb[91].mxu1  ;;  %v4823_v15 = vpack.c.bf16 %v2833_v29, %v2832_v31 }
 0x236   : > { %v7204_v56 = vadd.f32 %v5212_v12, %v5211_v54  ;;  %4876 = vst [vmem:[%s6965_s9 + $0x38] sm:$0xff] %v4828_v7  }
 0x237   : > { %4875 = vst [vmem:[%s6965_s9 + $0x30] sm:$0xff] %v4823_v15  }
 0x23a   : > { %v5214_v22 = vpop.f32.mrb[92].mxu1 }
 0x23b   : > { %v5215_v16 = vpop.f32.mrb[93].mxu1 }
 0x23c   : > { %v7249_v21 = vadd.f32 %v5215_v16, %v5214_v22  ;;  %v5217_v6 = vpop.f32.mrb[94].mxu1 }
 0x23d   : > { %v5218_v18 = vpop.f32.mrb[95].mxu1 }
 0x23e   : > { %v7255_v63 = vadd.f32 %v5218_v18, %v5217_v6 }
 0x23f   : > { %5966 = shalt.err (!%p5963_p5)
}
 0x240   : > { %s5967_s23 = scalar_lea.hbm %s7241_s13, 1024  ;;  %s5971_s9 = scalar_lea.hbm %s7505_s3, 4096 }
 0x241   : > { %p5968_p8 = scmp.ne.s32.totalorder %s7241_s13, %s5967_s23  ;;  %p5972_p6 = scmp.lt.u32.totalorder %s7241_s13, %s7505_s3 }
 0x242   : > { %p5973_p10 = scmp.lt.u32.totalorder %s5971_s9, %s5967_s23  ;;  %p5975_p4 = scmp.lt.u32.totalorder %s5967_s23, %s7241_s13 }
 0x243   : > { %p5969_p12 = pnand %p5968_p8, %p7603_p3 }
 0x244   : > { %p5974_p1 = por %p5973_p10, %p5972_p6 }
 0x245   : > { %p5970_p2 = pneg %p5969_p12 }
 0x246   : > { %p5976_p7 = por %p5975_p4, %p5974_p1 }
 0x248   : > { %p5977_p13 = pnand %p5976_p7, %p5970_p2 }
 0x24a   : > { %5980 = shalt.err (!%p5977_p13)
}
 0x24b   : > { %s6119_s11 = smov 64   ;;  %s6120_s4 = smov 4   ;;  %v5248_v36 = vpop.f32.mrb[88].mxu0  ;;  %v5300_v26 = vpop.f32.mrb[96].mxu1 }
 0x24c   : > { %5505 = dma.vmem_to_hbm [thread:$0]  (%p7603_p3), %s7243_s22, 1024, %s7241_s13, %s4133_s1, %s6119_s11, %s6119_s11, %s6120_s4   ;;  %v5249_v14 = vpop.f32.mrb[89].mxu0  ;;  %v5301_v37 = vpop.f32.mrb[97].mxu1 }
 0x24d   : > { %v5250_v62 = vadd.f32 %v5249_v14, %v5248_v36  ;;  %v5251_v10 = vpop.f32.mrb[90].mxu0  ;;  %v5302_v34 = vadd.f32 %v5301_v37, %v5300_v26  ;;  %v5303_v4 = vpop.f32.mrb[98].mxu1  ;;  %s7363_s22 = scalar_lea.vmem [#allocation10], %s4346_s15  ;;  %s7607_s6 = sld [smem:[#allocation22_spill]] }
 0x24e   : > { %v5252_v46 = vpop.f32.mrb[91].mxu0  ;;  %v5304_v12 = vpop.f32.mrb[99].mxu1  ;;  %s4173_s15 = sshll.u32 %s7363_s22, 4  ;;  %s4138_s18 = scalar_lea.sflag [#allocation11], %s6891_s7  ;;  %s7435_s15 = int_to_ptr.vmem [resolvable:$true] %s4173_s15 }
 0x24f   : > { %v3641_v41 = vadd.f32 %v5250_v62, %v6923_v38  ;;  %v5253_v54 = vadd.f32 %v5252_v46, %v5251_v10  ;;  %v7287_v50 = vadd.f32 %v5302_v34, %v7187_v49  ;;  %v5305_v51 = vadd.f32 %v5304_v12, %v5303_v4  ;;  %v5254_v55 = vpop.f32.mrb[92].mxu0  ;;  %v5306_v7 = vpop.f32.mrb[100].mxu1  ;;  %s5981_s27 = scalar_lea.vmem %s7435_s15, 1024  ;;  %s6121_s23 = smov [#allocation10]  }
 0x250   : > { %v5255_v48 = vpop.f32.mrb[93].mxu0  ;;  %v5307_v38 = vpop.f32.mrb[101].mxu1  ;;  %p5982_p9 = scmp.ne.s32.totalorder %s7435_s15, %s5981_s27  ;;  %s5985_s28 = sshll.u32 %s6121_s23, 4  ;;  %s5986_s28 = int_to_ptr.vmem [resolvable:$false] %s5985_s28 }
 0x251   : > { %v3644_v43 = vadd.f32 %v5253_v54, %v6948_v2  ;;  %v7290_v3 = vadd.f32 %v5305_v51, %v7202_v59  ;;  %v5256_v8 = vadd.f32 %v5255_v48, %v5254_v55  ;;  %v5257_v39 = vpop.f32.mrb[94].mxu0  ;;  %v5308_v31 = vadd.f32 %v5307_v38, %v5306_v7  ;;  %v5309_v29 = vpop.f32.mrb[102].mxu1  ;;  %s5987_s8 = scalar_lea.vmem %s5986_s28, 2048  ;;  %p5988_p5 = scmp.lt.s32.totalorder %s7435_s15, %s5986_s28 }
 0x252   : > { %v5258_v27 = vpop.f32.mrb[95].mxu0  ;;  %v5310_v2 = vpop.f32.mrb[103].mxu1  ;;  %p5983_p11 = pnand %p5982_p9, %p7603_p3  ;;  %p5989_p8 = scmp.lt.s32.totalorder %s5987_s8, %s5981_s27 }
 0x253   : > { %v3649_v35 = vadd.f32 %v5256_v8, %v6976_v53  ;;  %v5259_v22 = vadd.f32 %v5258_v27, %v5257_v39  ;;  %v7295_v1 = vadd.f32 %v5308_v31, %v7247_v19  ;;  %v5311_v16 = vadd.f32 %v5310_v2, %v5309_v29  ;;  %v5260_v59 = vpop.f32.mrb[96].mxu0  ;;  %v5312_v36 = vpop.f32.mrb[104].mxu1  ;;  %s7433_s10 = scalar_lea.hbm %s7607_s6, %s4748_s21 }
 0x254   : > { %v5261_v20 = vpop.f32.mrb[97].mxu0  ;;  %v5313_v53 = vpop.f32.mrb[105].mxu1  ;;  %p5984_p0 = pneg %p5983_p11  ;;  %p5990_p12 = por %p5989_p8, %p5988_p5 }
 0x255   : > { %v3652_v49 = vadd.f32 %v5259_v22, %v6996_v42  ;;  %v7298_v15 = vadd.f32 %v5311_v16, %v7253_v25  ;;  %v5262_v6 = vadd.f32 %v5261_v20, %v5260_v59  ;;  %v5263_v18 = vpop.f32.mrb[98].mxu0  ;;  %v5314_v26 = vadd.f32 %v5313_v53, %v5312_v36  ;;  %v5315_v46 = vpop.f32.mrb[106].mxu1 }
 0x256   : > { %v5264_v14 = vpop.f32.mrb[99].mxu0  ;;  %v5316_v42 = vpop.f32.mrb[107].mxu1  ;;  %p5991_p2 = pnand %p5990_p12, %p5984_p0 }
 0x257   : > { %v3657_v62 = vadd.f32 %v5262_v6, %v7059_v44  ;;  %v5265_v10 = vadd.f32 %v5264_v14, %v5263_v18  ;;  %v7302_v37 = vadd.f32 %v5314_v26, %v3641_v41  ;;  %v5317_v54 = vadd.f32 %v5316_v42, %v5315_v46  ;;  %v5266_v34 = vpop.f32.mrb[100].mxu0 }
 0x258   : > { %v5267_v4 = vpop.f32.mrb[101].mxu0 }
 0x259   : > { %v3660_v19 = vadd.f32 %v5265_v10, %v7067_v23  ;;  %v7304_v25 = vadd.f32 %v5317_v54, %v3644_v43  ;;  %v5268_v12 = vadd.f32 %v5267_v4, %v5266_v34  ;;  %v5269_v51 = vpop.f32.mrb[102].mxu0 }
 0x25a   : > { %v5318_v55 = vpop.f32.mrb[108].mxu1  ;;  %v5270_v48 = vpop.f32.mrb[103].mxu0 }
 0x25b   : > { %v5319_v8 = vpop.f32.mrb[109].mxu1  ;;  %v3665_v44 = vadd.f32 %v5268_v12, %v7128_v61  ;;  %v5271_v39 = vadd.f32 %v5270_v48, %v5269_v51  ;;  %v5272_v31 = vpop.f32.mrb[104].mxu0 }
 0x25c   : > { %v5320_v7 = vadd.f32 %v5319_v8, %v5318_v55  ;;  %v5321_v27 = vpop.f32.mrb[110].mxu1  ;;  %v5273_v29 = vpop.f32.mrb[105].mxu0 }
 0x25d   : > { %v5322_v38 = vpop.f32.mrb[111].mxu1  ;;  %v3668_v23 = vadd.f32 %v5271_v39, %v7144_v60  ;;  %v5274_v2 = vadd.f32 %v5273_v29, %v5272_v31  ;;  %v5275_v16 = vpop.f32.mrb[106].mxu0 }
 0x25e   : > { %v7308_v41 = vadd.f32 %v5320_v7, %v3649_v35  ;;  %v5323_v22 = vadd.f32 %v5322_v38, %v5321_v27  ;;  %v5276_v20 = vpop.f32.mrb[107].mxu0 }
 0x25f   : > { %v3673_v61 = vadd.f32 %v5274_v2, %v7198_v13  ;;  %v5277_v18 = vadd.f32 %v5276_v20, %v5275_v16  ;;  %v5278_v26 = vpop.f32.mrb[108].mxu0 }
 0x260   : > { %v7310_v43 = vadd.f32 %v5323_v22, %v3652_v49  ;;  %v5279_v46 = vpop.f32.mrb[109].mxu0 }
 0x261   : > { %v3676_v60 = vadd.f32 %v5277_v18, %v7204_v56  ;;  %v5280_v42 = vadd.f32 %v5279_v46, %v5278_v26  ;;  %v5281_v54 = vpop.f32.mrb[110].mxu0 }
 0x262   : > { %v5324_v59 = vpop.f32.mrb[112].mxu1  ;;  %v5282_v4 = vpop.f32.mrb[111].mxu0 }
 0x263   : > { %v5325_v6 = vpop.f32.mrb[113].mxu1  ;;  %v3681_v13 = vadd.f32 %v5280_v42, %v7249_v21  ;;  %v5283_v51 = vadd.f32 %v5282_v4, %v5281_v54 }
 0x264   : > { %v5326_v36 = vadd.f32 %v5325_v6, %v5324_v59  ;;  %v5327_v14 = vpop.f32.mrb[114].mxu1 }
 0x265   : > { %v5328_v53 = vpop.f32.mrb[115].mxu1  ;;  %v3684_v56 = vadd.f32 %v5283_v51, %v7255_v63 }
 0x266   : > { %v7314_v35 = vadd.f32 %v5326_v36, %v3657_v62  ;;  %v5329_v10 = vadd.f32 %v5328_v53, %v5327_v14  ;;  %v5364_v7 = vpop.f32.mrb[112].mxu0 }
 0x267   : > { %v5365_v27 = vpop.f32.mrb[113].mxu0 }
 0x268   : > { %v7316_v49 = vadd.f32 %v5329_v10, %v3660_v19  ;;  %v5366_v38 = vadd.f32 %v5365_v27, %v5364_v7  ;;  %v5367_v22 = vpop.f32.mrb[114].mxu0  ;;  %v7336_v27 = vld [vmem:[#allocation8 + $0x4] ss:$0 sm:$0xff] }
 0x269   : > { %v5368_v29 = vpop.f32.mrb[115].mxu0 }
 0x26a   : > { %v5330_v34 = vpop.f32.mrb[116].mxu1  ;;  %v5369_v16 = vadd.f32 %v5368_v29, %v5367_v22  ;;  %v3819_v20 = vadd.f32 %v5366_v38, %v7287_v50 }
 0x26b   : > { %v5331_v12 = vpop.f32.mrb[117].mxu1 }
 0x26c   : > { %v5332_v55 = vadd.f32 %v5331_v12, %v5330_v34  ;;  %v5333_v48 = vpop.f32.mrb[118].mxu1 }
 0x26d   : > { %v5334_v8 = vpop.f32.mrb[119].mxu1 }
 0x26e   : > { %v7320_v62 = vadd.f32 %v5332_v55, %v3665_v44  ;;  %v5335_v39 = vadd.f32 %v5334_v8, %v5333_v48  ;;  %v3822_v44 = vadd.f32 %v5369_v16, %v7290_v3  ;;  %v5370_v36 = vpop.f32.mrb[116].mxu0 }
 0x26f   : > { %v5371_v14 = vpop.f32.mrb[117].mxu0 }
 0x270   : > { %v7322_v19 = vadd.f32 %v5335_v39, %v3668_v23  ;;  %v5372_v53 = vadd.f32 %v5371_v14, %v5370_v36  ;;  %v5373_v10 = vpop.f32.mrb[118].mxu0 }
 0x271   : > { %v5374_v46 = vpop.f32.mrb[119].mxu0 }
 0x272   : > { %v5336_v31 = vpop.f32.mrb[120].mxu1  ;;  %v5375_v54 = vadd.f32 %v5374_v46, %v5373_v10  ;;  %v3827_v50 = vadd.f32 %v5372_v53, %v7295_v1  ;;  %v7338_v1 = vld [vmem:[#allocation8 + $0x5] ss:$0 sm:$0xff] }
 0x273   : > { %v5337_v2 = vpop.f32.mrb[121].mxu1 }
 0x274   : > { %v5338_v21 = vadd.f32 %v5337_v2, %v5336_v31  ;;  %v5339_v59 = vpop.f32.mrb[122].mxu1  ;;  %v3830_v3 = vadd.f32 %v5375_v54, %v7298_v15 }
 0x275   : > { %v5340_v6 = vpop.f32.mrb[123].mxu1 }
 0x276   : > { %v7325_v18 = vadd.f32 %v5338_v21, %v3673_v61  ;;  %v5341_v63 = vadd.f32 %v5340_v6, %v5339_v59  ;;  %v5376_v55 = vpop.f32.mrb[120].mxu0 }
 0x277   : > { %v5377_v48 = vpop.f32.mrb[121].mxu0 }
 0x278   : > { %v7328_v23 = vadd.f32 %v5341_v63, %v3676_v60  ;;  %v5378_v8 = vadd.f32 %v5377_v48, %v5376_v55  ;;  %v5379_v39 = vpop.f32.mrb[122].mxu0 }
 0x279   : > { %v5380_v38 = vpop.f32.mrb[123].mxu0 }
 0x27a   : > { %v5342_v26 = vpop.f32.mrb[124].mxu1  ;;  %v5381_v29 = vadd.f32 %v5380_v38, %v5379_v39  ;;  %v3835_v16 = vadd.f32 %v5378_v8, %v7302_v37 }
 0x27b   : > { %v5343_v42 = vpop.f32.mrb[125].mxu1 }
 0x27c   : > { %v5344_v34 = vadd.f32 %v5343_v42, %v5342_v26  ;;  %v5345_v4 = vpop.f32.mrb[126].mxu1  ;;  %v3838_v63 = vadd.f32 %v5381_v29, %v7304_v25 }
 0x27d   : > { %v5346_v12 = vpop.f32.mrb[127].mxu1 }
 0x27e   : > { %v7331_v61 = vadd.f32 %v5344_v34, %v3681_v13  ;;  %v5347_v51 = vadd.f32 %v5346_v12, %v5345_v4  ;;  %v5382_v53 = vpop.f32.mrb[124].mxu0 }
 0x27f   : > { %v5383_v26 = vpop.f32.mrb[125].mxu0 }
 0x280   : > { %v7334_v60 = vadd.f32 %v5347_v51, %v3684_v56  ;;  %v5384_v42 = vadd.f32 %v5383_v26, %v5382_v53  ;;  %v5385_v54 = vpop.f32.mrb[126].mxu0 }
 0x281   : > { %v5386_v25 = vpop.f32.mrb[127].mxu0 }
 0x282   : > { %v5478_v7 = vpop.f32.mrb[128].mxu1  ;;  %v5387_v51 = vadd.f32 %v5386_v25, %v5385_v54  ;;  %v3843_v55 = vadd.f32 %v5384_v42, %v7308_v41 }
 0x283   : > { %v3924_v22 = vadd.f32 %v5478_v7, %v3827_v50  ;;  %v3915_v31 = vpop.f32.mrb[129].mxu1 }
 0x284   : > { %v3916_v13 = vadd.f32 %v3915_v31, %v3819_v20  ;;  %v5479_v2 = vpop.f32.mrb[130].mxu1 }
 0x285   : > { %v3985_v15 = vmul.f32 %v7336_v27, %v3924_v22  ;;  %v3927_v56 = vadd.f32 %v5479_v2, %v3830_v3  ;;  %v3918_v21 = vpop.f32.mrb[131].mxu1  ;;  %v3846_v2 = vadd.f32 %v5387_v51, %v7310_v43 }
 0x286   : > { %v3983_v59 = vmul.f32 %v7336_v27, %v3916_v13  ;;  %v3919_v6 = vadd.f32 %v3918_v21, %v3822_v44 }
 0x287   : > { %v4006_v36 = vadd.f32 %v7338_v1, %v3985_v15  ;;  %v3986_v14 = vmul.f32 %v7336_v27, %v3927_v56  ;;  %v5388_v56 = vpop.f32.mrb[128].mxu0 }
 0x288   : > { %v4004_v10 = vadd.f32 %v7338_v1, %v3983_v59  ;;  %v3984_v20 = vmul.f32 %v7336_v27, %v3919_v6 }
 0x289   : > { %v4022_v37 = vmax.f32 %v4006_v36, 0.0  ;;  %v4007_v46 = vadd.f32 %v7338_v1, %v3986_v14 }
 0x28a   : > { %v4020_v34 = vmax.f32 %v4004_v10, 0.0  ;;  %v4005_v44 = vadd.f32 %v7338_v1, %v3984_v20  ;;  %v5482_v4 = vpop.f32.mrb[132].mxu1 }
 0x28b   : > { %v4023_v50 = vmax.f32 %v4007_v46, 0.0  ;;  %v3931_v12 = vpop.f32.mrb[133].mxu1  ;;  %v4038_v8 = vsel %vm6900_vm11, %v4022_v37, 0.0  ;;  %v3940_v13 = vadd.f32 %v5482_v4, %v3843_v55  ;;  %vm7604_vm11 = vnez %v7584_v32 }
 0x28c   : > { %v4021_v3 = vmax.f32 %v4005_v44, 0.0  ;;  %v5483_v48 = vpop.f32.mrb[134].mxu1  ;;  %v4036_v39 = vsel %vm6914_vm13, %v4020_v34, 0.0  ;;  %v3932_v38 = vadd.f32 %v3931_v12, %v3835_v16  ;;  %v5389_v16 = vpop.f32.mrb[129].mxu0  ;;  %vm7605_vm13 = vnez %v7578_v9 }
 0x28d   : > { %v4039_v7 = vsel %vm6930_vm14, %v4023_v50, 0.0  ;;  %v3934_v22 = vpop.f32.mrb[135].mxu1  ;;  %v3989_v5 = vmul.f32 %v7336_v27, %v3940_v13  ;;  %v3943_v30 = vadd.f32 %v5483_v48, %v3846_v2  ;;  %v5390_v21 = vadd.f32 %v5389_v16, %v5388_v56  ;;  %v5391_v59 = vpop.f32.mrb[130].mxu0 }
 0x28e   : > { %v4838_v31 = vpack.c.bf16 %v4039_v7, %v4038_v8  ;;  %v4037_v29 = vsel %vm6942_vm15, %v4021_v3, 0.0  ;;  %v3987_v15 = vmul.f32 %v7336_v27, %v3932_v38  ;;  %v3935_v28 = vadd.f32 %v3934_v22, %v3838_v63  ;;  %v5392_v14 = vpop.f32.mrb[131].mxu0 }
 0x28f   : > { %v4833_v41 = vpack.c.bf16 %v4037_v29, %v4036_v39  ;;  %v4010_v6 = vadd.f32 %v7338_v1, %v3989_v5  ;;  %v3990_v63 = vmul.f32 %v7336_v27, %v3943_v30  ;;  %v5393_v26 = vadd.f32 %v5392_v14, %v5391_v59  ;;  %v5394_v55 = vpop.f32.mrb[132].mxu0 }
 0x290   : > { %4877 = vst [vmem:[%s7363_s22 + $0x8] sm:$0xff] %v4838_v31   ;;  %v4008_v58 = vadd.f32 %v7338_v1, %v3987_v15  ;;  %v3988_v43 = vmul.f32 %v7336_v27, %v3935_v28  ;;  %v3851_v42 = vadd.f32 %v5390_v21, %v7314_v35  ;;  %v5395_v7 = vpop.f32.mrb[133].mxu0  ;;  %vm7606_vm14 = vnez %v7582_v24 }
 0x291   : > { %4834 = vst [vmem:[%s7363_s22] sm:$0xff] %v4833_v41   ;;  %v4026_v37 = vmax.f32 %v4010_v6, 0.0  ;;  %v4011_v46 = vadd.f32 %v7338_v1, %v3990_v63  ;;  %v3854_v50 = vadd.f32 %v5393_v26, %v7316_v49  ;;  %v5396_v38 = vadd.f32 %v5395_v7, %v5394_v55  ;;  %v5397_v52 = vpop.f32.mrb[134].mxu0 }
 0x292   : > { %v5486_v36 = vpop.f32.mrb[136].mxu1  ;;  %v4024_v53 = vmax.f32 %v4008_v58, 0.0  ;;  %v4009_v10 = vadd.f32 %v7338_v1, %v3988_v43  ;;  %v5398_v33 = vpop.f32.mrb[135].mxu0 }
 0x293   : > { %v3947_v20 = vpop.f32.mrb[137].mxu1  ;;  %v4027_v4 = vmax.f32 %v4011_v46, 0.0  ;;  %v4042_v12 = vsel %vm7012_vm8, %v4026_v37, 0.0  ;;  %v5399_v13 = vadd.f32 %v5398_v33, %v5397_v52  ;;  %v3859_v45 = vadd.f32 %v5396_v38, %v7320_v62 }
 0x294   : > { %v5487_v54 = vpop.f32.mrb[138].mxu1  ;;  %v4025_v34 = vmax.f32 %v4009_v10, 0.0  ;;  %v3948_v25 = vadd.f32 %v3947_v20, %v3851_v42  ;;  %v4040_v51 = vsel %vm7035_vm1, %v4024_v53, 0.0 }
 0x295   : > { %v3950_v44 = vpop.f32.mrb[139].mxu1  ;;  %v4043_v35 = vsel %vm7024_vm12, %v4027_v4, 0.0  ;;  %v3956_v56 = vadd.f32 %v5486_v36, %v3859_v45  ;;  %v3862_v5 = vadd.f32 %v5399_v13, %v7322_v19 }
 0x296   : > { %v4041_v3 = vsel %vm7045_vm2, %v4025_v34, 0.0  ;;  %v3991_v8 = vmul.f32 %v7336_v27, %v3948_v25  ;;  %v3951_v39 = vadd.f32 %v3950_v44, %v3854_v50  ;;  %v4848_v49 = vpack.c.bf16 %v4043_v35, %v4042_v12  ;;  %v5400_v16 = vpop.f32.mrb[136].mxu0 }
 0x297   : > { %v4843_v48 = vpack.c.bf16 %v4041_v3, %v4040_v51  ;;  %v3993_v58 = vmul.f32 %v7336_v27, %v3956_v56  ;;  %v3959_v21 = vadd.f32 %v5487_v54, %v3862_v5  ;;  %v5401_v59 = vpop.f32.mrb[137].mxu0 }
 0x298   : > { %v4012_v0 = vadd.f32 %v7338_v1, %v3991_v8  ;;  %v3992_v22 = vmul.f32 %v7336_v27, %v3951_v39  ;;  %4879 = vst [vmem:[%s7363_s22 + $0x18] sm:$0xff] %v4848_v49   ;;  %v5402_v14 = vadd.f32 %v5401_v59, %v5400_v16  ;;  %v5403_v53 = vpop.f32.mrb[138].mxu0 }
 0x299   : > { %4878 = vst [vmem:[%s7363_s22 + $0x10] sm:$0xff] %v4843_v48   ;;  %v4014_v63 = vadd.f32 %v7338_v1, %v3993_v58  ;;  %v3994_v36 = vmul.f32 %v7336_v27, %v3959_v21  ;;  %v5404_v19 = vpop.f32.mrb[139].mxu0 }
 0x29a   : > { %v5490_v31 = vpop.f32.mrb[140].mxu1  ;;  %v4028_v2 = vmax.f32 %v4012_v0, 0.0  ;;  %v4013_v41 = vadd.f32 %v7338_v1, %v3992_v22  ;;  %v5405_v26 = vadd.f32 %v5404_v19, %v5403_v53  ;;  %v3867_v47 = vadd.f32 %v5402_v14, %v7325_v18 }
 0x29b   : > { %v3963_v29 = vpop.f32.mrb[141].mxu1  ;;  %v4030_v10 = vmax.f32 %v4014_v63, 0.0  ;;  %v4015_v20 = vadd.f32 %v7338_v1, %v3994_v36 }
 0x29c   : > { %v5491_v15 = vpop.f32.mrb[142].mxu1  ;;  %v4029_v30 = vmax.f32 %v4013_v41, 0.0  ;;  %v4044_v43 = vsel %vm7110_vm4, %v4028_v2, 0.0  ;;  %v3964_v32 = vadd.f32 %v3963_v29, %v3867_v47  ;;  %v3870_v46 = vadd.f32 %v5405_v26, %v7328_v23 }
 0x29d   : > { %v3966_v28 = vpop.f32.mrb[143].mxu1  ;;  %v4031_v37 = vmax.f32 %v4015_v20, 0.0  ;;  %v4046_v42 = vsel %vm7605_vm13, %v4030_v10, 0.0 }
 0x29e   : > { %v4045_v62 = vsel %vm7604_vm11, %v4029_v30, 0.0  ;;  %v5406_v34 = vpop.f32.mrb[140].mxu0  ;;  %v3995_v44 = vmul.f32 %v7336_v27, %v3964_v32  ;;  %v3967_v4 = vadd.f32 %v3966_v28, %v3870_v46 }
 0x29f   : > { %v4853_v6 = vpack.c.bf16 %v4045_v62, %v4044_v43  ;;  %v4047_v54 = vsel %vm7606_vm14, %v4031_v37, 0.0  ;;  %v5407_v50 = vpop.f32.mrb[141].mxu0 }
 0x2a0   : > { %v4858_v25 = vpack.c.bf16 %v4047_v54, %v4046_v42  ;;  %v5408_v12 = vadd.f32 %v5407_v50, %v5406_v34  ;;  %v4016_v51 = vadd.f32 %v7338_v1, %v3995_v44  ;;  %v5409_v18 = vpop.f32.mrb[142].mxu0  ;;  %v3996_v3 = vmul.f32 %v7336_v27, %v3967_v4 }
 0x2a1   : > { %4880 = vst [vmem:[%s7363_s22 + $0x20] sm:$0xff] %v4853_v6   ;;  %v5410_v23 = vpop.f32.mrb[143].mxu0 }
 0x2a2   : > { %4881 = vst [vmem:[%s7363_s22 + $0x28] sm:$0xff] %v4858_v25   ;;  %v3875_v9 = vadd.f32 %v5408_v12, %v7331_v61  ;;  %v4032_v55 = vmax.f32 %v4016_v51, 0.0  ;;  %v5411_v24 = vadd.f32 %v5410_v23, %v5409_v18  ;;  %v4017_v35 = vadd.f32 %v7338_v1, %v3996_v3 }
 0x2a4   : > { %v3972_v48 = vadd.f32 %v5490_v31, %v3875_v9  ;;  %v3878_v8 = vadd.f32 %v5411_v24, %v7334_v60  ;;  %v4033_v39 = vmax.f32 %v4017_v35, 0.0  ;;  %v4048_v49 = vsel %vm7210_vm10, %v4032_v55, 0.0 }
 0x2a6   : > { %v3997_v7 = vmul.f32 %v7336_v27, %v3972_v48  ;;  %v3975_v38 = vadd.f32 %v5491_v15, %v3878_v8  ;;  %v4049_v61 = vsel %vm7218_vm7, %v4033_v39, 0.0 }
 0x2a7   : > { %v4863_v52 = vpack.c.bf16 %v4049_v61, %v4048_v49 }
 0x2a8   : > { %v4018_v0 = vadd.f32 %v7338_v1, %v3997_v7  ;;  %v3998_v22 = vmul.f32 %v7336_v27, %v3975_v38 }
 0x2a9   : > { %4882 = vst [vmem:[%s7363_s22 + $0x30] sm:$0xff] %v4863_v52  }
 0x2aa   : > { %v4034_v60 = vmax.f32 %v4018_v0, 0.0  ;;  %v4019_v31 = vadd.f32 %v7338_v1, %v3998_v22 }
 0x2ac   : > { %v4035_v33 = vmax.f32 %v4019_v31, 0.0  ;;  %v4050_v17 = vsel %vm7180_vm9, %v4034_v60, 0.0 }
 0x2ae   : > { %v4051_v40 = vsel %vm7193_vm0, %v4035_v33, 0.0 }
 0x2af   : > { %v4868_v29 = vpack.c.bf16 %v4051_v40, %v4050_v17 }
 0x2b1   : > { %4883 = vst [vmem:[%s7363_s22 + $0x38] sm:$0xff] %v4868_v29  }
 0x2b2   : > { %5994 = shalt.err (!%p5991_p2)
}
 0x2b3   : > { %s5995_s21 = scalar_lea.hbm %s7433_s10, 1024  ;;  %s5999_s26 = scalar_lea.hbm %s7607_s6, 4096 }
 0x2b4   : > { %p5996_p6 = scmp.ne.s32.totalorder %s7433_s10, %s5995_s21  ;;  %p6000_p4 = scmp.lt.u32.totalorder %s7433_s10, %s7607_s6 }
 0x2b5   : > { %p6001_p7 = scmp.lt.u32.totalorder %s5999_s26, %s5995_s21  ;;  %p6003_p9 = scmp.lt.u32.totalorder %s5995_s21, %s7433_s10 }
 0x2b6   : > { %p5997_p10 = pnand %p5996_p6, %p7603_p3 }
 0x2b7   : > { %p6002_p13 = por %p6001_p7, %p6000_p4 }
 0x2b8   : > { %p5998_p1 = pneg %p5997_p10 }
 0x2b9   : > { %p6004_p11 = por %p6003_p9, %p6002_p13 }
 0x2bb   : > { %p6005_p0 = pnand %p6004_p11, %p5998_p1 }
 0x2bd   : > { %6008 = shalt.err (!%p6005_p0)
}
 0x2be   : > { %5506 = dma.vmem_to_hbm [thread:$0]  (%p7603_p3), %s7435_s15, 1024, %s7433_s10, %s4138_s18, %s6119_s11, %s6119_s11, %s6120_s4  }
 0x2bf PF: > { %s7608_s13 = sld [smem:[#allocation16_spill]]  ;;  %s7609_s1 = sld [smem:[#allocation18_spill]] }
 0x2c0   : > { %p5532_p5 = scmp.ge.s32.totalorder %s6111_s25, 2 }
 0x2c5   : > { %s4188_s27 = sand.u32 1, %s7608_s13   ;;  %p7610_p8 = scmp.ne.s32.totalorder %s7609_s1, 0 }
 0x2c6   : > { %s4189_s23 = scalar_lea.sflag [#allocation5], %s4188_s27 }
 0x2c7   : > { %p5521_p12 = pnand %p5532_p5, %p7610_p8 }
 0x2c9   : > { %6062 = dma.done.wait (!%p5521_p12), %s4189_s23, 1024  }
 0x2ca   : > { %6064 = vsyncadd (!%p5521_p12), %s4189_s23, 4294966272  ;;  %s4198_s5 = scalar_lea.sflag [#allocation11], %s4188_s27 }
 0x2cb   : > { %6066 = dma.done.wait (!%p5521_p12), %s4198_s5, 1024  }
 0x2cc   : > { %6068 = vsyncadd (!%p5521_p12), %s4198_s5, 4294966272  ;;  %s25_s25 = sadd.s32 1, %s6111_s25   ;;  %s7611_s21 = sld [smem:[#allocation17_spill]] }
 0x2cd   : > { %p22_p2 = scmp.ge.s32.totalorder %s25_s25, 6   ;;  %s7612_s23 = sld [smem:[#allocation19_spill]] }
 0x2ce   : > { %s7613_s15 = smov %s6075_s16  ;;  %s7614_s16 = smov %s6079_s17 }
 0x2cf   : > { %s7615_s17 = smov %s6325_s2  ;;  %s7616_s18 = smov %s6087_s19 }
 0x2d0   : > { %s7617_s19 = smov %s6091_s20  ;;  %s7618_s20 = smov %s6320_s14 }
 0x2d1   : > { %s7619_s22 = smov %s6107_s24  ;;  %s7620_s24 = smov %s7626_s29 }
 0x2d2   :  { %24 = sbr.rel (!%p22_p2) target bundleno = 16 (0x10), region = 109 }
 0x2d9   :  { %4203 = vsyncpa [#allocation4], 1 }
 0x2da   :  { %4205 = vsyncpa [#allocation4 + $0x1], 1 }
 0x2db   :  { %4206 = vsyncpa [#allocation7], 1 }
 0x2dc   :  { %4207 = vsyncpa [#allocation5], 1 }
 0x2dd   :  { %4209 = vsyncpa [#allocation5 + $0x1], 1 }
 0x2de   :  { %4210 = vsyncpa [#allocation11], 1 }
 0x2df   :  { %4212 = vsyncpa [#allocation11 + $0x1], 1 }

</bundles_post_ra>
